<compile_context>
chip_gen: v7x
topology: tpu7x:2x2x1
jax: 0.10.0
libtpu: 0.0.40
codegen_flags: <defaults>
</compile_context>

<pallas_src>
import functools
import math

import jax
import jax.numpy as jnp
from jax.experimental import pallas as pl
from jax.experimental.pallas import tpu as pltpu


def _layernorm(x, gamma, beta, eps=1e-5):
    mu = jnp.mean(x, axis=-1, keepdims=True)
    xc = x - mu
    var = jnp.mean(xc * xc, axis=-1, keepdims=True)
    return xc * jax.lax.rsqrt(var + eps) * gamma + beta


def transformer_block_kernel(heads, causal, has_mask, with_attn, *refs):
    idx = 0
    query_ref = refs[idx]; idx += 1            # (1, TQ, E) f32
    kt_ref = refs[idx]; idx += 1               # (1, E, S)  bf16 (pre-transposed K)
    v_ref = refs[idx]; idx += 1                # (1, S, E)  bf16
    mask_ref = None
    if has_mask:
        mask_ref = refs[idx]; idx += 1         # (1, 1, TQ, S) bf16
    (wo_ref, bo_ref, g1_ref, be1_ref,
     w1_ref, b1_ref, w2_ref, b2_ref,
     g2_ref, be2_ref) = refs[idx:idx + 10]; idx += 10
    out_ref = refs[idx]; idx += 1
    attn_ref = None
    if with_attn:
        attn_ref = refs[idx]; idx += 1
    concat_ref = refs[idx]                     # (TQ, E) f32 VMEM scratch

    E = query_ref.shape[-1]
    D = E // heads
    TQ = query_ref.shape[1]
    S = v_ref.shape[1]
    bf16 = jnp.bfloat16

    query = query_ref[0]                                   # (TQ, E) f32, residual
    # Fold 1/sqrt(D) into q once (outside the head loop), cast for the MXU.
    q_bf = (query * (1.0 / math.sqrt(D))).astype(bf16)     # (TQ, E) bf16
    kt = kt_ref[0]                                         # (E, S) bf16
    v = v_ref[0]                                           # (S, E) bf16

    # Additive mask (PyTorch: masked_fill(-1e20)), hoisted out of the head loop.
    if causal:
        row = (pl.program_id(1) * TQ
               + jax.lax.broadcasted_iota(jnp.int32, (TQ, S), 0))
        col = jax.lax.broadcasted_iota(jnp.int32, (TQ, S), 1)
        neg_bias = jnp.where(col <= row, jnp.float32(0.0), jnp.float32(-1e20))
    elif has_mask:
        neg_bias = jnp.where(mask_ref[0, 0] == 0,
                             jnp.float32(-1e20), jnp.float32(0.0))
    else:
        neg_bias = None

    # TODO(synk): for very large head counts switch this static unroll to a
    # lax.fori_loop writing into concat_ref to bound live ranges.
    for h in range(heads):                                 # static unroll, H small
        sl = slice(h * D, (h + 1) * D)
        # scores = (q / sqrt(D)) @ K^T : (TQ, D) @ (D, S), bf16 MXU, f32 accum.
        s = jnp.dot(q_bf[:, sl], kt[sl, :],
                    preferred_element_type=jnp.float32)    # (TQ, S)
        if neg_bias is not None:
            s = s + neg_bias
        m = jnp.max(s, axis=-1, keepdims=True)
        p = jnp.exp(s - m)
        denom = jnp.sum(p, axis=-1, keepdims=True)
        a = p * pl.reciprocal(denom, approx=True)          # softmax (EUP recip)
        if attn_ref is not None:
            attn_ref[0, h] = a.astype(attn_ref.dtype)
        # PV: (TQ, S) @ (S, D); write straight into the concat scratch.
        concat_ref[:, sl] = jnp.dot(a.astype(bf16), v[:, sl],
                                    preferred_element_type=jnp.float32)

    # One (TQ, E) @ (E, E) fc_out matmul over the concatenated heads.
    attn_out = jnp.dot(concat_ref[...].astype(bf16), wo_ref[...],
                       preferred_element_type=jnp.float32) + bo_ref[0]

    # TODO(synk): nn.Dropout is treated as identity (inference / eval mode).
    x = _layernorm(attn_out + query, g1_ref[0], be1_ref[0])

    h1 = jnp.dot(x.astype(bf16), w1_ref[...],
                 preferred_element_type=jnp.float32) + b1_ref[0]
    h1 = jnp.maximum(h1, 0.0)                              # ReLU
    ff = jnp.dot(h1.astype(bf16), w2_ref[...],
                 preferred_element_type=jnp.float32) + b2_ref[0]

    out = _layernorm(ff + x, g2_ref[0], be2_ref[0])
    out_ref[0] = out.astype(out_ref.dtype)


def _tpu_hw():
    """(physical VMEM bytes, has 256-wide MXU) with conservative fallbacks."""
    kind = ""
    try:
        kind = jax.devices()[0].device_kind.lower()
    except Exception:
        pass
    wide_mxu = ("v6" in kind) or ("v7" in kind)
    vmem_bytes = None
    try:
        vmem_bytes = int(pltpu.get_tpu_info().vmem_capacity_bytes)
    except Exception:
        vmem_bytes = None
    if not vmem_bytes:
        vmem_bytes = (64 if "v7" in kind else 128) * 1024 * 1024
    return vmem_bytes, wide_mxu


def transformer_block(value, key, query, mask, params, heads, *,
                      q_tile=None, causal=False, return_attention=False,
                      attn_dtype=jnp.float32, out_dtype=jnp.float32):
    N, S, E = query.shape
    assert E % heads == 0, "Embedding size must be divisible by heads"
    F = params["w1_t"].shape[1]
    bf16 = jnp.bfloat16

    vmem_bytes, wide_mxu = _tpu_hw()
    # Leave headroom: ~75% of physical VMEM (96 MiB v5e/v6e, 48 MiB v7x).
    vmem_limit = max(32, min(100, (vmem_bytes * 3 // 4) // (1024 * 1024)))
    vmem_limit *= 1024 * 1024

    if q_tile is None:
        pref = 256 if wide_mxu else 128          # v6e/v7x MXU is 256 wide
        if S <= pref:
            q_tile = S
        elif S % pref == 0:
            q_tile = pref
        elif S % 128 == 0:
            q_tile = 128
        else:
            q_tile = pref                        # pad the query axis below

    nq = -(-S // q_tile)
    S_pad = nq * q_tile

    has_mask = (not causal) and (mask is not None)

    q_in = query
    mask_in = mask
    if S_pad != S:                               # pad query rows only (keys stay S)
        q_in = jnp.pad(query, ((0, 0), (0, S_pad - S), (0, 0)))
        if has_mask:
            mask_in = jnp.pad(mask, ((0, 0), (0, 0), (0, S_pad - S), (0, 0)),
                              constant_values=1.0)

    kt_bf = jnp.swapaxes(key, 1, 2).astype(bf16)   # (N, E, S): sublane head slices
    v_bf = value.astype(bf16)

    def build(single_buffer_consts):
        def const_spec(shape):
            nd = len(shape)
            kw = {}
            if single_buffer_consts:
                # Revisited every grid step, never re-DMA'd: no double buffer.
                kw["pipeline_mode"] = pl.Buffered(1)
            return pl.BlockSpec(shape, lambda n, qi, _nd=nd: (0,) * _nd, **kw)

        in_specs = [
            pl.BlockSpec((1, q_tile, E), lambda n, qi: (n, qi, 0)),    # query f32
            pl.BlockSpec((1, E, S), lambda n, qi: (n, 0, 0)),          # K^T  bf16
            pl.BlockSpec((1, S, E), lambda n, qi: (n, 0, 0)),          # V    bf16
        ]
        if has_mask:
            in_specs.append(
                pl.BlockSpec((1, 1, q_tile, S), lambda n, qi: (0, 0, qi, 0)))
        in_specs += [
            const_spec((E, E)), const_spec((1, E)),      # fc_out W^T, b
            const_spec((1, E)), const_spec((1, E)),      # ln1 gamma, beta
            const_spec((E, F)), const_spec((1, F)),      # ff W1^T, b1
            const_spec((F, E)), const_spec((1, E)),      # ff W2^T, b2
            const_spec((1, E)), const_spec((1, E)),      # ln2 gamma, beta
        ]
        out_specs = [pl.BlockSpec((1, q_tile, E), lambda n, qi: (n, qi, 0))]
        out_shape = [jax.ShapeDtypeStruct((N, S_pad, E), out_dtype)]
        if return_attention:
            out_specs.append(
                pl.BlockSpec((1, heads, q_tile, S), lambda n, qi: (n, 0, qi, 0)))
            out_shape.append(
                jax.ShapeDtypeStruct((N, heads, S_pad, S), attn_dtype))

        # Shard the megacore on the batch axis when possible so each core keeps
        # its own K/V resident instead of re-DMA-ing them per qi split.
        dim_sem = ("parallel", "arbitrary") if N >= 2 else ("parallel", "parallel")

        return pl.pallas_call(
            functools.partial(transformer_block_kernel,
                              heads, causal, has_mask, return_attention),
            grid=(N, nq),
            in_specs=in_specs,
            out_specs=out_specs,
            out_shape=out_shape,
            scratch_shapes=[pltpu.VMEM((q_tile, E), jnp.float32)],
            compiler_params=pltpu.CompilerParams(
                dimension_semantics=dim_sem,
                vmem_limit_bytes=int(vmem_limit),
            ),
        )

    args = [q_in, kt_bf, v_bf]
    if has_mask:
        args.append(mask_in.astype(bf16))
    args += [
        params["wo_t"].astype(bf16), params["bo"],
        params["g1"], params["be1"],
        params["w1_t"].astype(bf16), params["b1"],
        params["w2_t"].astype(bf16), params["b2"],
        params["g2"], params["be2"],
    ]

    try:
        results = build(single_buffer_consts=True)(*args)
    except Exception:
        # Fallback for JAX versions without BlockSpec(pipeline_mode=Buffered(1)).
        results = build(single_buffer_consts=False)(*args)

    out = results[0]
    attn = results[1] if return_attention else None
    if S_pad != S:
        out = out[:, :S]
        if attn is not None:
            attn = attn[:, :, :S]
    return out, attn


def _linear_init(key_, fan_in, fan_out):
    bound = 1.0 / math.sqrt(fan_in)
    kw, kb = jax.random.split(key_)
    w = jax.random.uniform(kw, (fan_out, fan_in), jnp.float32, -bound, bound)
    b = jax.random.uniform(kb, (fan_out,), jnp.float32, -bound, bound)
    return w, b


def _reference(value, key, query, mask, params, heads):
    """Pure-JAX port of the PyTorch forward (dropout = identity) using the same
    bf16-on-MXU / f32-accumulate precision policy as the kernel."""
    N, S, E = query.shape
    D = E // heads
    bf16 = jnp.bfloat16

    def split(x):
        return x.reshape(N, S, heads, D).transpose(0, 2, 1, 3)

    q = split(query * (1.0 / math.sqrt(D))).astype(bf16)
    k = split(key.astype(bf16))
    v = split(value.astype(bf16))
    energy = jnp.einsum('nhqd,nhkd->nhqk', q, k,
                        preferred_element_type=jnp.float32)
    energy = energy + jnp.where(mask == 0.0, -1e20, 0.0)
    attn = jax.nn.softmax(energy, axis=-1)
    o = jnp.einsum('nhqk,nhkd->nhqd', attn.astype(bf16), v,
                   preferred_element_type=jnp.float32)
    o = o.transpose(0, 2, 1, 3).reshape(N, S, E)
    o = (jnp.dot(o.astype(bf16), params["wo_t"].astype(bf16),
                 preferred_element_type=jnp.float32) + params["bo"][0])

    def ln(x, g, b):
        mu = x.mean(-1, keepdims=True)
        xc = x - mu
        var = (xc * xc).mean(-1, keepdims=True)
        return xc * jax.lax.rsqrt(var + 1e-5) * g[0] + b[0]

    x = ln(o + query, params["g1"], params["be1"])
    h1 = jnp.maximum(
        jnp.dot(x.astype(bf16), params["w1_t"].astype(bf16),
                preferred_element_type=jnp.float32) + params["b1"][0], 0.0)
    ff = (jnp.dot(h1.astype(bf16), params["w2_t"].astype(bf16),
                  preferred_element_type=jnp.float32) + params["b2"][0])
    out = ln(ff + x, params["g2"], params["be2"])
    return out, attn


if __name__ == "__main__":
    N, S, E, heads, expansion = 2, 8, 32, 4, 4
    D, F = E // heads, expansion * E

    root = jax.random.PRNGKey(0)
    k_in, k_wo, k_w1, k_w2 = jax.random.split(root, 4)

    kq, kk, kv = jax.random.split(k_in, 3)
    query = jax.random.normal(kq, (N, S, E), jnp.float32)
    key_in = jax.random.normal(kk, (N, S, E), jnp.float32)
    value = jax.random.normal(kv, (N, S, E), jnp.float32)
    mask = jnp.tril(jnp.ones((S, S), jnp.float32))[None, None]   # (1,1,S,S) causal

    wo, bo = _linear_init(k_wo, E, E)          # fc_out
    w1, b1 = _linear_init(k_w1, E, F)          # feed_forward[0]
    w2, b2 = _linear_init(k_w2, F, E)          # feed_forward[2]

    params = dict(
        wo_t=wo.T, bo=bo[None, :],
        g1=jnp.ones((1, E), jnp.float32), be1=jnp.zeros((1, E), jnp.float32),
        w1_t=w1.T, b1=b1[None, :],
        w2_t=w2.T, b2=b2[None, :],
        g2=jnp.ones((1, E), jnp.float32), be2=jnp.zeros((1, E), jnp.float32),
    )

    ref_out, ref_attn = _reference(value, key_in, query, mask, params, heads)

    # Perf-default path: no probs writeback, causal mask generated in-kernel.
    out_fast, _ = transformer_block(value, key_in, query, None, params, heads,
                                    causal=True, return_attention=False)
    out_fast = jax.block_until_ready(out_fast)
    assert jnp.allclose(out_fast, ref_out, atol=2e-2, rtol=2e-2), \
        float(jnp.max(jnp.abs(out_fast - ref_out)))

    # Full path: explicit dense mask (DMA'd as bf16) + attention-probs output.
    out, attn = transformer_block(value, key_in, query, mask, params, heads,
                                  causal=False, return_attention=True)
    out = jax.block_until_ready(out)
    attn = jax.block_until_ready(attn)
    assert jnp.allclose(out, ref_out, atol=2e-2, rtol=2e-2), \
        float(jnp.max(jnp.abs(out - ref_out)))
    assert jnp.allclose(attn, ref_attn, atol=2e-2, rtol=2e-2), \
        float(jnp.max(jnp.abs(attn - ref_attn)))

    print("KERNEL_OK")
</pallas_src>

<mosaic_0001>
module attributes {stable_mosaic.version = 11 : i64} {
  func.func @transformer_block_kernel(%arg0: i32, %arg1: i32, %arg2: memref<1x8x32xf32, #tpu.memory_space<vmem>>, %arg3: memref<1x32x8xbf16, #tpu.memory_space<vmem>>, %arg4: memref<1x8x32xbf16, #tpu.memory_space<vmem>>, %arg5: memref<32x32xbf16, #tpu.memory_space<vmem>>, %arg6: memref<1x32xf32, #tpu.memory_space<vmem>>, %arg7: memref<1x32xf32, #tpu.memory_space<vmem>>, %arg8: memref<1x32xf32, #tpu.memory_space<vmem>>, %arg9: memref<32x128xbf16, #tpu.memory_space<vmem>>, %arg10: memref<1x128xf32, #tpu.memory_space<vmem>>, %arg11: memref<128x32xbf16, #tpu.memory_space<vmem>>, %arg12: memref<1x32xf32, #tpu.memory_space<vmem>>, %arg13: memref<1x32xf32, #tpu.memory_space<vmem>>, %arg14: memref<1x32xf32, #tpu.memory_space<vmem>>, %arg15: memref<1x8x32xf32, #tpu.memory_space<vmem>>, %arg16: memref<8x32xf32, #tpu.memory_space<vmem>>) attributes {dimension_semantics = [#tpu.dimension_semantics<parallel>, #tpu.dimension_semantics<arbitrary>], iteration_bounds = array<i64: 2, 1>, scalar_prefetch = 0 : i64, scratch_operands = 1 : i64, tpu.core_type = #tpu.core_type<tc>, window_params = [{transform_indices = @transform_0, window_bounds = array<i64: 1, 8, 32>}, {transform_indices = @transform_1, window_bounds = array<i64: 1, 32, 8>}, {transform_indices = @transform_2, window_bounds = array<i64: 1, 8, 32>}, {pipeline_mode = #tpu.pipeline_mode<synchronous>, transform_indices = @transform_3, window_bounds = array<i64: 32, 32>}, {pipeline_mode = #tpu.pipeline_mode<synchronous>, transform_indices = @transform_4, window_bounds = array<i64: 1, 32>}, {pipeline_mode = #tpu.pipeline_mode<synchronous>, transform_indices = @transform_5, window_bounds = array<i64: 1, 32>}, {pipeline_mode = #tpu.pipeline_mode<synchronous>, transform_indices = @transform_6, window_bounds = array<i64: 1, 32>}, {pipeline_mode = #tpu.pipeline_mode<synchronous>, transform_indices = @transform_7, window_bounds = array<i64: 32, 128>}, {pipeline_mode = #tpu.pipeline_mode<synchronous>, transform_indices = @transform_8, window_bounds = array<i64: 1, 128>}, {pipeline_mode = #tpu.pipeline_mode<synchronous>, transform_indices = @transform_9, window_bounds = array<i64: 128, 32>}, {pipeline_mode = #tpu.pipeline_mode<synchronous>, transform_indices = @transform_10, window_bounds = array<i64: 1, 32>}, {pipeline_mode = #tpu.pipeline_mode<synchronous>, transform_indices = @transform_11, window_bounds = array<i64: 1, 32>}, {pipeline_mode = #tpu.pipeline_mode<synchronous>, transform_indices = @transform_12, window_bounds = array<i64: 1, 32>}, {transform_indices = @transform_13, window_bounds = array<i64: 1, 8, 32>}]} {
    %c0 = arith.constant 0 : index
    %c0_0 = arith.constant 0 : index
    %c0_1 = arith.constant 0 : index
    %0 = vector.load %arg2[%c0, %c0_0, %c0_1] : memref<1x8x32xf32, #tpu.memory_space<vmem>>, vector<1x8x32xf32>
    %1 = vector.shape_cast %0 : vector<1x8x32xf32> to vector<8x32xf32>
    %cst = arith.constant 0.353553385 : f32
    %2 = vector.broadcast %cst : f32 to vector<8x32xf32>
    %3 = arith.mulf %1, %2 : vector<8x32xf32>
    %4 = arith.truncf %3 : vector<8x32xf32> to vector<8x32xbf16>
    %c0_2 = arith.constant 0 : index
    %c0_3 = arith.constant 0 : index
    %c0_4 = arith.constant 0 : index
    %5 = vector.load %arg3[%c0_2, %c0_3, %c0_4] : memref<1x32x8xbf16, #tpu.memory_space<vmem>>, vector<1x32x8xbf16>
    %6 = vector.shape_cast %5 : vector<1x32x8xbf16> to vector<32x8xbf16>
    %c0_5 = arith.constant 0 : index
    %c0_6 = arith.constant 0 : index
    %c0_7 = arith.constant 0 : index
    %7 = vector.load %arg4[%c0_5, %c0_6, %c0_7] : memref<1x8x32xbf16, #tpu.memory_space<vmem>>, vector<1x8x32xbf16>
    %8 = vector.shape_cast %7 : vector<1x8x32xbf16> to vector<8x32xbf16>
    %c8_i32 = arith.constant 8 : i32
    %9 = arith.muli %arg1, %c8_i32 : i32
    %10 = tpu.iota {dimensions = array<i32: 0>} : vector<8x8xi32>
    %11 = vector.broadcast %9 : i32 to vector<8x8xi32>
    %12 = arith.addi %11, %10 : vector<8x8xi32>
    %13 = tpu.iota {dimensions = array<i32: 1>} : vector<8x8xi32>
    %14 = arith.cmpi sle, %13, %12 : vector<8x8xi32>
    %cst_8 = arith.constant 0.000000e+00 : f32
    %cst_9 = arith.constant -1.000000e+20 : f32
    %15 = vector.broadcast %cst_8 : f32 to vector<8x8xf32>
    %16 = vector.broadcast %cst_9 : f32 to vector<8x8xf32>
    %17 = arith.select %14, %15, %16 : vector<8x8xi1>, vector<8x8xf32>
    %18 = vector.extract_strided_slice %4 {offsets = [0, 0], sizes = [8, 8], strides = [1, 1]} : vector<8x32xbf16> to vector<8x8xbf16>
    %19 = vector.extract_strided_slice %6 {offsets = [0, 0], sizes = [8, 8], strides = [1, 1]} : vector<32x8xbf16> to vector<8x8xbf16>
    %cst_10 = arith.constant dense<0.000000e+00> : vector<8x8xf32>
    %20 = tpu.matmul %18, %19, %cst_10 {dimension_numbers = #tpu.dot_dimension_numbers<[1], [0], [0], [1], [0, 0, 1, 1], [], []>} : vector<8x8xbf16>, vector<8x8xbf16>, vector<8x8xf32> -> vector<8x8xf32>
    %21 = arith.addf %20, %17 : vector<8x8xf32>
    %cst_11 = arith.constant dense<0xFF800000> : vector<8xf32>
    %22 = vector.multi_reduction <maximumf>, %21, %cst_11 [1] : vector<8x8xf32> to vector<8xf32>
    %23 = vector.shape_cast %22 : vector<8xf32> to vector<8x1xf32>
    %24 = vector.broadcast %23 : vector<8x1xf32> to vector<8x8xf32>
    %25 = arith.subf %21, %24 : vector<8x8xf32>
    %26 = math.exp %25 : vector<8x8xf32>
    %cst_12 = arith.constant dense<0.000000e+00> : vector<8xf32>
    %27 = vector.multi_reduction <add>, %26, %cst_12 [1] : vector<8x8xf32> to vector<8xf32>
    %28 = vector.shape_cast %27 : vector<8xf32> to vector<8x1xf32>
    %29 = tpu.reciprocal %28 {approx = true} : vector<8x1xf32> -> vector<8x1xf32>
    %30 = vector.broadcast %29 : vector<8x1xf32> to vector<8x8xf32>
    %31 = arith.mulf %26, %30 : vector<8x8xf32>
    %32 = arith.truncf %31 : vector<8x8xf32> to vector<8x8xbf16>
    %33 = vector.extract_strided_slice %8 {offsets = [0, 0], sizes = [8, 8], strides = [1, 1]} : vector<8x32xbf16> to vector<8x8xbf16>
    %cst_13 = arith.constant dense<0.000000e+00> : vector<8x8xf32>
    %34 = tpu.matmul %32, %33, %cst_13 {dimension_numbers = #tpu.dot_dimension_numbers<[1], [0], [0], [1], [0, 0, 1, 1], [], []>} : vector<8x8xbf16>, vector<8x8xbf16>, vector<8x8xf32> -> vector<8x8xf32>
    %c0_14 = arith.constant 0 : index
    %c0_15 = arith.constant 0 : index
    %35 = vector.load %arg16[%c0_14, %c0_15] : memref<8x32xf32, #tpu.memory_space<vmem>>, vector<8x8xf32>
    tpu.vector_store %arg16[%c0_14, %c0_15], %34 {strides = array<i32>} : memref<8x32xf32, #tpu.memory_space<vmem>>, vector<8x8xf32>,
    %36 = vector.extract_strided_slice %4 {offsets = [0, 8], sizes = [8, 8], strides = [1, 1]} : vector<8x32xbf16> to vector<8x8xbf16>
    %37 = vector.extract_strided_slice %6 {offsets = [8, 0], sizes = [8, 8], strides = [1, 1]} : vector<32x8xbf16> to vector<8x8xbf16>
    %cst_16 = arith.constant dense<0.000000e+00> : vector<8x8xf32>
    %38 = tpu.matmul %36, %37, %cst_16 {dimension_numbers = #tpu.dot_dimension_numbers<[1], [0], [0], [1], [0, 0, 1, 1], [], []>} : vector<8x8xbf16>, vector<8x8xbf16>, vector<8x8xf32> -> vector<8x8xf32>
    %39 = arith.addf %38, %17 : vector<8x8xf32>
    %cst_17 = arith.constant dense<0xFF800000> : vector<8xf32>
    %40 = vector.multi_reduction <maximumf>, %39, %cst_17 [1] : vector<8x8xf32> to vector<8xf32>
    %41 = vector.shape_cast %40 : vector<8xf32> to vector<8x1xf32>
    %42 = vector.broadcast %41 : vector<8x1xf32> to vector<8x8xf32>
    %43 = arith.subf %39, %42 : vector<8x8xf32>
    %44 = math.exp %43 : vector<8x8xf32>
    %cst_18 = arith.constant dense<0.000000e+00> : vector<8xf32>
    %45 = vector.multi_reduction <add>, %44, %cst_18 [1] : vector<8x8xf32> to vector<8xf32>
    %46 = vector.shape_cast %45 : vector<8xf32> to vector<8x1xf32>
    %47 = tpu.reciprocal %46 {approx = true} : vector<8x1xf32> -> vector<8x1xf32>
    %48 = vector.broadcast %47 : vector<8x1xf32> to vector<8x8xf32>
    %49 = arith.mulf %44, %48 : vector<8x8xf32>
    %50 = arith.truncf %49 : vector<8x8xf32> to vector<8x8xbf16>
    %51 = vector.extract_strided_slice %8 {offsets = [0, 8], sizes = [8, 8], strides = [1, 1]} : vector<8x32xbf16> to vector<8x8xbf16>
    %cst_19 = arith.constant dense<0.000000e+00> : vector<8x8xf32>
    %52 = tpu.matmul %50, %51, %cst_19 {dimension_numbers = #tpu.dot_dimension_numbers<[1], [0], [0], [1], [0, 0, 1, 1], [], []>} : vector<8x8xbf16>, vector<8x8xbf16>, vector<8x8xf32> -> vector<8x8xf32>
    %c0_20 = arith.constant 0 : index
    %c8 = arith.constant 8 : index
    %53 = vector.load %arg16[%c0_20, %c8] : memref<8x32xf32, #tpu.memory_space<vmem>>, vector<8x8xf32>
    tpu.vector_store %arg16[%c0_20, %c8], %52 {strides = array<i32>} : memref<8x32xf32, #tpu.memory_space<vmem>>, vector<8x8xf32>,
    %54 = vector.extract_strided_slice %4 {offsets = [0, 16], sizes = [8, 8], strides = [1, 1]} : vector<8x32xbf16> to vector<8x8xbf16>
    %55 = vector.extract_strided_slice %6 {offsets = [16, 0], sizes = [8, 8], strides = [1, 1]} : vector<32x8xbf16> to vector<8x8xbf16>
    %cst_21 = arith.constant dense<0.000000e+00> : vector<8x8xf32>
    %56 = tpu.matmul %54, %55, %cst_21 {dimension_numbers = #tpu.dot_dimension_numbers<[1], [0], [0], [1], [0, 0, 1, 1], [], []>} : vector<8x8xbf16>, vector<8x8xbf16>, vector<8x8xf32> -> vector<8x8xf32>
    %57 = arith.addf %56, %17 : vector<8x8xf32>
    %cst_22 = arith.constant dense<0xFF800000> : vector<8xf32>
    %58 = vector.multi_reduction <maximumf>, %57, %cst_22 [1] : vector<8x8xf32> to vector<8xf32>
    %59 = vector.shape_cast %58 : vector<8xf32> to vector<8x1xf32>
    %60 = vector.broadcast %59 : vector<8x1xf32> to vector<8x8xf32>
    %61 = arith.subf %57, %60 : vector<8x8xf32>
    %62 = math.exp %61 : vector<8x8xf32>
    %cst_23 = arith.constant dense<0.000000e+00> : vector<8xf32>
    %63 = vector.multi_reduction <add>, %62, %cst_23 [1] : vector<8x8xf32> to vector<8xf32>
    %64 = vector.shape_cast %63 : vector<8xf32> to vector<8x1xf32>
    %65 = tpu.reciprocal %64 {approx = true} : vector<8x1xf32> -> vector<8x1xf32>
    %66 = vector.broadcast %65 : vector<8x1xf32> to vector<8x8xf32>
    %67 = arith.mulf %62, %66 : vector<8x8xf32>
    %68 = arith.truncf %67 : vector<8x8xf32> to vector<8x8xbf16>
    %69 = vector.extract_strided_slice %8 {offsets = [0, 16], sizes = [8, 8], strides = [1, 1]} : vector<8x32xbf16> to vector<8x8xbf16>
    %cst_24 = arith.constant dense<0.000000e+00> : vector<8x8xf32>
    %70 = tpu.matmul %68, %69, %cst_24 {dimension_numbers = #tpu.dot_dimension_numbers<[1], [0], [0], [1], [0, 0, 1, 1], [], []>} : vector<8x8xbf16>, vector<8x8xbf16>, vector<8x8xf32> -> vector<8x8xf32>
    %c0_25 = arith.constant 0 : index
    %c16 = arith.constant 16 : index
    %71 = vector.load %arg16[%c0_25, %c16] : memref<8x32xf32, #tpu.memory_space<vmem>>, vector<8x8xf32>
    tpu.vector_store %arg16[%c0_25, %c16], %70 {strides = array<i32>} : memref<8x32xf32, #tpu.memory_space<vmem>>, vector<8x8xf32>,
    %72 = vector.extract_strided_slice %4 {offsets = [0, 24], sizes = [8, 8], strides = [1, 1]} : vector<8x32xbf16> to vector<8x8xbf16>
    %73 = vector.extract_strided_slice %6 {offsets = [24, 0], sizes = [8, 8], strides = [1, 1]} : vector<32x8xbf16> to vector<8x8xbf16>
    %cst_26 = arith.constant dense<0.000000e+00> : vector<8x8xf32>
    %74 = tpu.matmul %72, %73, %cst_26 {dimension_numbers = #tpu.dot_dimension_numbers<[1], [0], [0], [1], [0, 0, 1, 1], [], []>} : vector<8x8xbf16>, vector<8x8xbf16>, vector<8x8xf32> -> vector<8x8xf32>
    %75 = arith.addf %74, %17 : vector<8x8xf32>
    %cst_27 = arith.constant dense<0xFF800000> : vector<8xf32>
    %76 = vector.multi_reduction <maximumf>, %75, %cst_27 [1] : vector<8x8xf32> to vector<8xf32>
    %77 = vector.shape_cast %76 : vector<8xf32> to vector<8x1xf32>
    %78 = vector.broadcast %77 : vector<8x1xf32> to vector<8x8xf32>
    %79 = arith.subf %75, %78 : vector<8x8xf32>
    %80 = math.exp %79 : vector<8x8xf32>
    %cst_28 = arith.constant dense<0.000000e+00> : vector<8xf32>
    %81 = vector.multi_reduction <add>, %80, %cst_28 [1] : vector<8x8xf32> to vector<8xf32>
    %82 = vector.shape_cast %81 : vector<8xf32> to vector<8x1xf32>
    %83 = tpu.reciprocal %82 {approx = true} : vector<8x1xf32> -> vector<8x1xf32>
    %84 = vector.broadcast %83 : vector<8x1xf32> to vector<8x8xf32>
    %85 = arith.mulf %80, %84 : vector<8x8xf32>
    %86 = arith.truncf %85 : vector<8x8xf32> to vector<8x8xbf16>
    %87 = vector.extract_strided_slice %8 {offsets = [0, 24], sizes = [8, 8], strides = [1, 1]} : vector<8x32xbf16> to vector<8x8xbf16>
    %cst_29 = arith.constant dense<0.000000e+00> : vector<8x8xf32>
    %88 = tpu.matmul %86, %87, %cst_29 {dimension_numbers = #tpu.dot_dimension_numbers<[1], [0], [0], [1], [0, 0, 1, 1], [], []>} : vector<8x8xbf16>, vector<8x8xbf16>, vector<8x8xf32> -> vector<8x8xf32>
    %c0_30 = arith.constant 0 : index
    %c24 = arith.constant 24 : index
    %89 = vector.load %arg16[%c0_30, %c24] : memref<8x32xf32, #tpu.memory_space<vmem>>, vector<8x8xf32>
    tpu.vector_store %arg16[%c0_30, %c24], %88 {strides = array<i32>} : memref<8x32xf32, #tpu.memory_space<vmem>>, vector<8x8xf32>,
    %c0_31 = arith.constant 0 : index
    %c0_32 = arith.constant 0 : index
    %90 = vector.load %arg16[%c0_31, %c0_32] : memref<8x32xf32, #tpu.memory_space<vmem>>, vector<8x32xf32>
    %91 = arith.truncf %90 : vector<8x32xf32> to vector<8x32xbf16>
    %c0_33 = arith.constant 0 : index
    %c0_34 = arith.constant 0 : index
    %92 = vector.load %arg5[%c0_33, %c0_34] : memref<32x32xbf16, #tpu.memory_space<vmem>>, vector<32x32xbf16>
    %cst_35 = arith.constant dense<0.000000e+00> : vector<8x32xf32>
    %93 = tpu.matmul %91, %92, %cst_35 {dimension_numbers = #tpu.dot_dimension_numbers<[1], [0], [0], [1], [0, 0, 1, 1], [], []>} : vector<8x32xbf16>, vector<32x32xbf16>, vector<8x32xf32> -> vector<8x32xf32>
    %c0_36 = arith.constant 0 : index
    %c0_37 = arith.constant 0 : index
    %94 = vector.load %arg6[%c0_36, %c0_37] : memref<1x32xf32, #tpu.memory_space<vmem>>, vector<1x32xf32>
    %95 = vector.shape_cast %94 : vector<1x32xf32> to vector<32xf32>
    %96 = vector.shape_cast %95 : vector<32xf32> to vector<1x32xf32>
    %97 = vector.broadcast %96 : vector<1x32xf32> to vector<8x32xf32>
    %98 = arith.addf %93, %97 : vector<8x32xf32>
    %99 = arith.addf %98, %1 : vector<8x32xf32>
    %c0_38 = arith.constant 0 : index
    %c0_39 = arith.constant 0 : index
    %100 = vector.load %arg7[%c0_38, %c0_39] : memref<1x32xf32, #tpu.memory_space<vmem>>, vector<1x32xf32>
    %101 = vector.shape_cast %100 : vector<1x32xf32> to vector<32xf32>
    %c0_40 = arith.constant 0 : index
    %c0_41 = arith.constant 0 : index
    %102 = vector.load %arg8[%c0_40, %c0_41] : memref<1x32xf32, #tpu.memory_space<vmem>>, vector<1x32xf32>
    %103 = vector.shape_cast %102 : vector<1x32xf32> to vector<32xf32>
    %cst_42 = arith.constant dense<0.000000e+00> : vector<8xf32>
    %104 = vector.multi_reduction <add>, %99, %cst_42 [1] : vector<8x32xf32> to vector<8xf32>
    %105 = vector.shape_cast %104 : vector<8xf32> to vector<8x1xf32>
    %cst_43 = arith.constant 3.200000e+01 : f32
    %106 = vector.broadcast %cst_43 : f32 to vector<8x1xf32>
    %107 = arith.divf %105, %106 : vector<8x1xf32>
    %108 = vector.broadcast %107 : vector<8x1xf32> to vector<8x32xf32>
    %109 = arith.subf %99, %108 : vector<8x32xf32>
    %110 = arith.mulf %109, %109 : vector<8x32xf32>
    %cst_44 = arith.constant dense<0.000000e+00> : vector<8xf32>
    %111 = vector.multi_reduction <add>, %110, %cst_44 [1] : vector<8x32xf32> to vector<8xf32>
    %112 = vector.shape_cast %111 : vector<8xf32> to vector<8x1xf32>
    %cst_45 = arith.constant 3.200000e+01 : f32
    %113 = vector.broadcast %cst_45 : f32 to vector<8x1xf32>
    %114 = arith.divf %112, %113 : vector<8x1xf32>
    %cst_46 = arith.constant 9.99999974E-6 : f32
    %115 = vector.broadcast %cst_46 : f32 to vector<8x1xf32>
    %116 = arith.addf %114, %115 : vector<8x1xf32>
    %117 = math.rsqrt %116 : vector<8x1xf32>
    %118 = vector.broadcast %117 : vector<8x1xf32> to vector<8x32xf32>
    %119 = arith.mulf %109, %118 : vector<8x32xf32>
    %120 = vector.shape_cast %101 : vector<32xf32> to vector<1x32xf32>
    %121 = vector.broadcast %120 : vector<1x32xf32> to vector<8x32xf32>
    %122 = arith.mulf %119, %121 : vector<8x32xf32>
    %123 = vector.shape_cast %103 : vector<32xf32> to vector<1x32xf32>
    %124 = vector.broadcast %123 : vector<1x32xf32> to vector<8x32xf32>
    %125 = arith.addf %122, %124 : vector<8x32xf32>
    %126 = arith.truncf %125 : vector<8x32xf32> to vector<8x32xbf16>
    %c0_47 = arith.constant 0 : index
    %c0_48 = arith.constant 0 : index
    %127 = vector.load %arg9[%c0_47, %c0_48] : memref<32x128xbf16, #tpu.memory_space<vmem>>, vector<32x128xbf16>
    %cst_49 = arith.constant dense<0.000000e+00> : vector<8x128xf32>
    %128 = tpu.matmul %126, %127, %cst_49 {dimension_numbers = #tpu.dot_dimension_numbers<[1], [0], [0], [1], [0, 0, 1, 1], [], []>} : vector<8x32xbf16>, vector<32x128xbf16>, vector<8x128xf32> -> vector<8x128xf32>
    %c0_50 = arith.constant 0 : index
    %c0_51 = arith.constant 0 : index
    %129 = vector.load %arg10[%c0_50, %c0_51] : memref<1x128xf32, #tpu.memory_space<vmem>>, vector<1x128xf32>
    %130 = vector.shape_cast %129 : vector<1x128xf32> to vector<128xf32>
    %131 = vector.shape_cast %130 : vector<128xf32> to vector<1x128xf32>
    %132 = vector.broadcast %131 : vector<1x128xf32> to vector<8x128xf32>
    %133 = arith.addf %128, %132 : vector<8x128xf32>
    %cst_52 = arith.constant 0.000000e+00 : f32
    %134 = vector.broadcast %cst_52 : f32 to vector<8x128xf32>
    %135 = arith.maximumf %133, %134 : vector<8x128xf32>
    %136 = arith.truncf %135 : vector<8x128xf32> to vector<8x128xbf16>
    %c0_53 = arith.constant 0 : index
    %c0_54 = arith.constant 0 : index
    %137 = vector.load %arg11[%c0_53, %c0_54] : memref<128x32xbf16, #tpu.memory_space<vmem>>, vector<128x32xbf16>
    %cst_55 = arith.constant dense<0.000000e+00> : vector<8x32xf32>
    %138 = tpu.matmul %136, %137, %cst_55 {dimension_numbers = #tpu.dot_dimension_numbers<[1], [0], [0], [1], [0, 0, 1, 1], [], []>} : vector<8x128xbf16>, vector<128x32xbf16>, vector<8x32xf32> -> vector<8x32xf32>
    %c0_56 = arith.constant 0 : index
    %c0_57 = arith.constant 0 : index
    %139 = vector.load %arg12[%c0_56, %c0_57] : memref<1x32xf32, #tpu.memory_space<vmem>>, vector<1x32xf32>
    %140 = vector.shape_cast %139 : vector<1x32xf32> to vector<32xf32>
    %141 = vector.shape_cast %140 : vector<32xf32> to vector<1x32xf32>
    %142 = vector.broadcast %141 : vector<1x32xf32> to vector<8x32xf32>
    %143 = arith.addf %138, %142 : vector<8x32xf32>
    %144 = arith.addf %143, %125 : vector<8x32xf32>
    %c0_58 = arith.constant 0 : index
    %c0_59 = arith.constant 0 : index
    %145 = vector.load %arg13[%c0_58, %c0_59] : memref<1x32xf32, #tpu.memory_space<vmem>>, vector<1x32xf32>
    %146 = vector.shape_cast %145 : vector<1x32xf32> to vector<32xf32>
    %c0_60 = arith.constant 0 : index
    %c0_61 = arith.constant 0 : index
    %147 = vector.load %arg14[%c0_60, %c0_61] : memref<1x32xf32, #tpu.memory_space<vmem>>, vector<1x32xf32>
    %148 = vector.shape_cast %147 : vector<1x32xf32> to vector<32xf32>
    %cst_62 = arith.constant dense<0.000000e+00> : vector<8xf32>
    %149 = vector.multi_reduction <add>, %144, %cst_62 [1] : vector<8x32xf32> to vector<8xf32>
    %150 = vector.shape_cast %149 : vector<8xf32> to vector<8x1xf32>
    %cst_63 = arith.constant 3.200000e+01 : f32
    %151 = vector.broadcast %cst_63 : f32 to vector<8x1xf32>
    %152 = arith.divf %150, %151 : vector<8x1xf32>
    %153 = vector.broadcast %152 : vector<8x1xf32> to vector<8x32xf32>
    %154 = arith.subf %144, %153 : vector<8x32xf32>
    %155 = arith.mulf %154, %154 : vector<8x32xf32>
    %cst_64 = arith.constant dense<0.000000e+00> : vector<8xf32>
    %156 = vector.multi_reduction <add>, %155, %cst_64 [1] : vector<8x32xf32> to vector<8xf32>
    %157 = vector.shape_cast %156 : vector<8xf32> to vector<8x1xf32>
    %cst_65 = arith.constant 3.200000e+01 : f32
    %158 = vector.broadcast %cst_65 : f32 to vector<8x1xf32>
    %159 = arith.divf %157, %158 : vector<8x1xf32>
    %cst_66 = arith.constant 9.99999974E-6 : f32
    %160 = vector.broadcast %cst_66 : f32 to vector<8x1xf32>
    %161 = arith.addf %159, %160 : vector<8x1xf32>
    %162 = math.rsqrt %161 : vector<8x1xf32>
    %163 = vector.broadcast %162 : vector<8x1xf32> to vector<8x32xf32>
    %164 = arith.mulf %154, %163 : vector<8x32xf32>
    %165 = vector.shape_cast %146 : vector<32xf32> to vector<1x32xf32>
    %166 = vector.broadcast %165 : vector<1x32xf32> to vector<8x32xf32>
    %167 = arith.mulf %164, %166 : vector<8x32xf32>
    %168 = vector.shape_cast %148 : vector<32xf32> to vector<1x32xf32>
    %169 = vector.broadcast %168 : vector<1x32xf32> to vector<8x32xf32>
    %170 = arith.addf %167, %169 : vector<8x32xf32>
    %c0_67 = arith.constant 0 : index
    %c0_68 = arith.constant 0 : index
    %c0_69 = arith.constant 0 : index
    %171 = vector.load %arg15[%c0_67, %c0_68, %c0_69] : memref<1x8x32xf32, #tpu.memory_space<vmem>>, vector<1x8x32xf32>
    %172 = vector.shape_cast %171 : vector<1x8x32xf32> to vector<8x32xf32>
    %173 = vector.shape_cast %170 : vector<8x32xf32> to vector<1x8x32xf32>
    tpu.vector_store %arg15[%c0_67, %c0_68, %c0_69], %173 {strides = array<i32>} : memref<1x8x32xf32, #tpu.memory_space<vmem>>, vector<1x8x32xf32>,
    return
  }
  func.func @transform_0(%arg0: i32, %arg1: i32) -> (i32, i32, i32) {
    %c0_i32 = arith.constant 0 : i32
    %c0_i32_0 = arith.constant 0 : i32
    return %arg0, %arg1, %c0_i32 : i32, i32, i32
  }
  func.func @transform_1(%arg0: i32, %arg1: i32) -> (i32, i32, i32) {
    %c0_i32 = arith.constant 0 : i32
    %c0_i32_0 = arith.constant 0 : i32
    %c0_i32_1 = arith.constant 0 : i32
    return %arg0, %c0_i32, %c0_i32_0 : i32, i32, i32
  }
  func.func @transform_2(%arg0: i32, %arg1: i32) -> (i32, i32, i32) {
    %c0_i32 = arith.constant 0 : i32
    %c0_i32_0 = arith.constant 0 : i32
    %c0_i32_1 = arith.constant 0 : i32
    return %arg0, %c0_i32, %c0_i32_0 : i32, i32, i32
  }
  func.func @transform_3(%arg0: i32, %arg1: i32) -> (i32, i32) {
    %c0_i32 = arith.constant 0 : i32
    %c0_i32_0 = arith.constant 0 : i32
    %c0_i32_1 = arith.constant 0 : i32
    return %c0_i32, %c0_i32_0 : i32, i32
  }
  func.func @transform_4(%arg0: i32, %arg1: i32) -> (i32, i32) {
    %c0_i32 = arith.constant 0 : i32
    %c0_i32_0 = arith.constant 0 : i32
    %c0_i32_1 = arith.constant 0 : i32
    return %c0_i32, %c0_i32_0 : i32, i32
  }
  func.func @transform_5(%arg0: i32, %arg1: i32) -> (i32, i32) {
    %c0_i32 = arith.constant 0 : i32
    %c0_i32_0 = arith.constant 0 : i32
    %c0_i32_1 = arith.constant 0 : i32
    return %c0_i32, %c0_i32_0 : i32, i32
  }
  func.func @transform_6(%arg0: i32, %arg1: i32) -> (i32, i32) {
    %c0_i32 = arith.constant 0 : i32
    %c0_i32_0 = arith.constant 0 : i32
    %c0_i32_1 = arith.constant 0 : i32
    return %c0_i32, %c0_i32_0 : i32, i32
  }
  func.func @transform_7(%arg0: i32, %arg1: i32) -> (i32, i32) {
    %c0_i32 = arith.constant 0 : i32
    %c0_i32_0 = arith.constant 0 : i32
    %c0_i32_1 = arith.constant 0 : i32
    return %c0_i32, %c0_i32_0 : i32, i32
  }
  func.func @transform_8(%arg0: i32, %arg1: i32) -> (i32, i32) {
    %c0_i32 = arith.constant 0 : i32
    %c0_i32_0 = arith.constant 0 : i32
    %c0_i32_1 = arith.constant 0 : i32
    return %c0_i32, %c0_i32_0 : i32, i32
  }
  func.func @transform_9(%arg0: i32, %arg1: i32) -> (i32, i32) {
    %c0_i32 = arith.constant 0 : i32
    %c0_i32_0 = arith.constant 0 : i32
    %c0_i32_1 = arith.constant 0 : i32
    return %c0_i32, %c0_i32_0 : i32, i32
  }
  func.func @transform_10(%arg0: i32, %arg1: i32) -> (i32, i32) {
    %c0_i32 = arith.constant 0 : i32
    %c0_i32_0 = arith.constant 0 : i32
    %c0_i32_1 = arith.constant 0 : i32
    return %c0_i32, %c0_i32_0 : i32, i32
  }
  func.func @transform_11(%arg0: i32, %arg1: i32) -> (i32, i32) {
    %c0_i32 = arith.constant 0 : i32
    %c0_i32_0 = arith.constant 0 : i32
    %c0_i32_1 = arith.constant 0 : i32
    return %c0_i32, %c0_i32_0 : i32, i32
  }
  func.func @transform_12(%arg0: i32, %arg1: i32) -> (i32, i32) {
    %c0_i32 = arith.constant 0 : i32
    %c0_i32_0 = arith.constant 0 : i32
    %c0_i32_1 = arith.constant 0 : i32
    return %c0_i32, %c0_i32_0 : i32, i32
  }
  func.func @transform_13(%arg0: i32, %arg1: i32) -> (i32, i32, i32) {
    %c0_i32 = arith.constant 0 : i32
    %c0_i32_0 = arith.constant 0 : i32
    return %arg0, %arg1, %c0_i32 : i32, i32, i32
  }
}

module attributes {stable_mosaic.version = 11 : i64} {
  func.func @transformer_block_kernel(%arg0: i32, %arg1: i32, %arg2: memref<1x8x32xf32, #tpu.memory_space<vmem>>, %arg3: memref<1x32x8xbf16, #tpu.memory_space<vmem>>, %arg4: memref<1x8x32xbf16, #tpu.memory_space<vmem>>, %arg5: memref<32x32xbf16, #tpu.memory_space<vmem>>, %arg6: memref<1x32xf32, #tpu.memory_space<vmem>>, %arg7: memref<1x32xf32, #tpu.memory_space<vmem>>, %arg8: memref<1x32xf32, #tpu.memory_space<vmem>>, %arg9: memref<32x128xbf16, #tpu.memory_space<vmem>>, %arg10: memref<1x128xf32, #tpu.memory_space<vmem>>, %arg11: memref<128x32xbf16, #tpu.memory_space<vmem>>, %arg12: memref<1x32xf32, #tpu.memory_space<vmem>>, %arg13: memref<1x32xf32, #tpu.memory_space<vmem>>, %arg14: memref<1x32xf32, #tpu.memory_space<vmem>>, %arg15: memref<1x8x32xf32, #tpu.memory_space<vmem>>, %arg16: memref<8x32xf32, #tpu.memory_space<vmem>>) attributes {dimension_semantics = [#tpu.dimension_semantics<parallel>, #tpu.dimension_semantics<arbitrary>], iteration_bounds = array<i64: 2, 1>, scalar_prefetch = 0 : i64, scratch_operands = 1 : i64, tpu.core_type = #tpu.core_type<tc>, window_params = [{transform_indices = @transform_0, window_bounds = array<i64: 1, 8, 32>}, {transform_indices = @transform_1, window_bounds = array<i64: 1, 32, 8>}, {transform_indices = @transform_2, window_bounds = array<i64: 1, 8, 32>}, {pipeline_mode = #tpu.pipeline_mode<synchronous>, transform_indices = @transform_3, window_bounds = array<i64: 32, 32>}, {pipeline_mode = #tpu.pipeline_mode<synchronous>, transform_indices = @transform_4, window_bounds = array<i64: 1, 32>}, {pipeline_mode = #tpu.pipeline_mode<synchronous>, transform_indices = @transform_5, window_bounds = array<i64: 1, 32>}, {pipeline_mode = #tpu.pipeline_mode<synchronous>, transform_indices = @transform_6, window_bounds = array<i64: 1, 32>}, {pipeline_mode = #tpu.pipeline_mode<synchronous>, transform_indices = @transform_7, window_bounds = array<i64: 32, 128>}, {pipeline_mode = #tpu.pipeline_mode<synchronous>, transform_indices = @transform_8, window_bounds = array<i64: 1, 128>}, {pipeline_mode = #tpu.pipeline_mode<synchronous>, transform_indices = @transform_9, window_bounds = array<i64: 128, 32>}, {pipeline_mode = #tpu.pipeline_mode<synchronous>, transform_indices = @transform_10, window_bounds = array<i64: 1, 32>}, {pipeline_mode = #tpu.pipeline_mode<synchronous>, transform_indices = @transform_11, window_bounds = array<i64: 1, 32>}, {pipeline_mode = #tpu.pipeline_mode<synchronous>, transform_indices = @transform_12, window_bounds = array<i64: 1, 32>}, {transform_indices = @transform_13, window_bounds = array<i64: 1, 8, 32>}]} {
    %c0 = arith.constant 0 : index
    %c0_0 = arith.constant 0 : index
    %c0_1 = arith.constant 0 : index
    %0 = vector.load %arg2[%c0, %c0_0, %c0_1] : memref<1x8x32xf32, #tpu.memory_space<vmem>>, vector<1x8x32xf32>
    %1 = vector.shape_cast %0 : vector<1x8x32xf32> to vector<8x32xf32>
    %cst = arith.constant 0.353553385 : f32
    %2 = vector.broadcast %cst : f32 to vector<8x32xf32>
    %3 = arith.mulf %1, %2 : vector<8x32xf32>
    %4 = arith.truncf %3 : vector<8x32xf32> to vector<8x32xbf16>
    %c0_2 = arith.constant 0 : index
    %c0_3 = arith.constant 0 : index
    %c0_4 = arith.constant 0 : index
    %5 = vector.load %arg3[%c0_2, %c0_3, %c0_4] : memref<1x32x8xbf16, #tpu.memory_space<vmem>>, vector<1x32x8xbf16>
    %6 = vector.shape_cast %5 : vector<1x32x8xbf16> to vector<32x8xbf16>
    %c0_5 = arith.constant 0 : index
    %c0_6 = arith.constant 0 : index
    %c0_7 = arith.constant 0 : index
    %7 = vector.load %arg4[%c0_5, %c0_6, %c0_7] : memref<1x8x32xbf16, #tpu.memory_space<vmem>>, vector<1x8x32xbf16>
    %8 = vector.shape_cast %7 : vector<1x8x32xbf16> to vector<8x32xbf16>
    %c8_i32 = arith.constant 8 : i32
    %9 = arith.muli %arg1, %c8_i32 : i32
    %10 = tpu.iota {dimensions = array<i32: 0>} : vector<8x8xi32>
    %11 = vector.broadcast %9 : i32 to vector<8x8xi32>
    %12 = arith.addi %11, %10 : vector<8x8xi32>
    %13 = tpu.iota {dimensions = array<i32: 1>} : vector<8x8xi32>
    %14 = arith.cmpi sle, %13, %12 : vector<8x8xi32>
    %cst_8 = arith.constant 0.000000e+00 : f32
    %cst_9 = arith.constant -1.000000e+20 : f32
    %15 = vector.broadcast %cst_8 : f32 to vector<8x8xf32>
    %16 = vector.broadcast %cst_9 : f32 to vector<8x8xf32>
    %17 = arith.select %14, %15, %16 : vector<8x8xi1>, vector<8x8xf32>
    %18 = vector.extract_strided_slice %4 {offsets = [0, 0], sizes = [8, 8], strides = [1, 1]} : vector<8x32xbf16> to vector<8x8xbf16>
    %19 = vector.extract_strided_slice %6 {offsets = [0, 0], sizes = [8, 8], strides = [1, 1]} : vector<32x8xbf16> to vector<8x8xbf16>
    %cst_10 = arith.constant dense<0.000000e+00> : vector<8x8xf32>
    %20 = tpu.matmul %18, %19, %cst_10 {dimension_numbers = #tpu.dot_dimension_numbers<[1], [0], [0], [1], [0, 0, 1, 1], [], []>} : vector<8x8xbf16>, vector<8x8xbf16>, vector<8x8xf32> -> vector<8x8xf32>
    %21 = arith.addf %20, %17 : vector<8x8xf32>
    %cst_11 = arith.constant dense<0xFF800000> : vector<8xf32>
    %22 = vector.multi_reduction <maximumf>, %21, %cst_11 [1] : vector<8x8xf32> to vector<8xf32>
    %23 = vector.shape_cast %22 : vector<8xf32> to vector<8x1xf32>
    %24 = vector.broadcast %23 : vector<8x1xf32> to vector<8x8xf32>
    %25 = arith.subf %21, %24 : vector<8x8xf32>
    %26 = math.exp %25 : vector<8x8xf32>
    %cst_12 = arith.constant dense<0.000000e+00> : vector<8xf32>
    %27 = vector.multi_reduction <add>, %26, %cst_12 [1] : vector<8x8xf32> to vector<8xf32>
    %28 = vector.shape_cast %27 : vector<8xf32> to vector<8x1xf32>
    %29 = tpu.reciprocal %28 {approx = true} : vector<8x1xf32> -> vector<8x1xf32>
    %30 = vector.broadcast %29 : vector<8x1xf32> to vector<8x8xf32>
    %31 = arith.mulf %26, %30 : vector<8x8xf32>
    %32 = arith.truncf %31 : vector<8x8xf32> to vector<8x8xbf16>
    %33 = vector.extract_strided_slice %8 {offsets = [0, 0], sizes = [8, 8], strides = [1, 1]} : vector<8x32xbf16> to vector<8x8xbf16>
    %cst_13 = arith.constant dense<0.000000e+00> : vector<8x8xf32>
    %34 = tpu.matmul %32, %33, %cst_13 {dimension_numbers = #tpu.dot_dimension_numbers<[1], [0], [0], [1], [0, 0, 1, 1], [], []>} : vector<8x8xbf16>, vector<8x8xbf16>, vector<8x8xf32> -> vector<8x8xf32>
    %c0_14 = arith.constant 0 : index
    %c0_15 = arith.constant 0 : index
    %35 = vector.load %arg16[%c0_14, %c0_15] : memref<8x32xf32, #tpu.memory_space<vmem>>, vector<8x8xf32>
    tpu.vector_store %arg16[%c0_14, %c0_15], %34 {strides = array<i32>} : memref<8x32xf32, #tpu.memory_space<vmem>>, vector<8x8xf32>,
    %36 = vector.extract_strided_slice %4 {offsets = [0, 8], sizes = [8, 8], strides = [1, 1]} : vector<8x32xbf16> to vector<8x8xbf16>
    %37 = vector.extract_strided_slice %6 {offsets = [8, 0], sizes = [8, 8], strides = [1, 1]} : vector<32x8xbf16> to vector<8x8xbf16>
    %cst_16 = arith.constant dense<0.000000e+00> : vector<8x8xf32>
    %38 = tpu.matmul %36, %37, %cst_16 {dimension_numbers = #tpu.dot_dimension_numbers<[1], [0], [0], [1], [0, 0, 1, 1], [], []>} : vector<8x8xbf16>, vector<8x8xbf16>, vector<8x8xf32> -> vector<8x8xf32>
    %39 = arith.addf %38, %17 : vector<8x8xf32>
    %cst_17 = arith.constant dense<0xFF800000> : vector<8xf32>
    %40 = vector.multi_reduction <maximumf>, %39, %cst_17 [1] : vector<8x8xf32> to vector<8xf32>
    %41 = vector.shape_cast %40 : vector<8xf32> to vector<8x1xf32>
    %42 = vector.broadcast %41 : vector<8x1xf32> to vector<8x8xf32>
    %43 = arith.subf %39, %42 : vector<8x8xf32>
    %44 = math.exp %43 : vector<8x8xf32>
    %cst_18 = arith.constant dense<0.000000e+00> : vector<8xf32>
    %45 = vector.multi_reduction <add>, %44, %cst_18 [1] : vector<8x8xf32> to vector<8xf32>
    %46 = vector.shape_cast %45 : vector<8xf32> to vector<8x1xf32>
    %47 = tpu.reciprocal %46 {approx = true} : vector<8x1xf32> -> vector<8x1xf32>
    %48 = vector.broadcast %47 : vector<8x1xf32> to vector<8x8xf32>
    %49 = arith.mulf %44, %48 : vector<8x8xf32>
    %50 = arith.truncf %49 : vector<8x8xf32> to vector<8x8xbf16>
    %51 = vector.extract_strided_slice %8 {offsets = [0, 8], sizes = [8, 8], strides = [1, 1]} : vector<8x32xbf16> to vector<8x8xbf16>
    %cst_19 = arith.constant dense<0.000000e+00> : vector<8x8xf32>
    %52 = tpu.matmul %50, %51, %cst_19 {dimension_numbers = #tpu.dot_dimension_numbers<[1], [0], [0], [1], [0, 0, 1, 1], [], []>} : vector<8x8xbf16>, vector<8x8xbf16>, vector<8x8xf32> -> vector<8x8xf32>
    %c0_20 = arith.constant 0 : index
    %c8 = arith.constant 8 : index
    %53 = vector.load %arg16[%c0_20, %c8] : memref<8x32xf32, #tpu.memory_space<vmem>>, vector<8x8xf32>
    tpu.vector_store %arg16[%c0_20, %c8], %52 {strides = array<i32>} : memref<8x32xf32, #tpu.memory_space<vmem>>, vector<8x8xf32>,
    %54 = vector.extract_strided_slice %4 {offsets = [0, 16], sizes = [8, 8], strides = [1, 1]} : vector<8x32xbf16> to vector<8x8xbf16>
    %55 = vector.extract_strided_slice %6 {offsets = [16, 0], sizes = [8, 8], strides = [1, 1]} : vector<32x8xbf16> to vector<8x8xbf16>
    %cst_21 = arith.constant dense<0.000000e+00> : vector<8x8xf32>
    %56 = tpu.matmul %54, %55, %cst_21 {dimension_numbers = #tpu.dot_dimension_numbers<[1], [0], [0], [1], [0, 0, 1, 1], [], []>} : vector<8x8xbf16>, vector<8x8xbf16>, vector<8x8xf32> -> vector<8x8xf32>
    %57 = arith.addf %56, %17 : vector<8x8xf32>
    %cst_22 = arith.constant dense<0xFF800000> : vector<8xf32>
    %58 = vector.multi_reduction <maximumf>, %57, %cst_22 [1] : vector<8x8xf32> to vector<8xf32>
    %59 = vector.shape_cast %58 : vector<8xf32> to vector<8x1xf32>
    %60 = vector.broadcast %59 : vector<8x1xf32> to vector<8x8xf32>
    %61 = arith.subf %57, %60 : vector<8x8xf32>
    %62 = math.exp %61 : vector<8x8xf32>
    %cst_23 = arith.constant dense<0.000000e+00> : vector<8xf32>
    %63 = vector.multi_reduction <add>, %62, %cst_23 [1] : vector<8x8xf32> to vector<8xf32>
    %64 = vector.shape_cast %63 : vector<8xf32> to vector<8x1xf32>
    %65 = tpu.reciprocal %64 {approx = true} : vector<8x1xf32> -> vector<8x1xf32>
    %66 = vector.broadcast %65 : vector<8x1xf32> to vector<8x8xf32>
    %67 = arith.mulf %62, %66 : vector<8x8xf32>
    %68 = arith.truncf %67 : vector<8x8xf32> to vector<8x8xbf16>
    %69 = vector.extract_strided_slice %8 {offsets = [0, 16], sizes = [8, 8], strides = [1, 1]} : vector<8x32xbf16> to vector<8x8xbf16>
    %cst_24 = arith.constant dense<0.000000e+00> : vector<8x8xf32>
    %70 = tpu.matmul %68, %69, %cst_24 {dimension_numbers = #tpu.dot_dimension_numbers<[1], [0], [0], [1], [0, 0, 1, 1], [], []>} : vector<8x8xbf16>, vector<8x8xbf16>, vector<8x8xf32> -> vector<8x8xf32>
    %c0_25 = arith.constant 0 : index
    %c16 = arith.constant 16 : index
    %71 = vector.load %arg16[%c0_25, %c16] : memref<8x32xf32, #tpu.memory_space<vmem>>, vector<8x8xf32>
    tpu.vector_store %arg16[%c0_25, %c16], %70 {strides = array<i32>} : memref<8x32xf32, #tpu.memory_space<vmem>>, vector<8x8xf32>,
    %72 = vector.extract_strided_slice %4 {offsets = [0, 24], sizes = [8, 8], strides = [1, 1]} : vector<8x32xbf16> to vector<8x8xbf16>
    %73 = vector.extract_strided_slice %6 {offsets = [24, 0], sizes = [8, 8], strides = [1, 1]} : vector<32x8xbf16> to vector<8x8xbf16>
    %cst_26 = arith.constant dense<0.000000e+00> : vector<8x8xf32>
    %74 = tpu.matmul %72, %73, %cst_26 {dimension_numbers = #tpu.dot_dimension_numbers<[1], [0], [0], [1], [0, 0, 1, 1], [], []>} : vector<8x8xbf16>, vector<8x8xbf16>, vector<8x8xf32> -> vector<8x8xf32>
    %75 = arith.addf %74, %17 : vector<8x8xf32>
    %cst_27 = arith.constant dense<0xFF800000> : vector<8xf32>
    %76 = vector.multi_reduction <maximumf>, %75, %cst_27 [1] : vector<8x8xf32> to vector<8xf32>
    %77 = vector.shape_cast %76 : vector<8xf32> to vector<8x1xf32>
    %78 = vector.broadcast %77 : vector<8x1xf32> to vector<8x8xf32>
    %79 = arith.subf %75, %78 : vector<8x8xf32>
    %80 = math.exp %79 : vector<8x8xf32>
    %cst_28 = arith.constant dense<0.000000e+00> : vector<8xf32>
    %81 = vector.multi_reduction <add>, %80, %cst_28 [1] : vector<8x8xf32> to vector<8xf32>
    %82 = vector.shape_cast %81 : vector<8xf32> to vector<8x1xf32>
    %83 = tpu.reciprocal %82 {approx = true} : vector<8x1xf32> -> vector<8x1xf32>
    %84 = vector.broadcast %83 : vector<8x1xf32> to vector<8x8xf32>
    %85 = arith.mulf %80, %84 : vector<8x8xf32>
    %86 = arith.truncf %85 : vector<8x8xf32> to vector<8x8xbf16>
    %87 = vector.extract_strided_slice %8 {offsets = [0, 24], sizes = [8, 8], strides = [1, 1]} : vector<8x32xbf16> to vector<8x8xbf16>
    %cst_29 = arith.constant dense<0.000000e+00> : vector<8x8xf32>
    %88 = tpu.matmul %86, %87, %cst_29 {dimension_numbers = #tpu.dot_dimension_numbers<[1], [0], [0], [1], [0, 0, 1, 1], [], []>} : vector<8x8xbf16>, vector<8x8xbf16>, vector<8x8xf32> -> vector<8x8xf32>
    %c0_30 = arith.constant 0 : index
    %c24 = arith.constant 24 : index
    %89 = vector.load %arg16[%c0_30, %c24] : memref<8x32xf32, #tpu.memory_space<vmem>>, vector<8x8xf32>
    tpu.vector_store %arg16[%c0_30, %c24], %88 {strides = array<i32>} : memref<8x32xf32, #tpu.memory_space<vmem>>, vector<8x8xf32>,
    %c0_31 = arith.constant 0 : index
    %c0_32 = arith.constant 0 : index
    %90 = vector.load %arg16[%c0_31, %c0_32] : memref<8x32xf32, #tpu.memory_space<vmem>>, vector<8x32xf32>
    %91 = arith.truncf %90 : vector<8x32xf32> to vector<8x32xbf16>
    %c0_33 = arith.constant 0 : index
    %c0_34 = arith.constant 0 : index
    %92 = vector.load %arg5[%c0_33, %c0_34] : memref<32x32xbf16, #tpu.memory_space<vmem>>, vector<32x32xbf16>
    %cst_35 = arith.constant dense<0.000000e+00> : vector<8x32xf32>
    %93 = tpu.matmul %91, %92, %cst_35 {dimension_numbers = #tpu.dot_dimension_numbers<[1], [0], [0], [1], [0, 0, 1, 1], [], []>} : vector<8x32xbf16>, vector<32x32xbf16>, vector<8x32xf32> -> vector<8x32xf32>
    %c0_36 = arith.constant 0 : index
    %c0_37 = arith.constant 0 : index
    %94 = vector.load %arg6[%c0_36, %c0_37] : memref<1x32xf32, #tpu.memory_space<vmem>>, vector<1x32xf32>
    %95 = vector.shape_cast %94 : vector<1x32xf32> to vector<32xf32>
    %96 = vector.shape_cast %95 : vector<32xf32> to vector<1x32xf32>
    %97 = vector.broadcast %96 : vector<1x32xf32> to vector<8x32xf32>
    %98 = arith.addf %93, %97 : vector<8x32xf32>
    %99 = arith.addf %98, %1 : vector<8x32xf32>
    %c0_38 = arith.constant 0 : index
    %c0_39 = arith.constant 0 : index
    %100 = vector.load %arg7[%c0_38, %c0_39] : memref<1x32xf32, #tpu.memory_space<vmem>>, vector<1x32xf32>
    %101 = vector.shape_cast %100 : vector<1x32xf32> to vector<32xf32>
    %c0_40 = arith.constant 0 : index
    %c0_41 = arith.constant 0 : index
    %102 = vector.load %arg8[%c0_40, %c0_41] : memref<1x32xf32, #tpu.memory_space<vmem>>, vector<1x32xf32>
    %103 = vector.shape_cast %102 : vector<1x32xf32> to vector<32xf32>
    %cst_42 = arith.constant dense<0.000000e+00> : vector<8xf32>
    %104 = vector.multi_reduction <add>, %99, %cst_42 [1] : vector<8x32xf32> to vector<8xf32>
    %105 = vector.shape_cast %104 : vector<8xf32> to vector<8x1xf32>
    %cst_43 = arith.constant 3.200000e+01 : f32
    %106 = vector.broadcast %cst_43 : f32 to vector<8x1xf32>
    %107 = arith.divf %105, %106 : vector<8x1xf32>
    %108 = vector.broadcast %107 : vector<8x1xf32> to vector<8x32xf32>
    %109 = arith.subf %99, %108 : vector<8x32xf32>
    %110 = arith.mulf %109, %109 : vector<8x32xf32>
    %cst_44 = arith.constant dense<0.000000e+00> : vector<8xf32>
    %111 = vector.multi_reduction <add>, %110, %cst_44 [1] : vector<8x32xf32> to vector<8xf32>
    %112 = vector.shape_cast %111 : vector<8xf32> to vector<8x1xf32>
    %cst_45 = arith.constant 3.200000e+01 : f32
    %113 = vector.broadcast %cst_45 : f32 to vector<8x1xf32>
    %114 = arith.divf %112, %113 : vector<8x1xf32>
    %cst_46 = arith.constant 9.99999974E-6 : f32
    %115 = vector.broadcast %cst_46 : f32 to vector<8x1xf32>
    %116 = arith.addf %114, %115 : vector<8x1xf32>
    %117 = math.rsqrt %116 : vector<8x1xf32>
    %118 = vector.broadcast %117 : vector<8x1xf32> to vector<8x32xf32>
    %119 = arith.mulf %109, %118 : vector<8x32xf32>
    %120 = vector.shape_cast %101 : vector<32xf32> to vector<1x32xf32>
    %121 = vector.broadcast %120 : vector<1x32xf32> to vector<8x32xf32>
    %122 = arith.mulf %119, %121 : vector<8x32xf32>
    %123 = vector.shape_cast %103 : vector<32xf32> to vector<1x32xf32>
    %124 = vector.broadcast %123 : vector<1x32xf32> to vector<8x32xf32>
    %125 = arith.addf %122, %124 : vector<8x32xf32>
    %126 = arith.truncf %125 : vector<8x32xf32> to vector<8x32xbf16>
    %c0_47 = arith.constant 0 : index
    %c0_48 = arith.constant 0 : index
    %127 = vector.load %arg9[%c0_47, %c0_48] : memref<32x128xbf16, #tpu.memory_space<vmem>>, vector<32x128xbf16>
    %cst_49 = arith.constant dense<0.000000e+00> : vector<8x128xf32>
    %128 = tpu.matmul %126, %127, %cst_49 {dimension_numbers = #tpu.dot_dimension_numbers<[1], [0], [0], [1], [0, 0, 1, 1], [], []>} : vector<8x32xbf16>, vector<32x128xbf16>, vector<8x128xf32> -> vector<8x128xf32>
    %c0_50 = arith.constant 0 : index
    %c0_51 = arith.constant 0 : index
    %129 = vector.load %arg10[%c0_50, %c0_51] : memref<1x128xf32, #tpu.memory_space<vmem>>, vector<1x128xf32>
    %130 = vector.shape_cast %129 : vector<1x128xf32> to vector<128xf32>
    %131 = vector.shape_cast %130 : vector<128xf32> to vector<1x128xf32>
    %132 = vector.broadcast %131 : vector<1x128xf32> to vector<8x128xf32>
    %133 = arith.addf %128, %132 : vector<8x128xf32>
    %cst_52 = arith.constant 0.000000e+00 : f32
    %134 = vector.broadcast %cst_52 : f32 to vector<8x128xf32>
    %135 = arith.maximumf %133, %134 : vector<8x128xf32>
    %136 = arith.truncf %135 : vector<8x128xf32> to vector<8x128xbf16>
    %c0_53 = arith.constant 0 : index
    %c0_54 = arith.constant 0 : index
    %137 = vector.load %arg11[%c0_53, %c0_54] : memref<128x32xbf16, #tpu.memory_space<vmem>>, vector<128x32xbf16>
    %cst_55 = arith.constant dense<0.000000e+00> : vector<8x32xf32>
    %138 = tpu.matmul %136, %137, %cst_55 {dimension_numbers = #tpu.dot_dimension_numbers<[1], [0], [0], [1], [0, 0, 1, 1], [], []>} : vector<8x128xbf16>, vector<128x32xbf16>, vector<8x32xf32> -> vector<8x32xf32>
    %c0_56 = arith.constant 0 : index
    %c0_57 = arith.constant 0 : index
    %139 = vector.load %arg12[%c0_56, %c0_57] : memref<1x32xf32, #tpu.memory_space<vmem>>, vector<1x32xf32>
    %140 = vector.shape_cast %139 : vector<1x32xf32> to vector<32xf32>
    %141 = vector.shape_cast %140 : vector<32xf32> to vector<1x32xf32>
    %142 = vector.broadcast %141 : vector<1x32xf32> to vector<8x32xf32>
    %143 = arith.addf %138, %142 : vector<8x32xf32>
    %144 = arith.addf %143, %125 : vector<8x32xf32>
    %c0_58 = arith.constant 0 : index
    %c0_59 = arith.constant 0 : index
    %145 = vector.load %arg13[%c0_58, %c0_59] : memref<1x32xf32, #tpu.memory_space<vmem>>, vector<1x32xf32>
    %146 = vector.shape_cast %145 : vector<1x32xf32> to vector<32xf32>
    %c0_60 = arith.constant 0 : index
    %c0_61 = arith.constant 0 : index
    %147 = vector.load %arg14[%c0_60, %c0_61] : memref<1x32xf32, #tpu.memory_space<vmem>>, vector<1x32xf32>
    %148 = vector.shape_cast %147 : vector<1x32xf32> to vector<32xf32>
    %cst_62 = arith.constant dense<0.000000e+00> : vector<8xf32>
    %149 = vector.multi_reduction <add>, %144, %cst_62 [1] : vector<8x32xf32> to vector<8xf32>
    %150 = vector.shape_cast %149 : vector<8xf32> to vector<8x1xf32>
    %cst_63 = arith.constant 3.200000e+01 : f32
    %151 = vector.broadcast %cst_63 : f32 to vector<8x1xf32>
    %152 = arith.divf %150, %151 : vector<8x1xf32>
    %153 = vector.broadcast %152 : vector<8x1xf32> to vector<8x32xf32>
    %154 = arith.subf %144, %153 : vector<8x32xf32>
    %155 = arith.mulf %154, %154 : vector<8x32xf32>
    %cst_64 = arith.constant dense<0.000000e+00> : vector<8xf32>
    %156 = vector.multi_reduction <add>, %155, %cst_64 [1] : vector<8x32xf32> to vector<8xf32>
    %157 = vector.shape_cast %156 : vector<8xf32> to vector<8x1xf32>
    %cst_65 = arith.constant 3.200000e+01 : f32
    %158 = vector.broadcast %cst_65 : f32 to vector<8x1xf32>
    %159 = arith.divf %157, %158 : vector<8x1xf32>
    %cst_66 = arith.constant 9.99999974E-6 : f32
    %160 = vector.broadcast %cst_66 : f32 to vector<8x1xf32>
    %161 = arith.addf %159, %160 : vector<8x1xf32>
    %162 = math.rsqrt %161 : vector<8x1xf32>
    %163 = vector.broadcast %162 : vector<8x1xf32> to vector<8x32xf32>
    %164 = arith.mulf %154, %163 : vector<8x32xf32>
    %165 = vector.shape_cast %146 : vector<32xf32> to vector<1x32xf32>
    %166 = vector.broadcast %165 : vector<1x32xf32> to vector<8x32xf32>
    %167 = arith.mulf %164, %166 : vector<8x32xf32>
    %168 = vector.shape_cast %148 : vector<32xf32> to vector<1x32xf32>
    %169 = vector.broadcast %168 : vector<1x32xf32> to vector<8x32xf32>
    %170 = arith.addf %167, %169 : vector<8x32xf32>
    %c0_67 = arith.constant 0 : index
    %c0_68 = arith.constant 0 : index
    %c0_69 = arith.constant 0 : index
    %171 = vector.load %arg15[%c0_67, %c0_68, %c0_69] : memref<1x8x32xf32, #tpu.memory_space<vmem>>, vector<1x8x32xf32>
    %172 = vector.shape_cast %171 : vector<1x8x32xf32> to vector<8x32xf32>
    %173 = vector.shape_cast %170 : vector<8x32xf32> to vector<1x8x32xf32>
    tpu.vector_store %arg15[%c0_67, %c0_68, %c0_69], %173 {strides = array<i32>} : memref<1x8x32xf32, #tpu.memory_space<vmem>>, vector<1x8x32xf32>,
    return
  }
  func.func @transform_0(%arg0: i32, %arg1: i32) -> (i32, i32, i32) {
    %c0_i32 = arith.constant 0 : i32
    %c0_i32_0 = arith.constant 0 : i32
    return %arg0, %arg1, %c0_i32 : i32, i32, i32
  }
  func.func @transform_1(%arg0: i32, %arg1: i32) -> (i32, i32, i32) {
    %c0_i32 = arith.constant 0 : i32
    %c0_i32_0 = arith.constant 0 : i32
    %c0_i32_1 = arith.constant 0 : i32
    return %arg0, %c0_i32, %c0_i32_0 : i32, i32, i32
  }
  func.func @transform_2(%arg0: i32, %arg1: i32) -> (i32, i32, i32) {
    %c0_i32 = arith.constant 0 : i32
    %c0_i32_0 = arith.constant 0 : i32
    %c0_i32_1 = arith.constant 0 : i32
    return %arg0, %c0_i32, %c0_i32_0 : i32, i32, i32
  }
  func.func @transform_3(%arg0: i32, %arg1: i32) -> (i32, i32) {
    %c0_i32 = arith.constant 0 : i32
    %c0_i32_0 = arith.constant 0 : i32
    %c0_i32_1 = arith.constant 0 : i32
    return %c0_i32, %c0_i32_0 : i32, i32
  }
  func.func @transform_4(%arg0: i32, %arg1: i32) -> (i32, i32) {
    %c0_i32 = arith.constant 0 : i32
    %c0_i32_0 = arith.constant 0 : i32
    %c0_i32_1 = arith.constant 0 : i32
    return %c0_i32, %c0_i32_0 : i32, i32
  }
  func.func @transform_5(%arg0: i32, %arg1: i32) -> (i32, i32) {
    %c0_i32 = arith.constant 0 : i32
    %c0_i32_0 = arith.constant 0 : i32
    %c0_i32_1 = arith.constant 0 : i32
    return %c0_i32, %c0_i32_0 : i32, i32
  }
  func.func @transform_6(%arg0: i32, %arg1: i32) -> (i32, i32) {
    %c0_i32 = arith.constant 0 : i32
    %c0_i32_0 = arith.constant 0 : i32
    %c0_i32_1 = arith.constant 0 : i32
    return %c0_i32, %c0_i32_0 : i32, i32
  }
  func.func @transform_7(%arg0: i32, %arg1: i32) -> (i32, i32) {
    %c0_i32 = arith.constant 0 : i32
    %c0_i32_0 = arith.constant 0 : i32
    %c0_i32_1 = arith.constant 0 : i32
    return %c0_i32, %c0_i32_0 : i32, i32
  }
  func.func @transform_8(%arg0: i32, %arg1: i32) -> (i32, i32) {
    %c0_i32 = arith.constant 0 : i32
    %c0_i32_0 = arith.constant 0 : i32
    %c0_i32_1 = arith.constant 0 : i32
    return %c0_i32, %c0_i32_0 : i32, i32
  }
  func.func @transform_9(%arg0: i32, %arg1: i32) -> (i32, i32) {
    %c0_i32 = arith.constant 0 : i32
    %c0_i32_0 = arith.constant 0 : i32
    %c0_i32_1 = arith.constant 0 : i32
    return %c0_i32, %c0_i32_0 : i32, i32
  }
  func.func @transform_10(%arg0: i32, %arg1: i32) -> (i32, i32) {
    %c0_i32 = arith.constant 0 : i32
    %c0_i32_0 = arith.constant 0 : i32
    %c0_i32_1 = arith.constant 0 : i32
    return %c0_i32, %c0_i32_0 : i32, i32
  }
  func.func @transform_11(%arg0: i32, %arg1: i32) -> (i32, i32) {
    %c0_i32 = arith.constant 0 : i32
    %c0_i32_0 = arith.constant 0 : i32
    %c0_i32_1 = arith.constant 0 : i32
    return %c0_i32, %c0_i32_0 : i32, i32
  }
  func.func @transform_12(%arg0: i32, %arg1: i32) -> (i32, i32) {
    %c0_i32 = arith.constant 0 : i32
    %c0_i32_0 = arith.constant 0 : i32
    %c0_i32_1 = arith.constant 0 : i32
    return %c0_i32, %c0_i32_0 : i32, i32
  }
  func.func @transform_13(%arg0: i32, %arg1: i32) -> (i32, i32, i32) {
    %c0_i32 = arith.constant 0 : i32
    %c0_i32_0 = arith.constant 0 : i32
    return %arg0, %arg1, %c0_i32 : i32, i32, i32
  }
}

</mosaic_0001>

<bundles_post_ra>
// kernel: tpu_custom_call.1
= control target key start
LH: loop header
LB: loop body
LE: loop exit
PB: predicated region body
PF: predicated region fallthrough
CT: control target
= control target key end

     0   :  { %s3271_s0 = inlined_call_operand.hbm [shape: f32[2,8,32], index: 0, kind: input, shape index: {}]   ;;  %s3272_s1 = inlined_call_operand.hbm [shape: bf16[2,32,8], index: 1, kind: input, shape index: {}]   ;;  %s3273_s2 = inlined_call_operand.hbm [shape: bf16[2,8,32], index: 2, kind: input, shape index: {}]   ;;  %s3274_s3 = inlined_call_operand.hbm [shape: bf16[32,32], index: 3, kind: input, shape index: {}]   ;;  %s3275_s4 = inlined_call_operand.hbm [shape: f32[1,32], index: 4, kind: input, shape index: {}]   ;;  %s3276_s5 = inlined_call_operand.hbm [shape: f32[1,32], index: 5, kind: input, shape index: {}]   ;;  %s3277_s6 = inlined_call_operand.hbm [shape: f32[1,32], index: 6, kind: input, shape index: {}]   ;;  %s3278_s7 = inlined_call_operand.hbm [shape: bf16[32,128], index: 7, kind: input, shape index: {}]   ;;  %s3279_s8 = inlined_call_operand.hbm [shape: f32[1,128], index: 8, kind: input, shape index: {}]   ;;  %s3280_s9 = inlined_call_operand.hbm [shape: bf16[128,32], index: 9, kind: input, shape index: {}]   ;;  %s3281_s10 = inlined_call_operand.hbm [shape: f32[1,32], index: 10, kind: input, shape index: {}]   ;;  %s3282_s11 = inlined_call_operand.hbm [shape: f32[1,32], index: 11, kind: input, shape index: {}]   ;;  %s3283_s12 = inlined_call_operand.hbm [shape: f32[1,32], index: 12, kind: input, shape index: {}]   ;;  %s3284_s13 = inlined_call_operand.hbm [shape: f32[2,8,32], index: 13, kind: output, shape index: {}]  }
   0x1   :  { %3307 = sst [smem:[#allocation38_spill]] %s3271_s0 }
   0x2   :  { %3308 = sst [smem:[#allocation39_spill]] %s3272_s1 }
   0x3   :  { %3309 = sst [smem:[#allocation40_spill]] %s3273_s2 }
   0x4   :  { %3310 = sst [smem:[#allocation41_spill]] %s3274_s3 }
   0x5   :  { %3311 = sst [smem:[#allocation42_spill]] %s3276_s5 }
   0x6   :  { %3312 = sst [smem:[#allocation43_spill]] %s3278_s7 }
   0x7   :  { %3313 = sst [smem:[#allocation44_spill]] %s3280_s9 }
   0x8   :  { %3314 = sst [smem:[#allocation45_spill]] %s3281_s10 }
   0x9   :  { %3315 = sst [smem:[#allocation46_spill]] %s3282_s11 }
   0xa   :  { %3316 = sst [smem:[#allocation47_spill]] %s3283_s12 }
   0xb   :  { %3317 = sst [smem:[#allocation48_spill]] %s3284_s13 }
   0xc   :  { %18 = vsyncpa [#allocation4], 0 }
   0xd   :  { %20 = vsyncpa [#allocation4 + $0x1], 0 }
   0xe   :  { %21 = vsyncpa [#allocation7], 0 }
   0xf   :  { %23 = vsyncpa [#allocation7 + $0x1], 0 }
  0x10   :  { %24 = vsyncpa [#allocation10], 0 }
  0x11   :  { %25 = vsyncpa [#allocation13], 0 }
  0x12   :  { %26 = vsyncpa [#allocation16], 0 }
  0x13   :  { %27 = vsyncpa [#allocation19], 0 }
  0x14   :  { %28 = vsyncpa [#allocation22], 0 }
  0x15   :  { %29 = vsyncpa [#allocation5], 0 }
  0x16   :  { %31 = vsyncpa [#allocation5 + $0x1], 0  ;;  %s2668_s25 = smov 0   ;;  %s2670_s26 = smov 0  }
  0x17   :  { %s2672_s27 = smov 0   ;;  %s2674_s28 = smov 0  }
  0x18   :  { %s2676_s29 = smov 0   ;;  %s2678_s30 = smov 0  }
  0x19 LB: > { %3318 = sst [smem:[#allocation33_spill]] %s2559_s27  ;;  %s2699_s14 = sadd.s32 4294967295, %s2571_s30   ;;  %s2571_s30 = sphi %s2678_s30, %s37_s30   ;;  %s2567_s29 = sphi %s2676_s29, %s3375_s29   ;;  %s2563_s28 = sphi %s2674_s28, %s3374_s28   ;;  %s2559_s27 = sphi %s2672_s27, %s3370_s27   ;;  %s2555_s26 = sphi %s2670_s26, %s3373_s26   ;;  %s2551_s25 = sphi %s2668_s25, %s3372_s25  }
  0x1a   : > { %3319 = sst [smem:[#allocation34_spill]] %s2563_s28  ;;  %p1695_p0 = scmp.ge.s32.totalorder %s2571_s30, 1 }
  0x1b   : > { %p3291_p1 = scmp.eq.s32.totalorder %s2699_s14, 0  ;;  %p372_p2 = scmp.lt.s32.totalorder %s2571_s30, 3 }
  0x1c   : > { %s2573_s16 = smov [#allocation9]   ;;  %s2574_s19 = smov [#allocation12]  }
  0x1d   : > { %p2704_p3 = pnand %p1695_p0, %p372_p2  ;;  %s384_s17 = sshll.u32 %s2573_s16, 4  ;;  %s2708_s17 = int_to_ptr.vmem [resolvable:$true] %s384_s17 }
  0x1e   : > { %s409_s20 = sshll.u32 %s2574_s19, 4  ;;  %s2575_s21 = smov [#allocation15]   ;;  %s2719_s20 = int_to_ptr.vmem [resolvable:$true] %s409_s20 }
  0x1f   : > { %s3320_s15 = scalar_select %p2704_p3, 1, 0 }
  0x20   : > { %p1927_p4 = pneg %p2704_p3  ;;  %s2721_s22 = sshll.u32 %s2575_s21, 4  ;;  %s431_s22 = int_to_ptr.vmem [resolvable:$true] %s2721_s22 }
  0x21   : > { %3321 = sst [smem:[#allocation35_spill]] %s3320_s15  ;;  %s3323_s3 = sld [smem:[#allocation41_spill]] }
  0x22   : > { %p2715_p6 = pnand %p1927_p4, %p3291_p1 }
  0x24   : > { %s3322_s18 = scalar_select %p2715_p6, 1, 0 }
  0x25   : > { %p2731_p8 = pneg %p2715_p6 }
  0x27   : > { %s2095_s16 = scalar_lea.hbm %s3323_s3, 256 }
  0x28   : > { %p2096_p7 = scmp.ne.s32.totalorder %s3323_s3, %s2095_s16  ;;  %p2102_p11 = scmp.lt.u32.totalorder %s2095_s16, %s3323_s3 }
  0x29   : > { %s3324_s15 = scalar_select %p2731_p8, 1, 0 }
  0x2a   : > { %p2098_p9 = pnand %p2731_p8, %p2096_p7 }
  0x2c   : > { %p2099_p10 = pneg %p2098_p9 }
  0x2e   : > { %p2104_p12 = pnand %p2102_p11, %p2099_p10 }
  0x30   : > { %2107 = shalt.err (!%p2104_p12)
}
  0x31   : > { %s2108_s13 = scalar_lea.vmem %s2708_s17, 256  ;;  %p2116_p4 = scmp.lt.s32.totalorder %s2708_s17, %s2708_s17 }
  0x32   : > { %p2109_p13 = scmp.ne.s32.totalorder %s2708_s17, %s2108_s13  ;;  %p2117_p5 = scmp.lt.s32.totalorder %s2108_s13, %s2108_s13 }
  0x34   : > { %p2111_p0 = pnand %p2109_p13, %p2731_p8  ;;  %p2118_p7 = por %p2117_p5, %p2116_p4 }
  0x36   : > { %p2112_p2 = pneg %p2111_p0 }
  0x38   : > { %p2119_p9 = pnand %p2118_p7, %p2112_p2 }
  0x3a   : > { %2122 = shalt.err (!%p2119_p9)
}
  0x3b   : > { %s3293_s28 = smov 64   ;;  %s3294_s23 = smov 4  }
  0x3c   : > { %1930 = dma.hbm_to_vmem [thread:$0]  (!%p2715_p6), %s3323_s3, 256, %s2708_s17, [#allocation10], %s3293_s28, %s3293_s28, %s3294_s23  }
  0x3d   : > { %s3325_s5 = sld [smem:[#allocation42_spill]] }
  0x43   : > { %s2123_s13 = scalar_lea.hbm %s3325_s5, 16 }
  0x44   : > { %p2124_p5 = scmp.ne.s32.totalorder %s3325_s5, %s2123_s13  ;;  %p2130_p12 = scmp.lt.u32.totalorder %s2123_s13, %s3325_s5 }
  0x46   : > { %p2126_p10 = pnand %p2124_p5, %p2731_p8 }
  0x48   : > { %p2127_p11 = pneg %p2126_p10 }
  0x4a   : > { %p2132_p13 = pnand %p2130_p12, %p2127_p11 }
  0x4c   : > { %2135 = shalt.err (!%p2132_p13)
}
  0x4d   : > { %s2136_s17 = scalar_lea.vmem %s2719_s20, 16  ;;  %s2143_s0 = scalar_lea.vmem %s2719_s20, 32 }
  0x4e   : > { %p2137_p0 = scmp.ne.s32.totalorder %s2719_s20, %s2136_s17  ;;  %p2144_p7 = scmp.lt.s32.totalorder %s2719_s20, %s2719_s20 }
  0x4f   : > { %p2145_p9 = scmp.lt.s32.totalorder %s2143_s0, %s2136_s17 }
  0x50   : > { %p2139_p2 = pnand %p2137_p0, %p2731_p8 }
  0x51   : > { %p2146_p5 = por %p2145_p9, %p2144_p7 }
  0x52   : > { %p2140_p4 = pneg %p2139_p2 }
  0x54   : > { %p2147_p10 = pnand %p2146_p5, %p2140_p4 }
  0x56   : > { %2150 = shalt.err (!%p2147_p10)
}
  0x57   : > { %1936 = dma.hbm_to_vmem [thread:$0]  (!%p2715_p6), %s3325_s5, 16, %s2719_s20, [#allocation13]  }
  0x58   : > { %s3326_s7 = sld [smem:[#allocation43_spill]] }
  0x5e   : > { %s2151_s16 = scalar_lea.hbm %s3326_s7, 256 }
  0x5f   : > { %p2152_p11 = scmp.ne.s32.totalorder %s3326_s7, %s2151_s16  ;;  %p2158_p0 = scmp.lt.u32.totalorder %s2151_s16, %s3326_s7 }
  0x61   : > { %p2154_p12 = pnand %p2152_p11, %p2731_p8 }
  0x63   : > { %p2155_p13 = pneg %p2154_p12 }
  0x65   : > { %p2160_p2 = pnand %p2158_p0, %p2155_p13 }
  0x67   : > { %2163 = shalt.err (!%p2160_p2)
}
  0x68   : > { %s2164_s0 = scalar_lea.vmem %s431_s22, 256  ;;  %p2172_p5 = scmp.lt.s32.totalorder %s431_s22, %s431_s22 }
  0x69   : > { %p2165_p4 = scmp.ne.s32.totalorder %s431_s22, %s2164_s0  ;;  %p2173_p10 = scmp.lt.s32.totalorder %s2164_s0, %s2164_s0 }
  0x6b   : > { %p2167_p7 = pnand %p2165_p4, %p2731_p8  ;;  %p2174_p1 = por %p2173_p10, %p2172_p5 }
  0x6d   : > { %p2168_p9 = pneg %p2167_p7 }
  0x6f   : > { %p2175_p3 = pnand %p2174_p1, %p2168_p9 }
  0x71   : > { %2178 = shalt.err (!%p2175_p3)
}
  0x72   : > { %1942 = dma.hbm_to_vmem [thread:$0]  (!%p2715_p6), %s3326_s7, 256, %s431_s22, [#allocation16], %s3293_s28, %s3293_s28, %s3294_s23  }
  0x73   : > { %s2578_s10 = smov [#allocation18]   ;;  %s2579_s24 = smov [#allocation21]  }
  0x74   : > { %s454_s12 = sshll.u32 %s2578_s10, 4  ;;  %s479_s16 = sshll.u32 %s2579_s24, 4  ;;  %s455_s12 = int_to_ptr.vmem [resolvable:$true] %s454_s12  ;;  %s480_s16 = int_to_ptr.vmem [resolvable:$true] %s479_s16 }
  0x75   : > { %s3327_s9 = sld [smem:[#allocation44_spill]] }
  0x7b   : > { %s2179_s13 = scalar_lea.hbm %s3327_s9, 1024 }
  0x7c   : > { %p2180_p1 = scmp.ne.s32.totalorder %s3327_s9, %s2179_s13  ;;  %p2186_p12 = scmp.lt.u32.totalorder %s2179_s13, %s3327_s9 }
  0x7e   : > { %p2182_p3 = pnand %p2180_p1, %p2731_p8 }
  0x80   : > { %p2183_p11 = pneg %p2182_p3 }
  0x82   : > { %p2188_p13 = pnand %p2186_p12, %p2183_p11 }
  0x84   : > { %2191 = shalt.err (!%p2188_p13)
}
  0x85   : > { %s2192_s22 = scalar_lea.vmem %s455_s12, 1024  ;;  %p2200_p7 = scmp.lt.s32.totalorder %s455_s12, %s455_s12 }
  0x86   : > { %p2193_p0 = scmp.ne.s32.totalorder %s455_s12, %s2192_s22  ;;  %p2201_p9 = scmp.lt.s32.totalorder %s2192_s22, %s2192_s22 }
  0x88   : > { %p2195_p2 = pnand %p2193_p0, %p2731_p8  ;;  %p2202_p5 = por %p2201_p9, %p2200_p7 }
  0x8a   : > { %p2196_p4 = pneg %p2195_p2 }
  0x8c   : > { %p2203_p10 = pnand %p2202_p5, %p2196_p4 }
  0x8e   : > { %2206 = shalt.err (!%p2203_p10)
}
  0x8f   : > { %1948 = dma.hbm_to_vmem [thread:$0]  (!%p2715_p6), %s3327_s9, 1024, %s455_s12, [#allocation19], %s3293_s28, %s3293_s28, %s3294_s23  }
  0x90   : > { %s3328_s11 = sld [smem:[#allocation46_spill]] }
  0x96   : > { %s2207_s19 = scalar_lea.hbm %s3328_s11, 16 }
  0x97   : > { %p2208_p1 = scmp.ne.s32.totalorder %s3328_s11, %s2207_s19  ;;  %p2214_p12 = scmp.lt.u32.totalorder %s2207_s19, %s3328_s11 }
  0x99   : > { %p2210_p3 = pnand %p2208_p1, %p2731_p8 }
  0x9b   : > { %p2211_p11 = pneg %p2210_p3 }
  0x9d   : > { %p2216_p13 = pnand %p2214_p12, %p2211_p11 }
  0x9f   : > { %2219 = shalt.err (!%p2216_p13)
}
  0xa0   : > { %s2220_s20 = scalar_lea.vmem %s480_s16, 16  ;;  %s2227_s12 = scalar_lea.vmem %s480_s16, 32 }
  0xa1   : > { %p2221_p0 = scmp.ne.s32.totalorder %s480_s16, %s2220_s20  ;;  %p2228_p7 = scmp.lt.s32.totalorder %s480_s16, %s480_s16 }
  0xa2   : > { %p2229_p9 = scmp.lt.s32.totalorder %s2227_s12, %s2220_s20 }
  0xa3   : > { %p2223_p2 = pnand %p2221_p0, %p2731_p8 }
  0xa4   : > { %p2230_p5 = por %p2229_p9, %p2228_p7 }
  0xa5   : > { %p2224_p4 = pneg %p2223_p2 }
  0xa7   : > { %p2231_p10 = pnand %p2230_p5, %p2224_p4 }
  0xa9   : > { %2234 = shalt.err (!%p2231_p10)
}
  0xaa   : > { %1954 = dma.hbm_to_vmem [thread:$0]  (!%p2715_p6), %s3328_s11, 16, %s480_s16, [#allocation22]  }
  0xab   : > { %s1694_s2 = sadd.s32 4294967294, %s2571_s30   ;;  %s49_s10 = sadd.s32 1, %s2567_s29 }
  0xac   : > { %s58_s24 = sadd.s32 1, %s2559_s27  ;;  %p51_p1 = scmp.ge.s32.totalorder %s49_s10, 2 }
  0xad   : > { %p65_p3 = scmp.ne.s32.totalorder %s2559_s27, %s2555_s26  ;;  %p66_p11 = scmp.eq.s32.totalorder %s2571_s30, 0 }
  0xae   : > { %p71_p12 = scmp.ne.s32.totalorder %s2555_s26, %s2551_s25  ;;  %s3377_s10 = smov (%p51_p1, %s49_s10), 0 }
  0xaf   : > { %3329 = sst [smem:[#allocation36_spill]] %s3377_s10  ;;  %p67_p13 = por %p66_p11, %p65_p3 }
  0xb0   : > { %p3330_p0 = scmp.eq.s32.totalorder %s2699_s14, 0  ;;  %s53_s16 = ssub.s32 %s2567_s29, %s3377_s10 }
  0xb1   : > { %p359_p4 = scmp.eq.s32.totalorder %s2699_s14, 1  ;;  %p56_p7 = scmp.eq.s32.totalorder %s53_s16, 0 }
  0xb2   : > { %p2852_p2 = por %p3330_p0, %p71_p12  ;;  %p365_p9 = scmp.eq.s32.totalorder %s1694_s2, 1 }
  0xb3   : > { %p2859_p5 = por %p359_p4, %p65_p3  ;;  %p1982_p10 = scmp.lt.s32.totalorder %s2571_s30, 2 }
  0xb4   : > { %s3331_s19 = scalar_select %p2852_p2, 1, 0 }
  0xb5   : > { %s3332_s21 = scalar_select %p2859_p5, 1, 0 }
  0xb6   : > { %s2865_s13 = scalar_select %p56_p7, %s2559_s27, %s58_s24  }
  0xb7   : > { %p2867_p1 = por %p365_p9, %p71_p12  ;;  %s2872_s0 = sand.u32 1, %s2559_s27  }
  0xb8   : > { %3333 = sst [smem:[#allocation37_spill]] %s2865_s13  ;;  %p2874_p11 = pnand %p1982_p10, %p67_p13 }
  0xb9   : > { %s3334_s17 = scalar_select %p2867_p1, 1, 0 }
  0xba   : > { %s3335_s20 = scalar_select %p2874_p11, 1, 0 }
  0xbb   : > { %s520_s12 = sand.u32 1, %s2571_s30   ;;  %s1709_s22 = sshll.u32 %s2872_s0, 4 }
  0xbc   : > { %s1763_s3 = sshll.u32 %s2567_s29, 8  ;;  %s524_s2 = scalar_lea.vmem [#allocation6], %s1709_s22 }
  0xbd   : > { %s531_s16 = sshll.u32 %s524_s2, 4  ;;  %s3336_s1 = sld [smem:[#allocation39_spill]]  ;;  %s2886_s16 = int_to_ptr.vmem [resolvable:$true] %s531_s16 }
  0xbe   : > { %s2888_s5 = scalar_lea.sflag [#allocation7], %s520_s12  ;;  %p2894_p12 = pneg %p2874_p11 }
  0xc0   : > { %s3337_s9 = scalar_select %p2894_p12, 1, 0 }
  0xc3   : > { %s2884_s23 = scalar_lea.hbm %s3336_s1, %s1763_s3  ;;  %s2240_s3 = scalar_lea.hbm %s3336_s1, 512 }
  0xc4   : > { %s2235_s7 = scalar_lea.hbm %s2884_s23, 256  ;;  %p2241_p4 = scmp.lt.u32.totalorder %s2884_s23, %s3336_s1 }
  0xc5   : > { %p2236_p3 = scmp.ne.s32.totalorder %s2884_s23, %s2235_s7  ;;  %p2242_p7 = scmp.lt.u32.totalorder %s2240_s3, %s2235_s7 }
  0xc6   : > { %p2244_p10 = scmp.lt.u32.totalorder %s2235_s7, %s2884_s23 }
  0xc7   : > { %p2238_p13 = pnand %p2894_p12, %p2236_p3  ;;  %p2243_p9 = por %p2242_p7, %p2241_p4 }
  0xc9   : > { %p2239_p0 = pneg %p2238_p13  ;;  %p2245_p1 = por %p2244_p10, %p2243_p9 }
  0xcb   : > { %p2246_p5 = pnand %p2245_p1, %p2239_p0 }
  0xcd   : > { %2249 = shalt.err (!%p2246_p5)
}
  0xce   : > { %s2250_s12 = scalar_lea.vmem %s2886_s16, 256  ;;  %s2580_s28 = smov [#allocation6]  }
  0xcf   : > { %p2251_p3 = scmp.ne.s32.totalorder %s2886_s16, %s2250_s12  ;;  %s2255_s22 = sshll.u32 %s2580_s28, 4  ;;  %s2256_s22 = int_to_ptr.vmem [resolvable:$false] %s2255_s22 }
  0xd0   : > { %s2257_s2 = scalar_lea.vmem %s2256_s22, 512  ;;  %p2258_p6 = scmp.lt.s32.totalorder %s2886_s16, %s2256_s22 }
  0xd1   : > { %p2253_p13 = pnand %p2251_p3, %p2894_p12  ;;  %p2259_p8 = scmp.lt.s32.totalorder %s2257_s2, %s2250_s12 }
  0xd3   : > { %p2254_p2 = pneg %p2253_p13  ;;  %p2260_p4 = por %p2259_p8, %p2258_p6 }
  0xd5   : > { %p2261_p7 = pnand %p2260_p4, %p2254_p2 }
  0xd7   : > { %2264 = shalt.err (!%p2261_p7)
}
  0xd8   : > { %s3338_s7 = smov 4   ;;  %s3339_s3 = smov 64  }
  0xd9   : > { %1964 = dma.hbm_to_vmem [thread:$0]  (!%p2874_p11), %s2884_s23, 256, %s2886_s16, %s2888_s5, %s3339_s3, %s3339_s3, %s3338_s7  }
  0xda   : > { %s2581_s24 = smov [#allocation11]   ;;  %s2582_s28 = smov [#allocation14]  }
  0xdb   : > { %s398_s1 = sshll.u32 %s2581_s24, 4  ;;  %s420_s11 = sshll.u32 %s2582_s28, 4  ;;  %s399_s1 = int_to_ptr.vmem [resolvable:$true] %s398_s1  ;;  %s2921_s11 = int_to_ptr.vmem [resolvable:$true] %s420_s11 }
  0xdc   : > { %s2265_s2 = scalar_lea.hbm %s3275_s4, 16  ;;  %p3340_p8 = scmp.ne.s32.totalorder %s3324_s15, 0 }
  0xdd   : > { %p2266_p6 = scmp.ne.s32.totalorder %s3275_s4, %s2265_s2  ;;  %p2272_p1 = scmp.lt.u32.totalorder %s2265_s2, %s3275_s4 }
  0xdf   : > { %p2268_p2 = pnand %p2266_p6, %p3340_p8 }
  0xe1   : > { %p2269_p5 = pneg %p2268_p2 }
  0xe3   : > { %p2274_p0 = pnand %p2272_p1, %p2269_p5 }
  0xe5   : > { %2277 = shalt.err (!%p2274_p0)
}
  0xe6   : > { %s2278_s16 = scalar_lea.vmem %s399_s1, 16  ;;  %s2285_s7 = scalar_lea.vmem %s399_s1, 32 }
  0xe7   : > { %p2279_p9 = scmp.ne.s32.totalorder %s399_s1, %s2278_s16  ;;  %p2286_p13 = scmp.lt.s32.totalorder %s399_s1, %s399_s1 }
  0xe8   : > { %p2287_p4 = scmp.lt.s32.totalorder %s2285_s7, %s2278_s16 }
  0xe9   : > { %p2281_p10 = pnand %p2279_p9, %p3340_p8 }
  0xea   : > { %p2288_p7 = por %p2287_p4, %p2286_p13 }
  0xeb   : > { %p2282_p3 = pneg %p2281_p10 }
  0xed   : > { %p2289_p11 = pnand %p2288_p7, %p2282_p3 }
  0xef   : > { %2292 = shalt.err (!%p2289_p11)
}
  0xf0   : > { %p3341_p6 = scmp.ne.s32.totalorder %s3322_s18, 0  ;;  %s2293_s24 = scalar_lea.hbm %s3277_s6, 16 }
  0xf1   : > { %p2294_p2 = scmp.ne.s32.totalorder %s3277_s6, %s2293_s24  ;;  %p2300_p11 = scmp.lt.u32.totalorder %s2293_s24, %s3277_s6 }
  0xf2   : > { %1933 = dma.hbm_to_vmem [thread:$0]  (!%p3341_p6), %s3275_s4, 16, %s399_s1, [#allocation10]  }
  0xf3   : > { %p2296_p5 = pnand %p2294_p2, %p3340_p8 }
  0xf5   : > { %p2297_p1 = pneg %p2296_p5 }
  0xf7   : > { %p2302_p0 = pnand %p2300_p11, %p2297_p1 }
  0xf9   : > { %2305 = shalt.err (!%p2302_p0)
}
  0xfa   : > { %s2306_s1 = scalar_lea.vmem %s2921_s11, 16  ;;  %s2313_s23 = scalar_lea.vmem %s2921_s11, 32 }
  0xfb   : > { %p2307_p9 = scmp.ne.s32.totalorder %s2921_s11, %s2306_s1  ;;  %p2314_p13 = scmp.lt.s32.totalorder %s2921_s11, %s2921_s11 }
  0xfc   : > { %p2315_p4 = scmp.lt.s32.totalorder %s2313_s23, %s2306_s1 }
  0xfd   : > { %p2309_p10 = pnand %p2307_p9, %p3340_p8 }
  0xfe   : > { %p2316_p7 = por %p2315_p4, %p2314_p13 }
  0xff   : > { %p2310_p3 = pneg %p2309_p10 }
 0x101   : > { %p2317_p2 = pnand %p2316_p7, %p2310_p3 }
 0x103   : > { %2320 = shalt.err (!%p2317_p2)
}
 0x104   : > { %1939 = dma.hbm_to_vmem [thread:$0]  (!%p3341_p6), %s3277_s6, 16, %s2921_s11, [#allocation13]  }
 0x105   : > { %s2583_s10 = smov [#allocation17]   ;;  %s2584_s27 = smov [#allocation20]  }
 0x106   : > { %s444_s13 = sshll.u32 %s2583_s10, 4  ;;  %s468_s3 = sshll.u32 %s2584_s27, 4  ;;  %s445_s13 = int_to_ptr.vmem [resolvable:$true] %s444_s13  ;;  %s2965_s3 = int_to_ptr.vmem [resolvable:$true] %s468_s3 }
 0x107   : > { %s2321_s12 = scalar_lea.hbm %s3279_s8, 16 }
 0x108   : > { %p2322_p5 = scmp.ne.s32.totalorder %s3279_s8, %s2321_s12  ;;  %p2328_p0 = scmp.lt.u32.totalorder %s2321_s12, %s3279_s8 }
 0x10a   : > { %p2324_p1 = pnand %p2322_p5, %p3340_p8 }
 0x10c   : > { %p2325_p11 = pneg %p2324_p1 }
 0x10e   : > { %p2330_p9 = pnand %p2328_p0, %p2325_p11 }
 0x110   : > { %2333 = shalt.err (!%p2330_p9)
}
 0x111   : > { %s2334_s23 = scalar_lea.vmem %s445_s13, 16  ;;  %s2341_s16 = scalar_lea.vmem %s445_s13, 32 }
 0x112   : > { %p2335_p10 = scmp.ne.s32.totalorder %s445_s13, %s2334_s23  ;;  %p2342_p4 = scmp.lt.s32.totalorder %s445_s13, %s445_s13 }
 0x113   : > { %p2343_p7 = scmp.lt.s32.totalorder %s2341_s16, %s2334_s23 }
 0x114   : > { %p2337_p3 = pnand %p2335_p10, %p3340_p8 }
 0x115   : > { %p2344_p2 = por %p2343_p7, %p2342_p4 }
 0x116   : > { %p2338_p13 = pneg %p2337_p3 }
 0x118   : > { %p2345_p12 = pnand %p2344_p2, %p2338_p13 }
 0x11a   : > { %2348 = shalt.err (!%p2345_p12)
}
 0x11b   : > { %1945 = dma.hbm_to_vmem [thread:$0]  (!%p3341_p6), %s3279_s8, 16, %s445_s13, [#allocation16]  }
 0x11c   : > { %s3342_s28 = sld [smem:[#allocation45_spill]] }
 0x122   : > { %s3343_s12 = smov %s3342_s28  ;;  %s2349_s22 = scalar_lea.hbm %s3342_s28, 16 }
 0x123   : > { %p2350_p5 = scmp.ne.s32.totalorder %s3343_s12, %s2349_s22  ;;  %p2356_p12 = scmp.lt.u32.totalorder %s2349_s22, %s3343_s12 }
 0x125   : > { %p2352_p1 = pnand %p2350_p5, %p3340_p8 }
 0x127   : > { %p2353_p11 = pneg %p2352_p1 }
 0x129   : > { %p2358_p0 = pnand %p2356_p12, %p2353_p11 }
 0x12b   : > { %2361 = shalt.err (!%p2358_p0)
}
 0x12c   : > { %s2362_s13 = scalar_lea.vmem %s2965_s3, 16  ;;  %s2369_s16 = scalar_lea.vmem %s2965_s3, 32 }
 0x12d   : > { %p2363_p9 = scmp.ne.s32.totalorder %s2965_s3, %s2362_s13  ;;  %p2370_p13 = scmp.lt.s32.totalorder %s2965_s3, %s2965_s3 }
 0x12e   : > { %p2371_p4 = scmp.lt.s32.totalorder %s2369_s16, %s2362_s13 }
 0x12f   : > { %p2365_p10 = pnand %p2363_p9, %p3340_p8 }
 0x130   : > { %p2372_p7 = por %p2371_p4, %p2370_p13 }
 0x131   : > { %p2366_p3 = pneg %p2365_p10 }
 0x133   : > { %p2373_p2 = pnand %p2372_p7, %p2366_p3 }
 0x135   : > { %2376 = shalt.err (!%p2373_p2)
}
 0x136   : > { %1951 = dma.hbm_to_vmem [thread:$0]  (!%p3341_p6), %s3343_s12, 16, %s2965_s3, [#allocation19]  }
 0x137   : > { %s2585_s27 = smov [#allocation23]   ;;  %s1707_s28 = sshll.u32 %s2872_s0, 3 }
 0x138   : > { %s490_s24 = sshll.u32 %s2585_s27, 4  ;;  %s3344_s1 = sld [smem:[#allocation47_spill]]  ;;  %s491_s24 = int_to_ptr.vmem [resolvable:$true] %s490_s24 }
 0x13e   : > { %s2377_s11 = scalar_lea.hbm %s3344_s1, 16 }
 0x13f   : > { %p2378_p5 = scmp.ne.s32.totalorder %s3344_s1, %s2377_s11  ;;  %p2384_p12 = scmp.lt.u32.totalorder %s2377_s11, %s3344_s1 }
 0x141   : > { %p2380_p1 = pnand %p2378_p5, %p3340_p8 }
 0x143   : > { %p2381_p11 = pneg %p2380_p1 }
 0x145   : > { %p2386_p0 = pnand %p2384_p12, %p2381_p11 }
 0x147   : > { %2389 = shalt.err (!%p2386_p0)
}
 0x148   : > { %s2390_s3 = scalar_lea.vmem %s491_s24, 16  ;;  %s2397_s10 = scalar_lea.vmem %s491_s24, 32 }
 0x149   : > { %p2391_p9 = scmp.ne.s32.totalorder %s491_s24, %s2390_s3  ;;  %p2398_p13 = scmp.lt.s32.totalorder %s491_s24, %s491_s24 }
 0x14a   : > { %p2399_p4 = scmp.lt.s32.totalorder %s2397_s10, %s2390_s3 }
 0x14b   : > { %p2393_p10 = pnand %p2391_p9, %p3340_p8 }
 0x14c   : > { %p2400_p7 = por %p2399_p4, %p2398_p13 }
 0x14d   : > { %p2394_p3 = pneg %p2393_p10 }
 0x14f   : > { %p2401_p2 = pnand %p2400_p7, %p2394_p3 }
 0x151   : > { %2404 = shalt.err (!%p2401_p2)
}
 0x152   : > { %1957 = dma.hbm_to_vmem [thread:$0]  (!%p3341_p6), %s3344_s1, 16, %s491_s24, [#allocation22]  }
 0x153   : > { %s1708_s2 = sshll.u32 %s2567_s29, 7  ;;  %s505_s11 = scalar_lea.vmem [#allocation3], %s1707_s28 }
 0x154   : > { %s513_s15 = sshll.u32 %s505_s11, 4  ;;  %s3345_s16 = sld [smem:[#allocation38_spill]]  ;;  %s514_s15 = int_to_ptr.vmem [resolvable:$true] %s513_s15 }
 0x155   : > { %s502_s18 = scalar_lea.sflag [#allocation4], %s2872_s0  ;;  %p3346_p5 = scmp.ne.s32.totalorder %s3337_s9, 0 }
 0x15a   : > { %s3032_s7 = scalar_lea.hbm %s3345_s16, %s1708_s2  ;;  %s2410_s28 = scalar_lea.hbm %s3345_s16, 256 }
 0x15b   : > { %s2405_s3 = scalar_lea.hbm %s3032_s7, 128  ;;  %p2411_p6 = scmp.lt.u32.totalorder %s3032_s7, %s3345_s16 }
 0x15c   : > { %p2406_p8 = scmp.ne.s32.totalorder %s3032_s7, %s2405_s3  ;;  %p2412_p12 = scmp.lt.u32.totalorder %s2410_s28, %s2405_s3 }
 0x15d   : > { %p2414_p9 = scmp.lt.u32.totalorder %s2405_s3, %s3032_s7 }
 0x15e   : > { %p2408_p1 = pnand %p2406_p8, %p3346_p5  ;;  %p2413_p0 = por %p2412_p12, %p2411_p6 }
 0x160   : > { %p2409_p11 = pneg %p2408_p1  ;;  %p2415_p10 = por %p2414_p9, %p2413_p0 }
 0x162   : > { %p2416_p3 = pnand %p2415_p10, %p2409_p11 }
 0x164   : > { %2419 = shalt.err (!%p2416_p3)
}
 0x165   : > { %s2420_s2 = scalar_lea.vmem %s514_s15, 128  ;;  %s2586_s11 = smov [#allocation3]  }
 0x166   : > { %p2421_p13 = scmp.ne.s32.totalorder %s514_s15, %s2420_s2  ;;  %s2425_s23 = sshll.u32 %s2586_s11, 4  ;;  %s2426_s23 = int_to_ptr.vmem [resolvable:$false] %s2425_s23 }
 0x167   : > { %s2427_s13 = scalar_lea.vmem %s2426_s23, 256  ;;  %p2428_p2 = scmp.lt.s32.totalorder %s514_s15, %s2426_s23 }
 0x168   : > { %p2423_p4 = pnand %p2421_p13, %p3346_p5  ;;  %p2429_p8 = scmp.lt.s32.totalorder %s2427_s13, %s2420_s2 }
 0x16a   : > { %p2424_p7 = pneg %p2423_p4  ;;  %p2430_p1 = por %p2429_p8, %p2428_p2 }
 0x16c   : > { %p2431_p6 = pnand %p2430_p1, %p2424_p7 }
 0x16e   : > { %2434 = shalt.err (!%p2431_p6)
}
 0x16f   : > { %p3347_p12 = scmp.ne.s32.totalorder %s3335_s20, 0  ;;  %s1712_s3 = sshll.u32 %s2872_s0, 2 }
 0x170   : > { %s1713_s24 = sshll.u32 %s2567_s29, 6  ;;  %s3348_s27 = sld [smem:[#allocation40_spill]] }
 0x171   : > { %1961 = dma.hbm_to_vmem [thread:$0]  (!%p3347_p12), %s3032_s7, 128, %s514_s15, %s502_s18  }
 0x172   : > { %s545_s2 = scalar_lea.vmem [#allocation8], %s1712_s3 }
 0x173   : > { %s552_s23 = sshll.u32 %s545_s2, 4  ;;  %s553_s23 = int_to_ptr.vmem [resolvable:$true] %s552_s23 }
 0x176   : > { %s3349_s22 = smov %s3348_s27  ;;  %s3057_s11 = scalar_lea.hbm %s3348_s27, %s1713_s24 }
 0x177   : > { %s2435_s13 = scalar_lea.hbm %s3057_s11, 64  ;;  %s2440_s7 = scalar_lea.hbm %s3349_s22, 128 }
 0x178   : > { %p2436_p11 = scmp.ne.s32.totalorder %s3057_s11, %s2435_s13  ;;  %p2441_p10 = scmp.lt.u32.totalorder %s3057_s11, %s3349_s22 }
 0x179   : > { %p2442_p3 = scmp.lt.u32.totalorder %s2440_s7, %s2435_s13  ;;  %p2444_p4 = scmp.lt.u32.totalorder %s2435_s13, %s3057_s11 }
 0x17a   : > { %p2438_p0 = pnand %p2436_p11, %p3346_p5 }
 0x17b   : > { %p2443_p13 = por %p2442_p3, %p2441_p10 }
 0x17c   : > { %p2439_p9 = pneg %p2438_p0 }
 0x17d   : > { %p2445_p7 = por %p2444_p4, %p2443_p13 }
 0x17f   : > { %p2446_p2 = pnand %p2445_p7, %p2439_p9 }
 0x181   : > { %2449 = shalt.err (!%p2446_p2)
}
 0x182   : > { %s2450_s3 = scalar_lea.vmem %s553_s23, 64  ;;  %s2587_s24 = smov [#allocation8]  }
 0x183   : > { %p2451_p8 = scmp.ne.s32.totalorder %s553_s23, %s2450_s3  ;;  %s2455_s28 = sshll.u32 %s2587_s24, 4  ;;  %s2456_s28 = int_to_ptr.vmem [resolvable:$false] %s2455_s28 }
 0x184   : > { %s2457_s27 = scalar_lea.vmem %s2456_s28, 128  ;;  %p2458_p11 = scmp.lt.s32.totalorder %s553_s23, %s2456_s28 }
 0x185   : > { %p2453_p1 = pnand %p2451_p8, %p3346_p5  ;;  %p2459_p0 = scmp.lt.s32.totalorder %s2457_s27, %s2450_s3 }
 0x187   : > { %p2454_p6 = pneg %p2453_p1  ;;  %p2460_p12 = por %p2459_p0, %p2458_p11 }
 0x189   : > { %p2461_p3 = pnand %p2460_p12, %p2454_p6 }
 0x18b   : > { %2464 = shalt.err (!%p2461_p3)
}
 0x18c   : > { %p3350_p10 = scmp.ne.s32.totalorder %s3335_s20, 0  ;;  %s3351_s2 = sld [smem:[#allocation35_spill]] }
 0x18e   : > { %1967 = dma.hbm_to_vmem [thread:$0]  (!%p3350_p10), %s3057_s11, 64, %s553_s23, %s2888_s5  }
 0x192   : > { %p3352_p9 = scmp.ne.s32.totalorder %s3351_s2, 0 }
 0x193   : > { %s3080_s9 = sand.u32 (!%p3352_p9), 1, %s2555_s26   ;;  %p3353_p5 = scmp.ne.s32.totalorder (!%p3352_p9), %s3331_s19, 0 }
 0x194   : > { %561 = sbr.rel (%p3352_p9) target bundleno = 3157 (0xc55), region = 72  ;;  %s1715_s13 = sshll.u32 (!%p3352_p9), %s3080_s9, 3 }
 0x195   : > { %s564_s15 = scalar_lea.sflag (!%p3352_p9), [#allocation4], %s3080_s9  ;;  %s567_s0 = scalar_lea.vmem (!%p3352_p9), [#allocation3], %s1715_s13 }
 0x19b   : > { %2518 = dma.done.wait (%p3353_p5), %s564_s15, 128  }
 0x19c   : > { %2520 = vsyncadd (%p3353_p5), %s564_s15, 4294967168  ;;  %s572_s5 = sand.u32 1, %s2699_s14   ;;  %s1716_s20 = sshll.u32 %s3080_s9, 4 }
 0x19d   : > { %s573_s11 = scalar_lea.sflag [#allocation7], %s572_s5  ;;  %s3092_s23 = scalar_lea.vmem [#allocation6], %s1716_s20 }
 0x19e   : > { %2522 = dma.done.wait (%p3353_p5), %s573_s11, 320  }
 0x19f   : > { %2524 = vsyncadd (%p3353_p5), %s573_s11, 4294966976  ;;  %s1717_s7 = sshll.u32 %s3080_s9, 2  ;;  %p3354_p12 = scmp.eq.s32.totalorder %s2699_s14, 0 }
 0x1a0   : > { %s3099_s18 = scalar_lea.vmem [#allocation8], %s1717_s7 }
 0x1a1   : > { %2526 = dma.done.wait (%p3354_p12), [#allocation10], 272   ;;  %p3355_p13 = pmov %p3354_p12 }
 0x1a2   : > { %p3356_p4 = pmov %p3354_p12 }
 0x1a3   : > { %2528 = vsyncadd (%p3355_p13), [#allocation10], 4294967024 }
 0x1a4   : > { %2530 = dma.done.wait (%p3356_p4), [#allocation13], 32   ;;  %p3357_p7 = pmov %p3356_p4 }
 0x1a5   : > { %p3358_p2 = pmov %p3356_p4 }
 0x1a6   : > { %2532 = vsyncadd (%p3357_p7), [#allocation13], 4294967264 }
 0x1a7   : > { %2534 = dma.done.wait (%p3358_p2), [#allocation16], 272   ;;  %p3359_p8 = pmov %p3358_p2 }
 0x1a8   : > { %p3360_p1 = pmov %p3358_p2 }
 0x1a9   : > { %2536 = vsyncadd (%p3359_p8), [#allocation16], 4294967024 }
 0x1aa   : > { %2538 = dma.done.wait (%p3360_p1), [#allocation19], 1040   ;;  %p3361_p6 = pmov %p3360_p1 }
 0x1ab   : > { %p3362_p11 = pmov %p3360_p1 }
 0x1ac   : > { %2540 = vsyncadd (%p3361_p6), [#allocation19], 4294966256 }
 0x1ad   : > { %2542 = dma.done.wait (%p3362_p11), [#allocation22], 32   ;;  %p3363_p0 = pmov %p3360_p1 }
 0x1ae   : > { %v2588_v0 = vmov 0.0   ;;  %vm2589_vm0 = vmmov 0   ;;  %vm700_vm1 = vcmask 1043456   ;;  %v682_v1 = vld [vmem:[%s3092_s23] sm:$0xf]  ;;  %v3128_v2 = vld [vmem:[%s567_s0] sm:$0xff]  ;;  %v688_v6 = vlaneseq }
 0x1af   : > { %2544 = vsyncadd (%p3363_p0), [#allocation22], 4294967264  ;;  %1795 = vmatprep.subr.bf16.mxu1 %v2588_v0  ;;  %1797 = vmatprep.mubr.msk.bf16.mxu1 %vm2589_vm0, %v2588_v0  ;;  %v702_v3 = vsel %vm700_vm1, %v682_v1, 0  ;;  %v680_v4 = vmul.f32 0.35355338, %v3128_v2  ;;  %vm696_vm2 = vcmask 64512  }
 0x1b0   : > { %1819 = vmatprep.subr.bf16.mxu0 %v2588_v0  ;;  %1821 = vmatprep.mubr.msk.bf16.mxu0 %vm2589_vm0, %v2588_v0  ;;  %s2590_s14 = smov 120   ;;  %s2591_s19 = smov 112   ;;  %v689_v7 = vshrl.u32 %v688_v6, 7  ;;  %v693_v8 = vand.u32 127, %v688_v6  ;;  %v2592_v9 = vmov -1e+20  }
 0x1b1   : > { %1796 = vmatpush3.bf16.msra.mxu1 %v702_v3  ;;  %v681_v5 = vpack.c.bf16 %v680_v4, %v680_v4  ;;  %v684_v18 = vld [vmem:[%s3092_s23 + $0x8] sm:$0xf]  ;;  %s2593_s10 = smov 104   ;;  %v686_v26 = vld [vmem:[%s3099_s18] sm:$0xf]  ;;  %s2594_s3 = smov 8  }
 0x1b2   : > { %1801 = vmatprep.subr.bf16.mxu1 %v2588_v0  ;;  %vm694_vm3 = vcmp.le.s32.totalorder %v693_v8, %v689_v7  ;;  %v927_v19 = vsel %vm700_vm1, %v684_v18, 0  ;;  %v760_v27 = vsel %vm700_vm1, %v686_v26, 0  ;;  %v685_v28 = vld [vmem:[%s3092_s23 + $0xc] sm:$0xf]  ;;  %v683_v39 = vld [vmem:[%s3092_s23 + $0x4] sm:$0xf]  ;;  %v1732_v1 = vcombine.low %v686_v26, %v686_v26 }
 0x1b3   : > { %804 = vrot.lane.b32.xlu1 %v681_v5, %s2590_s14  ;;  %v3138_v10 = vsel %vm694_vm3, 0.0, %v2592_v9  ;;  %1820 = vmatpush3.bf16.msra.mxu0 %v927_v19  ;;  %v1041_v29 = vsel %vm700_vm1, %v685_v28, 0  ;;  %v810_v42 = vsel %vm700_vm1, %v683_v39, 0  ;;  %s2595_s24 = smov 16   ;;  %s2596_s28 = smov 24   ;;  %vm919_vm4 = vcmask 130112  }
 0x1b4   : > { %1798 = vmatmul.mubr.msk.bf16.vlgmr.msra.gmra.mrb[0].mxu1 %vm696_vm2, %v681_v5  ;;  %1831 = vmatprep.subr.bf16.mxu0 %v2588_v0  ;;  %vm1033_vm5 = vcmask 195712   ;;  %vm1147_vm6 = vcmask 261312   ;;  %vm1174_vm7 = vcmask 261120   ;;  %s3364_s27 = sld [smem:[#allocation34_spill]]  ;;  %s677_s15 = scalar_lea.vmem [#allocation24], %s1715_s13 }
 0x1b5   : > { %1803 = vmatprep.mubr.msk.bf16.mxu1 %vm2589_vm0, %v2588_v0  ;;  %1802 = vmatpush3.bf16.msra.mxu1 %v760_v27  ;;  %s1475_s0 = sshll.u32 %s677_s15, 4  ;;  %s3365_s11 = sld [smem:[#allocation48_spill]]  ;;  %s3223_s0 = int_to_ptr.vmem [resolvable:$true] %s1475_s0 }
 0x1b6   : > { %1807 = vmatprep.subr.bf16.mxu1 %v2588_v0  ;;  %s1461_s7 = scalar_lea.sflag [#allocation5], %s3080_s9  ;;  %s2465_s18 = scalar_lea.vmem %s3223_s0, 128 }
 0x1b7   : > { %921 = vrot.lane.b32.xlu1 %v681_v5, %s2591_s19  ;;  %p2466_p3 = scmp.ne.s32.totalorder %s3223_s0, %s2465_s18  ;;  %p3366_p10 = scmp.ne.s32.totalorder %s3332_s21, 0 }
 0x1b8   : > { %s2597_s13 = smov [#allocation24]  }
 0x1b9   : > { %p2467_p9 = pnand %p2466_p3, %p3366_p10 }
 0x1ba   : > { %s1760_s2 = sshll.u32 %s3364_s27, 7 }
 0x1bb   : > { %s3221_s23 = scalar_lea.hbm %s3365_s11, %s1760_s2  ;;  %p2468_p5 = pneg %p2467_p9 }
 0x225   : > { %v805_v17 = vpop.permute.xlu1 %804 }
 0x229   : > { %v922_v20 = vpop.permute.xlu1 %921 }
 0x22a   : > { %1822 = vmatmul.mubr.msk.bf16.vlgmr.msra.gmra.mrb[0].mxu0 %vm696_vm2, %v922_v20 }
 0x22b   : > { %1833 = vmatprep.mubr.msk.bf16.mxu0 %vm2589_vm0, %v2588_v0  ;;  %1832 = vmatpush3.bf16.msra.mxu0 %v1041_v29 }
 0x22c   : > { %1843 = vmatprep.subr.bf16.mxu0 %v2588_v0 }
 0x287   : > { %v738_v11 = vpop.f32.mrb[0].mxu1 }
 0x288   : > { %v739_v12 = vadd.f32 %v738_v11, %v3138_v10  ;;  %v1799_v13 = vpop.f32.mrb[1].mxu1 }
 0x289   : > { %v741_v14 = vpop.f32.mrb[2].mxu1 }
 0x28a   : > { %v1800_v15 = vpop.f32.mrb[3].mxu1  ;;  %v744_v16 = vsel %vm696_vm2, %v739_v12, -inf }
 0x28b   : > { %745 = vmax.xlane.f32.xlu0 %v744_v16 }
 0x2fd   : > { %v963_v30 = vpop.f32.mrb[0].mxu0 }
 0x2fe   : > { %v964_v31 = vadd.f32 %v963_v30, %v3138_v10  ;;  %v1823_v32 = vpop.f32.mrb[1].mxu0 }
 0x2ff   : > { %v966_v33 = vpop.f32.mrb[2].mxu0 }
 0x300   : > { %v969_v34 = vsel %vm696_vm2, %v964_v31, -inf  ;;  %v1824_v35 = vpop.f32.mrb[3].mxu0 }
 0x301   : > { %v2063_v35 = vld [vmem:[#allocation9] sm:$0xff]  }
 0x318   : > { %v746_v21 = vpop.xlane.xlu0 %745 }
 0x319   : > { %v747_v22 = vsub.f32 %v739_v12, %v746_v21 }
 0x31b   : > { %v748_v23 = vmul.f32 1.442695, %v747_v22 }
 0x31d   : > { %2075 = vpow2.f32 %v748_v23 }
 0x327   : > { %v2076_v24 = vpop.eup %2075 }
 0x328   : > { %v750_v25 = vsel %vm696_vm2, %v2076_v24, 0.0 }
 0x329   : > { %751 = vadd.xlane.f32.xlu0 %v750_v25 }
 0x33f   : > { %1035 = vrot.lane.b32.xlu0 %v681_v5, %s2593_s10 }
 0x35e   : > { %970 = vmax.xlane.f32.xlu0 %v969_v34 }
 0x374   : > { %981 = vrot.lane.b32.xlu0 %v1732_v1, %s2591_s19 }
 0x3b6   : > { %v752_v36 = vpop.xlane.xlu0 %751 }
 0x3b7   : > { %2077 = vrcp.f32 %v752_v36  ;;  %v2064_v36 = vld [vmem:[#allocation9 + $0x8] sm:$0xff]  }
 0x3ba   : > { %v1036_v37 = vpop.permute.xlu0 %1035 }
 0x3bb   : > { %1834 = vmatmul.mubr.msk.bf16.vlgmr.msra.gmra.mrb[4].mxu0 %vm696_vm2, %v1036_v37 }
 0x3bc   : > { %1847 = vmatprep.mubr.msk.bf16.mxu0 %vm2589_vm0, %v2588_v0  ;;  %1844 = vmatpush3.bf16.msra.mxu0 %v2063_v35 }
 0x3bd   : > { %1845 = vmatprep.subr.bf16.mxu0 %v2588_v0 }
 0x3c0   : > { %1846 = vmatpush3.bf16.msra.mxu0 %v2064_v36 }
 0x3c1   : > { %v2078_v38 = vpop.eup %2077  ;;  %1859 = vmatprep.subr.bf16.mxu0 %v2588_v0 }
 0x3c2   : > { %v754_v40 = vmul.f32 %v2078_v38, %v2076_v24 }
 0x3c4   : > { %v755_v41 = vpack.c.bf16 %v754_v40, %v754_v40 }
 0x3c6   : > { %1804 = vmatmul.mubr.msk.bf16.vlgmr.msra.gmra.mrb[4].mxu1 %vm696_vm2, %v755_v41 }
 0x3c7   : > { %1808 = vmatpush3.bf16.msra.mxu1 %v810_v42  ;;  %1809 = vmatprep.mubr.msk.bf16.mxu1 %vm2589_vm0, %v2588_v0 }
 0x3c8   : > { %1813 = vmatprep.subr.bf16.mxu1 %v2588_v0 }
 0x3ce   : > { %1810 = vmatmul.mubr.msk.bf16.vlgmr.msra.gmra.mrb[8].mxu1 %vm696_vm2, %v805_v17 }
 0x3cf   : > { %1815 = vmatprep.mubr.msk.bf16.mxu1 %vm2589_vm0, %v2588_v0 }
 0x3eb   : > { %v971_v47 = vpop.xlane.xlu0 %970 }
 0x3ec   : > { %v972_v48 = vsub.f32 %v964_v31, %v971_v47 }
 0x3ee   : > { %v973_v50 = vmul.f32 1.442695, %v972_v48 }
 0x3ef   : > { %v982_v19 = vpop.permute.xlu0 %981 }
 0x3f0   : > { %2079 = vpow2.f32 %v973_v50  ;;  %v987_v21 = vsel %vm700_vm1, %v982_v19, 0  ;;  %v1738_v50 = vld [vmem:[#allocation11] ss:$0 sm:$0xff]  ;;  %v2074_v19 = vld [vmem:[#allocation18 + $0x38] sm:$0xff]  }
 0x3fa   : > { %v2080_v62 = vpop.eup %2079 }
 0x3fb   : > { %v975_v63 = vsel %vm696_vm2, %v2080_v62, 0.0 }
 0x48e   : > { %v1077_v43 = vpop.f32.mrb[4].mxu0 }
 0x48f   : > { %v1835_v44 = vpop.f32.mrb[5].mxu0  ;;  %v1078_v57 = vadd.f32 %v1077_v43, %v3138_v10 }
 0x490   : > { %v1080_v45 = vpop.f32.mrb[6].mxu0 }
 0x491   : > { %v1836_v46 = vpop.f32.mrb[7].mxu0  ;;  %v1083_v61 = vsel %vm696_vm2, %v1078_v57, -inf }
 0x499   : > { %v796_v49 = vpop.f32.mrb[4].mxu1 }
 0x49a   : > { %802 = vst.msk [vmem:[#allocation2] sm:$0xff] %vm696_vm2, %v796_v49  ;;  %v1805_v51 = vpop.f32.mrb[5].mxu1 }
 0x49b   : > { %v799_v52 = vpop.f32.mrb[6].mxu1 }
 0x49c   : > { %v1806_v53 = vpop.f32.mrb[7].mxu1 }
 0x4a1   : > { %v846_v54 = vpop.f32.mrb[8].mxu1 }
 0x4a2   : > { %v847_v55 = vadd.f32 %v846_v54, %v3138_v10  ;;  %v1811_v56 = vpop.f32.mrb[9].mxu1 }
 0x4a3   : > { %v849_v58 = vpop.f32.mrb[10].mxu1 }
 0x4a4   : > { %v1812_v59 = vpop.f32.mrb[11].mxu1  ;;  %v852_v60 = vsel %vm696_vm2, %v847_v55, -inf }
 0x4a5   : > { %853 = vmax.xlane.f32.xlu1 %v852_v60 }
 0x4a9   : > { %1084 = vmax.xlane.f32.xlu1 %v1083_v61 }
 0x4ad   : > { %976 = vadd.xlane.f32.xlu1 %v975_v63  ;;  %v2065_v63 = vld [vmem:[#allocation15] sm:$0xff]  }
 0x532   : > { %v854_v3 = vpop.xlane.xlu1 %853 }
 0x533   : > { %v855_v4 = vsub.f32 %v847_v55, %v854_v3  ;;  %v2067_v3 = vld [vmem:[#allocation18] sm:$0xff]  }
 0x535   : > { %v856_v7 = vmul.f32 1.442695, %v855_v4  ;;  %v2068_v4 = vld [vmem:[#allocation18 + $0x8] sm:$0xff]  }
 0x536   : > { %v1085_v5 = vpop.xlane.xlu1 %1084 }
 0x537   : > { %v1086_v6 = vsub.f32 %v1078_v57, %v1085_v5  ;;  %v2070_v5 = vld [vmem:[#allocation18 + $0x18] sm:$0xff]  }
 0x539   : > { %v1087_v8 = vmul.f32 1.442695, %v1086_v6  ;;  %v2071_v6 = vld [vmem:[#allocation18 + $0x20] sm:$0xff]  }
 0x53a   : > { %v977_v13 = vpop.xlane.xlu1 %976 }
 0x53b   : > { %2081 = vpow2.f32 %v1087_v8 }
 0x53c   : > { %2083 = vpow2.f32 %v856_v7  ;;  %v2072_v7 = vld [vmem:[#allocation18 + $0x28] sm:$0xff]  }
 0x545   : > { %v2082_v9 = vpop.eup %2081 }
 0x546   : > { %v1089_v10 = vsel %vm696_vm2, %v2082_v9, 0.0  ;;  %v2084_v11 = vpop.eup %2083 }
 0x547   : > { %1090 = vadd.xlane.f32.xlu1 %v1089_v10  ;;  %v858_v12 = vsel %vm696_vm2, %v2084_v11, 0.0 }
 0x54b   : > { %859 = vadd.xlane.f32.xlu1 %v858_v12  ;;  %v1742_v12 = vld [vmem:[#allocation12] ss:$0 sm:$0xff] }
 0x55c   : > { %867 = vrot.lane.b32.xlu1 %v1732_v1, %s2590_s14  ;;  %s2469_s14 = sshll.u32 %s2597_s13, 4  ;;  %s2470_s14 = int_to_ptr.vmem [resolvable:$false] %s2469_s14 }
 0x55d   : > { %s2471_s19 = scalar_lea.vmem %s2470_s14, 256  ;;  %p2472_p12 = scmp.lt.s32.totalorder %s3223_s0, %s2470_s14 }
 0x55e   : > { %p2473_p13 = scmp.lt.s32.totalorder %s2471_s19, %s2465_s18 }
 0x560   : > { %1095 = vrot.lane.b32.xlu1 %v1732_v1, %s2593_s10  ;;  %v2066_v1 = vld [vmem:[#allocation15 + $0x8] sm:$0xff]   ;;  %p2474_p4 = por %p2473_p13, %p2472_p12 }
 0x562   : > { %p2475_p7 = pnand %p2474_p4, %p2468_p5 }
 0x5d4   : > { %v1091_v14 = vpop.xlane.xlu1 %1090 }
 0x5d8   : > { %v860_v15 = vpop.xlane.xlu1 %859 }
 0x5d9   : > { %2085 = vrcp.f32 %v860_v15 }
 0x5da   : > { %2087 = vrcp.f32 %v977_v13 }
 0x5db   : > { %2089 = vrcp.f32 %v1091_v14  ;;  %v1743_v14 = vld [vmem:[#allocation14] ss:$0 sm:$0xff] }
 0x5dc   : > { %v868_v16 = vpop.permute.xlu1 %867 }
 0x5dd   : > { %v873_v17 = vsel %vm700_vm1, %v868_v16, 0 }
 0x5de   : > { %1814 = vmatpush3.bf16.msra.mxu1 %v873_v17 }
 0x5df   : > { %1825 = vmatprep.subr.bf16.mxu1 %v2588_v0 }
 0x5e0   : > { %v1096_v25 = vpop.permute.xlu1 %1095 }
 0x5e1   : > { %v1101_v26 = vsel %vm700_vm1, %v1096_v25, 0 }
 0x5e3   : > { %v2086_v18 = vpop.eup %2085 }
 0x5e4   : > { %v862_v20 = vmul.f32 %v2086_v18, %v2084_v11  ;;  %v2088_v23 = vpop.eup %2087  ;;  %v2073_v18 = vld [vmem:[#allocation18 + $0x30] sm:$0xff]  }
 0x5e5   : > { %v979_v24 = vmul.f32 %v2088_v23, %v2080_v62  ;;  %v2090_v28 = vpop.eup %2089 }
 0x5e6   : > { %v863_v22 = vpack.c.bf16 %v862_v20, %v862_v20  ;;  %v1093_v29 = vmul.f32 %v2090_v28, %v2082_v9  ;;  %v1744_v20 = vld [vmem:[#allocation17] ss:$0 sm:$0xff]  ;;  %v1748_v28 = vld [vmem:[#allocation20] ss:$0 sm:$0xff] }
 0x5e7   : > { %v980_v27 = vpack.c.bf16 %v979_v24, %v979_v24 }
 0x5e8   : > { %1816 = vmatmul.mubr.msk.bf16.vlgmr.msra.gmra.mrb[12].mxu1 %vm696_vm2, %v863_v22  ;;  %v1094_v30 = vpack.c.bf16 %v1093_v29, %v1093_v29 }
 0x5e9   : > { %1826 = vmatpush3.bf16.msra.mxu1 %v987_v21  ;;  %1827 = vmatprep.mubr.msk.bf16.mxu1 %vm2589_vm0, %v2588_v0 }
 0x5ea   : > { %1837 = vmatprep.subr.bf16.mxu1 %v2588_v0 }
 0x5f0   : > { %1828 = vmatmul.mubr.msk.bf16.vlgmr.msra.gmra.mrb[16].mxu1 %vm696_vm2, %v980_v27 }
 0x5f1   : > { %1838 = vmatpush3.bf16.msra.mxu1 %v1101_v26  ;;  %1839 = vmatprep.mubr.msk.bf16.mxu1 %vm2589_vm0, %v2588_v0 }
 0x5f2   : > { %1851 = vmatprep.subr.bf16.mxu1 %v2588_v0 }
 0x5f8   : > { %1840 = vmatmul.mubr.msk.bf16.vlgmr.msra.gmra.mrb[20].mxu1 %vm696_vm2, %v1094_v30 }
 0x5f9   : > { %1855 = vmatprep.mubr.msk.bf16.mxu1 %vm2589_vm0, %v2588_v0  ;;  %1852 = vmatpush3.bf16.msra.mxu1 %v2065_v63 }
 0x5fa   : > { %1853 = vmatprep.subr.bf16.mxu1 %v2588_v0 }
 0x5fd   : > { %1854 = vmatpush3.bf16.msra.mxu1 %v2066_v1 }
 0x6bb   : > { %v909_v31 = vpop.f32.mrb[12].mxu1 }
 0x6bc   : > { %916 = vrot.lane.b32.xlu1 %v909_v31, %s2594_s3  ;;  %v1817_v32 = vpop.f32.mrb[13].mxu1 }
 0x6bd   : > { %v912_v33 = vpop.f32.mrb[14].mxu1 }
 0x6be   : > { %v1818_v34 = vpop.f32.mrb[15].mxu1 }
 0x6c3   : > { %v1023_v37 = vpop.f32.mrb[16].mxu1 }
 0x6c4   : > { %1030 = vrot.lane.b32.xlu0 %v1023_v37, %s2595_s24  ;;  %v1829_v38 = vpop.f32.mrb[17].mxu1 }
 0x6c5   : > { %v1026_v39 = vpop.f32.mrb[18].mxu1 }
 0x6c6   : > { %v1830_v40 = vpop.f32.mrb[19].mxu1 }
 0x6cb   : > { %v1137_v41 = vpop.f32.mrb[20].mxu1 }
 0x6cc   : > { %1144 = vrot.lane.b32.xlu1 %v1137_v41, %s2596_s28  ;;  %v1841_v42 = vpop.f32.mrb[21].mxu1 }
 0x6cd   : > { %v1140_v43 = vpop.f32.mrb[22].mxu1 }
 0x6ce   : > { %v1842_v44 = vpop.f32.mrb[23].mxu1 }
 0x6cf   : > { %v1757_v44 = vld [vmem:[#allocation21] ss:$0 sm:$0xff] }
 0x72e   : > { %v917_v45 = vpop.permute.xlu1 %916 }
 0x72f   : > { %920 = vst.msk [vmem:[#allocation2] sm:$0xff] %vm919_vm4, %v917_v45 }
 0x736   : > { %v1031_v46 = vpop.permute.xlu0 %1030 }
 0x737   : > { %1034 = vst.msk [vmem:[#allocation2] sm:$0xff] %vm1033_vm5, %v1031_v46  ;;  %v1758_v46 = vld [vmem:[#allocation23] ss:$0 sm:$0xff] }
 0x73e   : > { %v1145_v47 = vpop.permute.xlu1 %1144 }
 0x73f   : > { %1148 = vst.msk [vmem:[#allocation2] sm:$0xff] %vm1147_vm6, %v1145_v47 }
 0x746   : > { %v1149_v48 = vld [vmem:[#allocation2] sm:$0xff] }
 0x747   : > { %v1150_v49 = vpack.c.bf16 %v1149_v48, %v1149_v48 }
 0x749   : > { %1848 = vmatmul.mubr.msk.bf16.vlgmr.msra.gmra.mrb[8].mxu0 %vm1174_vm7, %v1150_v49 }
 0x74a   : > { %1875 = vmatprep.mubr.msk.bf16.mxu0 %vm2589_vm0, %v2588_v0  ;;  %1860 = vmatpush3.bf16.msra.mxu0 %v2067_v3 }
 0x74b   : > { %1861 = vmatprep.subr.bf16.mxu0 %v2588_v0 }
 0x74e   : > { %1862 = vmatpush3.bf16.msra.mxu0 %v2068_v4 }
 0x74f   : > { %1863 = vmatprep.subr.bf16.mxu0 %v2588_v0 }
 0x81c   : > { %v1212_v51 = vpop.f32.mrb[8].mxu0 }
 0x81d   : > { %v1213_v52 = vadd.f32 %v1738_v50, %v1212_v51  ;;  %v1849_v53 = vpop.f32.mrb[9].mxu0 }
 0x81e   : > { %v1215_v54 = vpop.f32.mrb[10].mxu0 }
 0x81f   : > { %v1850_v55 = vpop.f32.mrb[11].mxu0  ;;  %v1218_v56 = vadd.f32 %v1213_v52, %v3128_v2  ;;  %v2069_v2 = vld [vmem:[#allocation18 + $0x10] sm:$0xff]  }
 0x820   : > { %1864 = vmatpush3.bf16.msra.mxu0 %v2069_v2 }
 0x821   : > { %v1221_v57 = vsel %vm1174_vm7, %v1218_v56, 0.0  ;;  %1865 = vmatprep.subr.bf16.mxu0 %v2588_v0 }
 0x822   : > { %1222 = vadd.xlane.f32.xlu0 %v1221_v57 }
 0x824   : > { %1866 = vmatpush3.bf16.msra.mxu0 %v2070_v5 }
 0x825   : > { %1867 = vmatprep.subr.bf16.mxu0 %v2588_v0 }
 0x828   : > { %1868 = vmatpush3.bf16.msra.mxu0 %v2071_v6 }
 0x829   : > { %1869 = vmatprep.subr.bf16.mxu0 %v2588_v0 }
 0x82c   : > { %1870 = vmatpush3.bf16.msra.mxu0 %v2072_v7 }
 0x82d   : > { %1871 = vmatprep.subr.bf16.mxu0 %v2588_v0 }
 0x830   : > { %1872 = vmatpush3.bf16.msra.mxu0 %v2073_v18 }
 0x831   : > { %1873 = vmatprep.subr.bf16.mxu0 %v2588_v0 }
 0x834   : > { %1874 = vmatpush3.bf16.msra.mxu0 %v2074_v19 }
 0x8af   : > { %v1223_v58 = vpop.xlane.xlu0 %1222 }
 0x8b0   : > { %v1225_v59 = vmul.f32 0.03125, %v1223_v58 }
 0x8b2   : > { %v1226_v60 = vsub.f32 %v1218_v56, %v1225_v59 }
 0x8b4   : > { %v1227_v61 = vmul.f32 %v1226_v60, %v1226_v60 }
 0x8b6   : > { %v1228_v62 = vsel %vm1174_vm7, %v1227_v61, 0.0 }
 0x8b7   : > { %1229 = vadd.xlane.f32.xlu1 %v1228_v62 }
 0x944   : > { %v1230_v8 = vpop.xlane.xlu1 %1229 }
 0x945   : > { %v1231_v9 = vmul.f32 0.03125, %v1230_v8 }
 0x947   : > { %v1232_v10 = vadd.f32 1e-05, %v1231_v9 }
 0x949   : > { %2091 = vrsqrt.f32 %v1232_v10 }
 0x953   : > { %v2092_v11 = vpop.eup %2091 }
 0x954   : > { %v1234_v13 = vmul.f32 %v2092_v11, %v1226_v60 }
 0x956   : > { %v1241_v15 = vmul.f32 %v1742_v12, %v1234_v13 }
 0x958   : > { %v1248_v16 = vadd.f32 %v1743_v14, %v1241_v15 }
 0x95a   : > { %v1249_v17 = vpack.c.bf16 %v1248_v16, %v1248_v16 }
 0x95c   : > { %1856 = vmatmul.mubr.msk.bf16.vlgmr.msra.gmra.mrb[24].mxu1 %vm1174_vm7, %v1249_v17 }
 0xa2f   : > { %v1310_v21 = vpop.f32.mrb[24].mxu1 }
 0xa30   : > { %v1311_v22 = vadd.f32 %v1744_v20, %v1310_v21  ;;  %v1857_v23 = vpop.f32.mrb[25].mxu1 }
 0xa31   : > { %v1313_v24 = vpop.f32.mrb[26].mxu1 }
 0xa32   : > { %v1316_v25 = vmax.f32 %v1311_v22, 0.0  ;;  %v1858_v26 = vpop.f32.mrb[27].mxu1 }
 0xa34   : > { %v1317_v27 = vpack.c.bf16 %v1316_v25, %v1316_v25 }
 0xa36   : > { %1876 = vmatmul.mubr.bf16.vlgmr.msra.gmra.mrb[12].mxu0 %v1317_v27 }
 0xb09   : > { %v1423_v29 = vpop.f32.mrb[12].mxu0 }
 0xb0a   : > { %v1424_v30 = vadd.f32 %v1748_v28, %v1423_v29  ;;  %v1877_v31 = vpop.f32.mrb[13].mxu0 }
 0xb0b   : > { %v1426_v32 = vpop.f32.mrb[14].mxu0 }
 0xb0c   : > { %v1878_v33 = vpop.f32.mrb[15].mxu0  ;;  %v1429_v34 = vadd.f32 %v1424_v30, %v1248_v16 }
 0xb0e   : > { %v1432_v0 = vsel %vm1174_vm7, %v1429_v34, 0.0 }
 0xb0f   : > { %1433 = vadd.xlane.f32.xlu0 %v1432_v0 }
 0xb9c   : > { %v1434_v35 = vpop.xlane.xlu0 %1433 }
 0xb9d   : > { %v1435_v36 = vmul.f32 0.03125, %v1434_v35 }
 0xb9f   : > { %v1436_v37 = vsub.f32 %v1429_v34, %v1435_v36 }
 0xba1   : > { %v1437_v38 = vmul.f32 %v1436_v37, %v1436_v37 }
 0xba3   : > { %v1438_v39 = vsel %vm1174_vm7, %v1437_v38, 0.0 }
 0xba4   : > { %1439 = vadd.xlane.f32.xlu0 %v1438_v39 }
 0xc31   : > { %v1440_v40 = vpop.xlane.xlu0 %1439 }
 0xc32   : > { %v1441_v41 = vmul.f32 0.03125, %v1440_v40 }
 0xc34   : > { %v1442_v42 = vadd.f32 1e-05, %v1441_v41 }
 0xc36   : > { %2093 = vrsqrt.f32 %v1442_v42 }
 0xc40   : > { %v2094_v43 = vpop.eup %2093 }
 0xc41   : > { %v1444_v45 = vmul.f32 %v2094_v43, %v1436_v37 }
 0xc43   : > { %v1451_v47 = vmul.f32 %v1757_v44, %v1444_v45 }
 0xc45   : > { %v1458_v48 = vadd.f32 %v1758_v46, %v1451_v47 }
 0xc47   : > { %1459 = vst.msk [vmem:[%s677_s15] sm:$0xff] %vm1174_vm7, %v1458_v48 }
 0xc48   : > { %2478 = shalt.err (!%p2475_p7)
}
 0xc49   : > { %s2479_s9 = scalar_lea.hbm %s3221_s23, 128  ;;  %s2483_s24 = scalar_lea.hbm %s3365_s11, 256 }
 0xc4a   : > { %p2480_p2 = scmp.ne.s32.totalorder %s3221_s23, %s2479_s9  ;;  %p2484_p6 = scmp.lt.u32.totalorder %s3221_s23, %s3365_s11 }
 0xc4b   : > { %p2485_p11 = scmp.lt.u32.totalorder %s2483_s24, %s2479_s9  ;;  %p2487_p3 = scmp.lt.u32.totalorder %s2479_s9, %s3221_s23 }
 0xc4c   : > { %p2481_p8 = pnand %p2480_p2, %p3366_p10 }
 0xc4d   : > { %p2486_p0 = por %p2485_p11, %p2484_p6 }
 0xc4e   : > { %p2482_p1 = pneg %p2481_p8 }
 0xc4f   : > { %p2488_p9 = por %p2487_p3, %p2486_p0 }
 0xc51   : > { %p2489_p5 = pnand %p2488_p9, %p2482_p1 }
 0xc53   : > { %2492 = shalt.err (!%p2489_p5)
}
 0xc54   : > { %1925 = dma.vmem_to_hbm [thread:$0]  (%p3366_p10), %s3223_s0, 128, %s3221_s23, %s1461_s7  }
 0xc55 PF: > { %s1487_s2 = sand.u32 1, %s2551_s25   ;;  %p3367_p12 = scmp.ne.s32.totalorder %s3334_s17, 0 }
 0xc56   : > { %p3368_p13 = scmp.ge.s32.totalorder %s2571_s30, 2  ;;  %s1488_s15 = scalar_lea.sflag [#allocation5], %s1487_s2 }
 0xc58   : > { %p1969_p4 = pnand %p3368_p13, %p3367_p12 }
 0xc5a   : > { %2546 = dma.done.wait (!%p1969_p4), %s1488_s15, 128  }
 0xc5b   : > { %2548 = vsyncadd (!%p1969_p4), %s1488_s15, 4294967168  ;;  %s37_s30 = sadd.s32 1, %s2571_s30   ;;  %s3369_s5 = sld [smem:[#allocation33_spill]] }
 0xc5c   : > { %p34_p7 = scmp.ge.s32.totalorder %s37_s30, 4   ;;  %s3370_s27 = sld [smem:[#allocation37_spill]] }
 0xc5d   : > { %s3371_s21 = sld [smem:[#allocation36_spill]]  ;;  %s3372_s25 = smov %s2555_s26 }
 0xc5e   : > { %s3374_s28 = smov %s2567_s29  ;;  %36 = sbr.rel (!%p34_p7) target bundleno = 25 (0x19), region = 181 }
 0xc61   : > { %s3373_s26 = smov %s3369_s5 }
 0xc63   : > { %s3375_s29 = smov %s3371_s21 }
 0xc65   :  { %1493 = vsyncpa [#allocation4], 1 }
 0xc66   :  { %1495 = vsyncpa [#allocation4 + $0x1], 1 }
 0xc67   :  { %1496 = vsyncpa [#allocation7], 1 }
 0xc68   :  { %1498 = vsyncpa [#allocation7 + $0x1], 1 }
 0xc69   :  { %1499 = vsyncpa [#allocation10], 1 }
 0xc6a   :  { %1500 = vsyncpa [#allocation13], 1 }
 0xc6b   :  { %1501 = vsyncpa [#allocation16], 1 }
 0xc6c   :  { %1502 = vsyncpa [#allocation19], 1 }
 0xc6d   :  { %1503 = vsyncpa [#allocation22], 1 }
 0xc6e   :  { %1504 = vsyncpa [#allocation5], 1 }
 0xc6f   :  { %1506 = vsyncpa [#allocation5 + $0x1], 1 }

// kernel: tpu_custom_call.1
= control target key start
LH: loop header
LB: loop body
LE: loop exit
PB: predicated region body
PF: predicated region fallthrough
CT: control target
= control target key end

     0   :  { %s3271_s0 = inlined_call_operand.hbm [shape: f32[2,8,32], index: 0, kind: input, shape index: {}]   ;;  %s3272_s1 = inlined_call_operand.hbm [shape: bf16[2,32,8], index: 1, kind: input, shape index: {}]   ;;  %s3273_s2 = inlined_call_operand.hbm [shape: bf16[2,8,32], index: 2, kind: input, shape index: {}]   ;;  %s3274_s3 = inlined_call_operand.hbm [shape: bf16[32,32], index: 3, kind: input, shape index: {}]   ;;  %s3275_s4 = inlined_call_operand.hbm [shape: f32[1,32], index: 4, kind: input, shape index: {}]   ;;  %s3276_s5 = inlined_call_operand.hbm [shape: f32[1,32], index: 5, kind: input, shape index: {}]   ;;  %s3277_s6 = inlined_call_operand.hbm [shape: f32[1,32], index: 6, kind: input, shape index: {}]   ;;  %s3278_s7 = inlined_call_operand.hbm [shape: bf16[32,128], index: 7, kind: input, shape index: {}]   ;;  %s3279_s8 = inlined_call_operand.hbm [shape: f32[1,128], index: 8, kind: input, shape index: {}]   ;;  %s3280_s9 = inlined_call_operand.hbm [shape: bf16[128,32], index: 9, kind: input, shape index: {}]   ;;  %s3281_s10 = inlined_call_operand.hbm [shape: f32[1,32], index: 10, kind: input, shape index: {}]   ;;  %s3282_s11 = inlined_call_operand.hbm [shape: f32[1,32], index: 11, kind: input, shape index: {}]   ;;  %s3283_s12 = inlined_call_operand.hbm [shape: f32[1,32], index: 12, kind: input, shape index: {}]   ;;  %s3284_s13 = inlined_call_operand.hbm [shape: f32[2,8,32], index: 13, kind: output, shape index: {}]  }
   0x1   :  { %3307 = sst [smem:[#allocation38_spill]] %s3271_s0 }
   0x2   :  { %3308 = sst [smem:[#allocation39_spill]] %s3272_s1 }
   0x3   :  { %3309 = sst [smem:[#allocation40_spill]] %s3273_s2 }
   0x4   :  { %3310 = sst [smem:[#allocation41_spill]] %s3274_s3 }
   0x5   :  { %3311 = sst [smem:[#allocation42_spill]] %s3276_s5 }
   0x6   :  { %3312 = sst [smem:[#allocation43_spill]] %s3278_s7 }
   0x7   :  { %3313 = sst [smem:[#allocation44_spill]] %s3280_s9 }
   0x8   :  { %3314 = sst [smem:[#allocation45_spill]] %s3281_s10 }
   0x9   :  { %3315 = sst [smem:[#allocation46_spill]] %s3282_s11 }
   0xa   :  { %3316 = sst [smem:[#allocation47_spill]] %s3283_s12 }
   0xb   :  { %3317 = sst [smem:[#allocation48_spill]] %s3284_s13 }
   0xc   :  { %18 = vsyncpa [#allocation4], 0 }
   0xd   :  { %20 = vsyncpa [#allocation4 + $0x1], 0 }
   0xe   :  { %21 = vsyncpa [#allocation7], 0 }
   0xf   :  { %23 = vsyncpa [#allocation7 + $0x1], 0 }
  0x10   :  { %24 = vsyncpa [#allocation10], 0 }
  0x11   :  { %25 = vsyncpa [#allocation13], 0 }
  0x12   :  { %26 = vsyncpa [#allocation16], 0 }
  0x13   :  { %27 = vsyncpa [#allocation19], 0 }
  0x14   :  { %28 = vsyncpa [#allocation22], 0 }
  0x15   :  { %29 = vsyncpa [#allocation5], 0 }
  0x16   :  { %31 = vsyncpa [#allocation5 + $0x1], 0  ;;  %s2668_s25 = smov 0   ;;  %s2670_s26 = smov 0  }
  0x17   :  { %s2672_s27 = smov 0   ;;  %s2674_s28 = smov 0  }
  0x18   :  { %s2676_s29 = smov 0   ;;  %s2678_s30 = smov 0  }
  0x19 LB: > { %3318 = sst [smem:[#allocation33_spill]] %s2559_s27  ;;  %s2699_s14 = sadd.s32 4294967295, %s2571_s30   ;;  %s2571_s30 = sphi %s2678_s30, %s37_s30   ;;  %s2567_s29 = sphi %s2676_s29, %s3375_s29   ;;  %s2563_s28 = sphi %s2674_s28, %s3374_s28   ;;  %s2559_s27 = sphi %s2672_s27, %s3370_s27   ;;  %s2555_s26 = sphi %s2670_s26, %s3373_s26   ;;  %s2551_s25 = sphi %s2668_s25, %s3372_s25  }
  0x1a   : > { %3319 = sst [smem:[#allocation34_spill]] %s2563_s28  ;;  %p1695_p0 = scmp.ge.s32.totalorder %s2571_s30, 1 }
  0x1b   : > { %p3291_p1 = scmp.eq.s32.totalorder %s2699_s14, 0  ;;  %p372_p2 = scmp.lt.s32.totalorder %s2571_s30, 3 }
  0x1c   : > { %s2573_s16 = smov [#allocation9]   ;;  %s2574_s19 = smov [#allocation12]  }
  0x1d   : > { %p2704_p3 = pnand %p1695_p0, %p372_p2  ;;  %s384_s17 = sshll.u32 %s2573_s16, 4  ;;  %s2708_s17 = int_to_ptr.vmem [resolvable:$true] %s384_s17 }
  0x1e   : > { %s409_s20 = sshll.u32 %s2574_s19, 4  ;;  %s2575_s21 = smov [#allocation15]   ;;  %s2719_s20 = int_to_ptr.vmem [resolvable:$true] %s409_s20 }
  0x1f   : > { %s3320_s15 = scalar_select %p2704_p3, 1, 0 }
  0x20   : > { %p1927_p4 = pneg %p2704_p3  ;;  %s2721_s22 = sshll.u32 %s2575_s21, 4  ;;  %s431_s22 = int_to_ptr.vmem [resolvable:$true] %s2721_s22 }
  0x21   : > { %3321 = sst [smem:[#allocation35_spill]] %s3320_s15  ;;  %s3323_s3 = sld [smem:[#allocation41_spill]] }
  0x22   : > { %p2715_p6 = pnand %p1927_p4, %p3291_p1 }
  0x24   : > { %s3322_s18 = scalar_select %p2715_p6, 1, 0 }
  0x25   : > { %p2731_p8 = pneg %p2715_p6 }
  0x27   : > { %s2095_s16 = scalar_lea.hbm %s3323_s3, 256 }
  0x28   : > { %p2096_p7 = scmp.ne.s32.totalorder %s3323_s3, %s2095_s16  ;;  %p2102_p11 = scmp.lt.u32.totalorder %s2095_s16, %s3323_s3 }
  0x29   : > { %s3324_s15 = scalar_select %p2731_p8, 1, 0 }
  0x2a   : > { %p2098_p9 = pnand %p2731_p8, %p2096_p7 }
  0x2c   : > { %p2099_p10 = pneg %p2098_p9 }
  0x2e   : > { %p2104_p12 = pnand %p2102_p11, %p2099_p10 }
  0x30   : > { %2107 = shalt.err (!%p2104_p12)
}
  0x31   : > { %s2108_s13 = scalar_lea.vmem %s2708_s17, 256  ;;  %p2116_p4 = scmp.lt.s32.totalorder %s2708_s17, %s2708_s17 }
  0x32   : > { %p2109_p13 = scmp.ne.s32.totalorder %s2708_s17, %s2108_s13  ;;  %p2117_p5 = scmp.lt.s32.totalorder %s2108_s13, %s2108_s13 }
  0x34   : > { %p2111_p0 = pnand %p2109_p13, %p2731_p8  ;;  %p2118_p7 = por %p2117_p5, %p2116_p4 }
  0x36   : > { %p2112_p2 = pneg %p2111_p0 }
  0x38   : > { %p2119_p9 = pnand %p2118_p7, %p2112_p2 }
  0x3a   : > { %2122 = shalt.err (!%p2119_p9)
}
  0x3b   : > { %s3293_s28 = smov 64   ;;  %s3294_s23 = smov 4  }
  0x3c   : > { %1930 = dma.hbm_to_vmem [thread:$0]  (!%p2715_p6), %s3323_s3, 256, %s2708_s17, [#allocation10], %s3293_s28, %s3293_s28, %s3294_s23  }
  0x3d   : > { %s3325_s5 = sld [smem:[#allocation42_spill]] }
  0x43   : > { %s2123_s13 = scalar_lea.hbm %s3325_s5, 16 }
  0x44   : > { %p2124_p5 = scmp.ne.s32.totalorder %s3325_s5, %s2123_s13  ;;  %p2130_p12 = scmp.lt.u32.totalorder %s2123_s13, %s3325_s5 }
  0x46   : > { %p2126_p10 = pnand %p2124_p5, %p2731_p8 }
  0x48   : > { %p2127_p11 = pneg %p2126_p10 }
  0x4a   : > { %p2132_p13 = pnand %p2130_p12, %p2127_p11 }
  0x4c   : > { %2135 = shalt.err (!%p2132_p13)
}
  0x4d   : > { %s2136_s17 = scalar_lea.vmem %s2719_s20, 16  ;;  %s2143_s0 = scalar_lea.vmem %s2719_s20, 32 }
  0x4e   : > { %p2137_p0 = scmp.ne.s32.totalorder %s2719_s20, %s2136_s17  ;;  %p2144_p7 = scmp.lt.s32.totalorder %s2719_s20, %s2719_s20 }
  0x4f   : > { %p2145_p9 = scmp.lt.s32.totalorder %s2143_s0, %s2136_s17 }
  0x50   : > { %p2139_p2 = pnand %p2137_p0, %p2731_p8 }
  0x51   : > { %p2146_p5 = por %p2145_p9, %p2144_p7 }
  0x52   : > { %p2140_p4 = pneg %p2139_p2 }
  0x54   : > { %p2147_p10 = pnand %p2146_p5, %p2140_p4 }
  0x56   : > { %2150 = shalt.err (!%p2147_p10)
}
  0x57   : > { %1936 = dma.hbm_to_vmem [thread:$0]  (!%p2715_p6), %s3325_s5, 16, %s2719_s20, [#allocation13]  }
  0x58   : > { %s3326_s7 = sld [smem:[#allocation43_spill]] }
  0x5e   : > { %s2151_s16 = scalar_lea.hbm %s3326_s7, 256 }
  0x5f   : > { %p2152_p11 = scmp.ne.s32.totalorder %s3326_s7, %s2151_s16  ;;  %p2158_p0 = scmp.lt.u32.totalorder %s2151_s16, %s3326_s7 }
  0x61   : > { %p2154_p12 = pnand %p2152_p11, %p2731_p8 }
  0x63   : > { %p2155_p13 = pneg %p2154_p12 }
  0x65   : > { %p2160_p2 = pnand %p2158_p0, %p2155_p13 }
  0x67   : > { %2163 = shalt.err (!%p2160_p2)
}
  0x68   : > { %s2164_s0 = scalar_lea.vmem %s431_s22, 256  ;;  %p2172_p5 = scmp.lt.s32.totalorder %s431_s22, %s431_s22 }
  0x69   : > { %p2165_p4 = scmp.ne.s32.totalorder %s431_s22, %s2164_s0  ;;  %p2173_p10 = scmp.lt.s32.totalorder %s2164_s0, %s2164_s0 }
  0x6b   : > { %p2167_p7 = pnand %p2165_p4, %p2731_p8  ;;  %p2174_p1 = por %p2173_p10, %p2172_p5 }
  0x6d   : > { %p2168_p9 = pneg %p2167_p7 }
  0x6f   : > { %p2175_p3 = pnand %p2174_p1, %p2168_p9 }
  0x71   : > { %2178 = shalt.err (!%p2175_p3)
}
  0x72   : > { %1942 = dma.hbm_to_vmem [thread:$0]  (!%p2715_p6), %s3326_s7, 256, %s431_s22, [#allocation16], %s3293_s28, %s3293_s28, %s3294_s23  }
  0x73   : > { %s2578_s10 = smov [#allocation18]   ;;  %s2579_s24 = smov [#allocation21]  }
  0x74   : > { %s454_s12 = sshll.u32 %s2578_s10, 4  ;;  %s479_s16 = sshll.u32 %s2579_s24, 4  ;;  %s455_s12 = int_to_ptr.vmem [resolvable:$true] %s454_s12  ;;  %s480_s16 = int_to_ptr.vmem [resolvable:$true] %s479_s16 }
  0x75   : > { %s3327_s9 = sld [smem:[#allocation44_spill]] }
  0x7b   : > { %s2179_s13 = scalar_lea.hbm %s3327_s9, 1024 }
  0x7c   : > { %p2180_p1 = scmp.ne.s32.totalorder %s3327_s9, %s2179_s13  ;;  %p2186_p12 = scmp.lt.u32.totalorder %s2179_s13, %s3327_s9 }
  0x7e   : > { %p2182_p3 = pnand %p2180_p1, %p2731_p8 }
  0x80   : > { %p2183_p11 = pneg %p2182_p3 }
  0x82   : > { %p2188_p13 = pnand %p2186_p12, %p2183_p11 }
  0x84   : > { %2191 = shalt.err (!%p2188_p13)
}
  0x85   : > { %s2192_s22 = scalar_lea.vmem %s455_s12, 1024  ;;  %p2200_p7 = scmp.lt.s32.totalorder %s455_s12, %s455_s12 }
  0x86   : > { %p2193_p0 = scmp.ne.s32.totalorder %s455_s12, %s2192_s22  ;;  %p2201_p9 = scmp.lt.s32.totalorder %s2192_s22, %s2192_s22 }
  0x88   : > { %p2195_p2 = pnand %p2193_p0, %p2731_p8  ;;  %p2202_p5 = por %p2201_p9, %p2200_p7 }
  0x8a   : > { %p2196_p4 = pneg %p2195_p2 }
  0x8c   : > { %p2203_p10 = pnand %p2202_p5, %p2196_p4 }
  0x8e   : > { %2206 = shalt.err (!%p2203_p10)
}
  0x8f   : > { %1948 = dma.hbm_to_vmem [thread:$0]  (!%p2715_p6), %s3327_s9, 1024, %s455_s12, [#allocation19], %s3293_s28, %s3293_s28, %s3294_s23  }
  0x90   : > { %s3328_s11 = sld [smem:[#allocation46_spill]] }
  0x96   : > { %s2207_s19 = scalar_lea.hbm %s3328_s11, 16 }
  0x97   : > { %p2208_p1 = scmp.ne.s32.totalorder %s3328_s11, %s2207_s19  ;;  %p2214_p12 = scmp.lt.u32.totalorder %s2207_s19, %s3328_s11 }
  0x99   : > { %p2210_p3 = pnand %p2208_p1, %p2731_p8 }
  0x9b   : > { %p2211_p11 = pneg %p2210_p3 }
  0x9d   : > { %p2216_p13 = pnand %p2214_p12, %p2211_p11 }
  0x9f   : > { %2219 = shalt.err (!%p2216_p13)
}
  0xa0   : > { %s2220_s20 = scalar_lea.vmem %s480_s16, 16  ;;  %s2227_s12 = scalar_lea.vmem %s480_s16, 32 }
  0xa1   : > { %p2221_p0 = scmp.ne.s32.totalorder %s480_s16, %s2220_s20  ;;  %p2228_p7 = scmp.lt.s32.totalorder %s480_s16, %s480_s16 }
  0xa2   : > { %p2229_p9 = scmp.lt.s32.totalorder %s2227_s12, %s2220_s20 }
  0xa3   : > { %p2223_p2 = pnand %p2221_p0, %p2731_p8 }
  0xa4   : > { %p2230_p5 = por %p2229_p9, %p2228_p7 }
  0xa5   : > { %p2224_p4 = pneg %p2223_p2 }
  0xa7   : > { %p2231_p10 = pnand %p2230_p5, %p2224_p4 }
  0xa9   : > { %2234 = shalt.err (!%p2231_p10)
}
  0xaa   : > { %1954 = dma.hbm_to_vmem [thread:$0]  (!%p2715_p6), %s3328_s11, 16, %s480_s16, [#allocation22]  }
  0xab   : > { %s1694_s2 = sadd.s32 4294967294, %s2571_s30   ;;  %s49_s10 = sadd.s32 1, %s2567_s29 }
  0xac   : > { %s58_s24 = sadd.s32 1, %s2559_s27  ;;  %p51_p1 = scmp.ge.s32.totalorder %s49_s10, 2 }
  0xad   : > { %p65_p3 = scmp.ne.s32.totalorder %s2559_s27, %s2555_s26  ;;  %p66_p11 = scmp.eq.s32.totalorder %s2571_s30, 0 }
  0xae   : > { %p71_p12 = scmp.ne.s32.totalorder %s2555_s26, %s2551_s25  ;;  %s3377_s10 = smov (%p51_p1, %s49_s10), 0 }
  0xaf   : > { %3329 = sst [smem:[#allocation36_spill]] %s3377_s10  ;;  %p67_p13 = por %p66_p11, %p65_p3 }
  0xb0   : > { %p3330_p0 = scmp.eq.s32.totalorder %s2699_s14, 0  ;;  %s53_s16 = ssub.s32 %s2567_s29, %s3377_s10 }
  0xb1   : > { %p359_p4 = scmp.eq.s32.totalorder %s2699_s14, 1  ;;  %p56_p7 = scmp.eq.s32.totalorder %s53_s16, 0 }
  0xb2   : > { %p2852_p2 = por %p3330_p0, %p71_p12  ;;  %p365_p9 = scmp.eq.s32.totalorder %s1694_s2, 1 }
  0xb3   : > { %p2859_p5 = por %p359_p4, %p65_p3  ;;  %p1982_p10 = scmp.lt.s32.totalorder %s2571_s30, 2 }
  0xb4   : > { %s3331_s19 = scalar_select %p2852_p2, 1, 0 }
  0xb5   : > { %s3332_s21 = scalar_select %p2859_p5, 1, 0 }
  0xb6   : > { %s2865_s13 = scalar_select %p56_p7, %s2559_s27, %s58_s24  }
  0xb7   : > { %p2867_p1 = por %p365_p9, %p71_p12  ;;  %s2872_s0 = sand.u32 1, %s2559_s27  }
  0xb8   : > { %3333 = sst [smem:[#allocation37_spill]] %s2865_s13  ;;  %p2874_p11 = pnand %p1982_p10, %p67_p13 }
  0xb9   : > { %s3334_s17 = scalar_select %p2867_p1, 1, 0 }
  0xba   : > { %s3335_s20 = scalar_select %p2874_p11, 1, 0 }
  0xbb   : > { %s520_s12 = sand.u32 1, %s2571_s30   ;;  %s1709_s22 = sshll.u32 %s2872_s0, 4 }
  0xbc   : > { %s1763_s3 = sshll.u32 %s2567_s29, 8  ;;  %s524_s2 = scalar_lea.vmem [#allocation6], %s1709_s22 }
  0xbd   : > { %s531_s16 = sshll.u32 %s524_s2, 4  ;;  %s3336_s1 = sld [smem:[#allocation39_spill]]  ;;  %s2886_s16 = int_to_ptr.vmem [resolvable:$true] %s531_s16 }
  0xbe   : > { %s2888_s5 = scalar_lea.sflag [#allocation7], %s520_s12  ;;  %p2894_p12 = pneg %p2874_p11 }
  0xc0   : > { %s3337_s9 = scalar_select %p2894_p12, 1, 0 }
  0xc3   : > { %s2884_s23 = scalar_lea.hbm %s3336_s1, %s1763_s3  ;;  %s2240_s3 = scalar_lea.hbm %s3336_s1, 512 }
  0xc4   : > { %s2235_s7 = scalar_lea.hbm %s2884_s23, 256  ;;  %p2241_p4 = scmp.lt.u32.totalorder %s2884_s23, %s3336_s1 }
  0xc5   : > { %p2236_p3 = scmp.ne.s32.totalorder %s2884_s23, %s2235_s7  ;;  %p2242_p7 = scmp.lt.u32.totalorder %s2240_s3, %s2235_s7 }
  0xc6   : > { %p2244_p10 = scmp.lt.u32.totalorder %s2235_s7, %s2884_s23 }
  0xc7   : > { %p2238_p13 = pnand %p2894_p12, %p2236_p3  ;;  %p2243_p9 = por %p2242_p7, %p2241_p4 }
  0xc9   : > { %p2239_p0 = pneg %p2238_p13  ;;  %p2245_p1 = por %p2244_p10, %p2243_p9 }
  0xcb   : > { %p2246_p5 = pnand %p2245_p1, %p2239_p0 }
  0xcd   : > { %2249 = shalt.err (!%p2246_p5)
}
  0xce   : > { %s2250_s12 = scalar_lea.vmem %s2886_s16, 256  ;;  %s2580_s28 = smov [#allocation6]  }
  0xcf   : > { %p2251_p3 = scmp.ne.s32.totalorder %s2886_s16, %s2250_s12  ;;  %s2255_s22 = sshll.u32 %s2580_s28, 4  ;;  %s2256_s22 = int_to_ptr.vmem [resolvable:$false] %s2255_s22 }
  0xd0   : > { %s2257_s2 = scalar_lea.vmem %s2256_s22, 512  ;;  %p2258_p6 = scmp.lt.s32.totalorder %s2886_s16, %s2256_s22 }
  0xd1   : > { %p2253_p13 = pnand %p2251_p3, %p2894_p12  ;;  %p2259_p8 = scmp.lt.s32.totalorder %s2257_s2, %s2250_s12 }
  0xd3   : > { %p2254_p2 = pneg %p2253_p13  ;;  %p2260_p4 = por %p2259_p8, %p2258_p6 }
  0xd5   : > { %p2261_p7 = pnand %p2260_p4, %p2254_p2 }
  0xd7   : > { %2264 = shalt.err (!%p2261_p7)
}
  0xd8   : > { %s3338_s7 = smov 4   ;;  %s3339_s3 = smov 64  }
  0xd9   : > { %1964 = dma.hbm_to_vmem [thread:$0]  (!%p2874_p11), %s2884_s23, 256, %s2886_s16, %s2888_s5, %s3339_s3, %s3339_s3, %s3338_s7  }
  0xda   : > { %s2581_s24 = smov [#allocation11]   ;;  %s2582_s28 = smov [#allocation14]  }
  0xdb   : > { %s398_s1 = sshll.u32 %s2581_s24, 4  ;;  %s420_s11 = sshll.u32 %s2582_s28, 4  ;;  %s399_s1 = int_to_ptr.vmem [resolvable:$true] %s398_s1  ;;  %s2921_s11 = int_to_ptr.vmem [resolvable:$true] %s420_s11 }
  0xdc   : > { %s2265_s2 = scalar_lea.hbm %s3275_s4, 16  ;;  %p3340_p8 = scmp.ne.s32.totalorder %s3324_s15, 0 }
  0xdd   : > { %p2266_p6 = scmp.ne.s32.totalorder %s3275_s4, %s2265_s2  ;;  %p2272_p1 = scmp.lt.u32.totalorder %s2265_s2, %s3275_s4 }
  0xdf   : > { %p2268_p2 = pnand %p2266_p6, %p3340_p8 }
  0xe1   : > { %p2269_p5 = pneg %p2268_p2 }
  0xe3   : > { %p2274_p0 = pnand %p2272_p1, %p2269_p5 }
  0xe5   : > { %2277 = shalt.err (!%p2274_p0)
}
  0xe6   : > { %s2278_s16 = scalar_lea.vmem %s399_s1, 16  ;;  %s2285_s7 = scalar_lea.vmem %s399_s1, 32 }
  0xe7   : > { %p2279_p9 = scmp.ne.s32.totalorder %s399_s1, %s2278_s16  ;;  %p2286_p13 = scmp.lt.s32.totalorder %s399_s1, %s399_s1 }
  0xe8   : > { %p2287_p4 = scmp.lt.s32.totalorder %s2285_s7, %s2278_s16 }
  0xe9   : > { %p2281_p10 = pnand %p2279_p9, %p3340_p8 }
  0xea   : > { %p2288_p7 = por %p2287_p4, %p2286_p13 }
  0xeb   : > { %p2282_p3 = pneg %p2281_p10 }
  0xed   : > { %p2289_p11 = pnand %p2288_p7, %p2282_p3 }
  0xef   : > { %2292 = shalt.err (!%p2289_p11)
}
  0xf0   : > { %p3341_p6 = scmp.ne.s32.totalorder %s3322_s18, 0  ;;  %s2293_s24 = scalar_lea.hbm %s3277_s6, 16 }
  0xf1   : > { %p2294_p2 = scmp.ne.s32.totalorder %s3277_s6, %s2293_s24  ;;  %p2300_p11 = scmp.lt.u32.totalorder %s2293_s24, %s3277_s6 }
  0xf2   : > { %1933 = dma.hbm_to_vmem [thread:$0]  (!%p3341_p6), %s3275_s4, 16, %s399_s1, [#allocation10]  }
  0xf3   : > { %p2296_p5 = pnand %p2294_p2, %p3340_p8 }
  0xf5   : > { %p2297_p1 = pneg %p2296_p5 }
  0xf7   : > { %p2302_p0 = pnand %p2300_p11, %p2297_p1 }
  0xf9   : > { %2305 = shalt.err (!%p2302_p0)
}
  0xfa   : > { %s2306_s1 = scalar_lea.vmem %s2921_s11, 16  ;;  %s2313_s23 = scalar_lea.vmem %s2921_s11, 32 }
  0xfb   : > { %p2307_p9 = scmp.ne.s32.totalorder %s2921_s11, %s2306_s1  ;;  %p2314_p13 = scmp.lt.s32.totalorder %s2921_s11, %s2921_s11 }
  0xfc   : > { %p2315_p4 = scmp.lt.s32.totalorder %s2313_s23, %s2306_s1 }
  0xfd   : > { %p2309_p10 = pnand %p2307_p9, %p3340_p8 }
  0xfe   : > { %p2316_p7 = por %p2315_p4, %p2314_p13 }
  0xff   : > { %p2310_p3 = pneg %p2309_p10 }
 0x101   : > { %p2317_p2 = pnand %p2316_p7, %p2310_p3 }
 0x103   : > { %2320 = shalt.err (!%p2317_p2)
}
 0x104   : > { %1939 = dma.hbm_to_vmem [thread:$0]  (!%p3341_p6), %s3277_s6, 16, %s2921_s11, [#allocation13]  }
 0x105   : > { %s2583_s10 = smov [#allocation17]   ;;  %s2584_s27 = smov [#allocation20]  }
 0x106   : > { %s444_s13 = sshll.u32 %s2583_s10, 4  ;;  %s468_s3 = sshll.u32 %s2584_s27, 4  ;;  %s445_s13 = int_to_ptr.vmem [resolvable:$true] %s444_s13  ;;  %s2965_s3 = int_to_ptr.vmem [resolvable:$true] %s468_s3 }
 0x107   : > { %s2321_s12 = scalar_lea.hbm %s3279_s8, 16 }
 0x108   : > { %p2322_p5 = scmp.ne.s32.totalorder %s3279_s8, %s2321_s12  ;;  %p2328_p0 = scmp.lt.u32.totalorder %s2321_s12, %s3279_s8 }
 0x10a   : > { %p2324_p1 = pnand %p2322_p5, %p3340_p8 }
 0x10c   : > { %p2325_p11 = pneg %p2324_p1 }
 0x10e   : > { %p2330_p9 = pnand %p2328_p0, %p2325_p11 }
 0x110   : > { %2333 = shalt.err (!%p2330_p9)
}
 0x111   : > { %s2334_s23 = scalar_lea.vmem %s445_s13, 16  ;;  %s2341_s16 = scalar_lea.vmem %s445_s13, 32 }
 0x112   : > { %p2335_p10 = scmp.ne.s32.totalorder %s445_s13, %s2334_s23  ;;  %p2342_p4 = scmp.lt.s32.totalorder %s445_s13, %s445_s13 }
 0x113   : > { %p2343_p7 = scmp.lt.s32.totalorder %s2341_s16, %s2334_s23 }
 0x114   : > { %p2337_p3 = pnand %p2335_p10, %p3340_p8 }
 0x115   : > { %p2344_p2 = por %p2343_p7, %p2342_p4 }
 0x116   : > { %p2338_p13 = pneg %p2337_p3 }
 0x118   : > { %p2345_p12 = pnand %p2344_p2, %p2338_p13 }
 0x11a   : > { %2348 = shalt.err (!%p2345_p12)
}
 0x11b   : > { %1945 = dma.hbm_to_vmem [thread:$0]  (!%p3341_p6), %s3279_s8, 16, %s445_s13, [#allocation16]  }
 0x11c   : > { %s3342_s28 = sld [smem:[#allocation45_spill]] }
 0x122   : > { %s3343_s12 = smov %s3342_s28  ;;  %s2349_s22 = scalar_lea.hbm %s3342_s28, 16 }
 0x123   : > { %p2350_p5 = scmp.ne.s32.totalorder %s3343_s12, %s2349_s22  ;;  %p2356_p12 = scmp.lt.u32.totalorder %s2349_s22, %s3343_s12 }
 0x125   : > { %p2352_p1 = pnand %p2350_p5, %p3340_p8 }
 0x127   : > { %p2353_p11 = pneg %p2352_p1 }
 0x129   : > { %p2358_p0 = pnand %p2356_p12, %p2353_p11 }
 0x12b   : > { %2361 = shalt.err (!%p2358_p0)
}
 0x12c   : > { %s2362_s13 = scalar_lea.vmem %s2965_s3, 16  ;;  %s2369_s16 = scalar_lea.vmem %s2965_s3, 32 }
 0x12d   : > { %p2363_p9 = scmp.ne.s32.totalorder %s2965_s3, %s2362_s13  ;;  %p2370_p13 = scmp.lt.s32.totalorder %s2965_s3, %s2965_s3 }
 0x12e   : > { %p2371_p4 = scmp.lt.s32.totalorder %s2369_s16, %s2362_s13 }
 0x12f   : > { %p2365_p10 = pnand %p2363_p9, %p3340_p8 }
 0x130   : > { %p2372_p7 = por %p2371_p4, %p2370_p13 }
 0x131   : > { %p2366_p3 = pneg %p2365_p10 }
 0x133   : > { %p2373_p2 = pnand %p2372_p7, %p2366_p3 }
 0x135   : > { %2376 = shalt.err (!%p2373_p2)
}
 0x136   : > { %1951 = dma.hbm_to_vmem [thread:$0]  (!%p3341_p6), %s3343_s12, 16, %s2965_s3, [#allocation19]  }
 0x137   : > { %s2585_s27 = smov [#allocation23]   ;;  %s1707_s28 = sshll.u32 %s2872_s0, 3 }
 0x138   : > { %s490_s24 = sshll.u32 %s2585_s27, 4  ;;  %s3344_s1 = sld [smem:[#allocation47_spill]]  ;;  %s491_s24 = int_to_ptr.vmem [resolvable:$true] %s490_s24 }
 0x13e   : > { %s2377_s11 = scalar_lea.hbm %s3344_s1, 16 }
 0x13f   : > { %p2378_p5 = scmp.ne.s32.totalorder %s3344_s1, %s2377_s11  ;;  %p2384_p12 = scmp.lt.u32.totalorder %s2377_s11, %s3344_s1 }
 0x141   : > { %p2380_p1 = pnand %p2378_p5, %p3340_p8 }
 0x143   : > { %p2381_p11 = pneg %p2380_p1 }
 0x145   : > { %p2386_p0 = pnand %p2384_p12, %p2381_p11 }
 0x147   : > { %2389 = shalt.err (!%p2386_p0)
}
 0x148   : > { %s2390_s3 = scalar_lea.vmem %s491_s24, 16  ;;  %s2397_s10 = scalar_lea.vmem %s491_s24, 32 }
 0x149   : > { %p2391_p9 = scmp.ne.s32.totalorder %s491_s24, %s2390_s3  ;;  %p2398_p13 = scmp.lt.s32.totalorder %s491_s24, %s491_s24 }
 0x14a   : > { %p2399_p4 = scmp.lt.s32.totalorder %s2397_s10, %s2390_s3 }
 0x14b   : > { %p2393_p10 = pnand %p2391_p9, %p3340_p8 }
 0x14c   : > { %p2400_p7 = por %p2399_p4, %p2398_p13 }
 0x14d   : > { %p2394_p3 = pneg %p2393_p10 }
 0x14f   : > { %p2401_p2 = pnand %p2400_p7, %p2394_p3 }
 0x151   : > { %2404 = shalt.err (!%p2401_p2)
}
 0x152   : > { %1957 = dma.hbm_to_vmem [thread:$0]  (!%p3341_p6), %s3344_s1, 16, %s491_s24, [#allocation22]  }
 0x153   : > { %s1708_s2 = sshll.u32 %s2567_s29, 7  ;;  %s505_s11 = scalar_lea.vmem [#allocation3], %s1707_s28 }
 0x154   : > { %s513_s15 = sshll.u32 %s505_s11, 4  ;;  %s3345_s16 = sld [smem:[#allocation38_spill]]  ;;  %s514_s15 = int_to_ptr.vmem [resolvable:$true] %s513_s15 }
 0x155   : > { %s502_s18 = scalar_lea.sflag [#allocation4], %s2872_s0  ;;  %p3346_p5 = scmp.ne.s32.totalorder %s3337_s9, 0 }
 0x15a   : > { %s3032_s7 = scalar_lea.hbm %s3345_s16, %s1708_s2  ;;  %s2410_s28 = scalar_lea.hbm %s3345_s16, 256 }
 0x15b   : > { %s2405_s3 = scalar_lea.hbm %s3032_s7, 128  ;;  %p2411_p6 = scmp.lt.u32.totalorder %s3032_s7, %s3345_s16 }
 0x15c   : > { %p2406_p8 = scmp.ne.s32.totalorder %s3032_s7, %s2405_s3  ;;  %p2412_p12 = scmp.lt.u32.totalorder %s2410_s28, %s2405_s3 }
 0x15d   : > { %p2414_p9 = scmp.lt.u32.totalorder %s2405_s3, %s3032_s7 }
 0x15e   : > { %p2408_p1 = pnand %p2406_p8, %p3346_p5  ;;  %p2413_p0 = por %p2412_p12, %p2411_p6 }
 0x160   : > { %p2409_p11 = pneg %p2408_p1  ;;  %p2415_p10 = por %p2414_p9, %p2413_p0 }
 0x162   : > { %p2416_p3 = pnand %p2415_p10, %p2409_p11 }
 0x164   : > { %2419 = shalt.err (!%p2416_p3)
}
 0x165   : > { %s2420_s2 = scalar_lea.vmem %s514_s15, 128  ;;  %s2586_s11 = smov [#allocation3]  }
 0x166   : > { %p2421_p13 = scmp.ne.s32.totalorder %s514_s15, %s2420_s2  ;;  %s2425_s23 = sshll.u32 %s2586_s11, 4  ;;  %s2426_s23 = int_to_ptr.vmem [resolvable:$false] %s2425_s23 }
 0x167   : > { %s2427_s13 = scalar_lea.vmem %s2426_s23, 256  ;;  %p2428_p2 = scmp.lt.s32.totalorder %s514_s15, %s2426_s23 }
 0x168   : > { %p2423_p4 = pnand %p2421_p13, %p3346_p5  ;;  %p2429_p8 = scmp.lt.s32.totalorder %s2427_s13, %s2420_s2 }
 0x16a   : > { %p2424_p7 = pneg %p2423_p4  ;;  %p2430_p1 = por %p2429_p8, %p2428_p2 }
 0x16c   : > { %p2431_p6 = pnand %p2430_p1, %p2424_p7 }
 0x16e   : > { %2434 = shalt.err (!%p2431_p6)
}
 0x16f   : > { %p3347_p12 = scmp.ne.s32.totalorder %s3335_s20, 0  ;;  %s1712_s3 = sshll.u32 %s2872_s0, 2 }
 0x170   : > { %s1713_s24 = sshll.u32 %s2567_s29, 6  ;;  %s3348_s27 = sld [smem:[#allocation40_spill]] }
 0x171   : > { %1961 = dma.hbm_to_vmem [thread:$0]  (!%p3347_p12), %s3032_s7, 128, %s514_s15, %s502_s18  }
 0x172   : > { %s545_s2 = scalar_lea.vmem [#allocation8], %s1712_s3 }
 0x173   : > { %s552_s23 = sshll.u32 %s545_s2, 4  ;;  %s553_s23 = int_to_ptr.vmem [resolvable:$true] %s552_s23 }
 0x176   : > { %s3349_s22 = smov %s3348_s27  ;;  %s3057_s11 = scalar_lea.hbm %s3348_s27, %s1713_s24 }
 0x177   : > { %s2435_s13 = scalar_lea.hbm %s3057_s11, 64  ;;  %s2440_s7 = scalar_lea.hbm %s3349_s22, 128 }
 0x178   : > { %p2436_p11 = scmp.ne.s32.totalorder %s3057_s11, %s2435_s13  ;;  %p2441_p10 = scmp.lt.u32.totalorder %s3057_s11, %s3349_s22 }
 0x179   : > { %p2442_p3 = scmp.lt.u32.totalorder %s2440_s7, %s2435_s13  ;;  %p2444_p4 = scmp.lt.u32.totalorder %s2435_s13, %s3057_s11 }
 0x17a   : > { %p2438_p0 = pnand %p2436_p11, %p3346_p5 }
 0x17b   : > { %p2443_p13 = por %p2442_p3, %p2441_p10 }
 0x17c   : > { %p2439_p9 = pneg %p2438_p0 }
 0x17d   : > { %p2445_p7 = por %p2444_p4, %p2443_p13 }
 0x17f   : > { %p2446_p2 = pnand %p2445_p7, %p2439_p9 }
 0x181   : > { %2449 = shalt.err (!%p2446_p2)
}
 0x182   : > { %s2450_s3 = scalar_lea.vmem %s553_s23, 64  ;;  %s2587_s24 = smov [#allocation8]  }
 0x183   : > { %p2451_p8 = scmp.ne.s32.totalorder %s553_s23, %s2450_s3  ;;  %s2455_s28 = sshll.u32 %s2587_s24, 4  ;;  %s2456_s28 = int_to_ptr.vmem [resolvable:$false] %s2455_s28 }
 0x184   : > { %s2457_s27 = scalar_lea.vmem %s2456_s28, 128  ;;  %p2458_p11 = scmp.lt.s32.totalorder %s553_s23, %s2456_s28 }
 0x185   : > { %p2453_p1 = pnand %p2451_p8, %p3346_p5  ;;  %p2459_p0 = scmp.lt.s32.totalorder %s2457_s27, %s2450_s3 }
 0x187   : > { %p2454_p6 = pneg %p2453_p1  ;;  %p2460_p12 = por %p2459_p0, %p2458_p11 }
 0x189   : > { %p2461_p3 = pnand %p2460_p12, %p2454_p6 }
 0x18b   : > { %2464 = shalt.err (!%p2461_p3)
}
 0x18c   : > { %p3350_p10 = scmp.ne.s32.totalorder %s3335_s20, 0  ;;  %s3351_s2 = sld [smem:[#allocation35_spill]] }
 0x18e   : > { %1967 = dma.hbm_to_vmem [thread:$0]  (!%p3350_p10), %s3057_s11, 64, %s553_s23, %s2888_s5  }
 0x192   : > { %p3352_p9 = scmp.ne.s32.totalorder %s3351_s2, 0 }
 0x193   : > { %s3080_s9 = sand.u32 (!%p3352_p9), 1, %s2555_s26   ;;  %p3353_p5 = scmp.ne.s32.totalorder (!%p3352_p9), %s3331_s19, 0 }
 0x194   : > { %561 = sbr.rel (%p3352_p9) target bundleno = 3157 (0xc55), region = 72  ;;  %s1715_s13 = sshll.u32 (!%p3352_p9), %s3080_s9, 3 }
 0x195   : > { %s564_s15 = scalar_lea.sflag (!%p3352_p9), [#allocation4], %s3080_s9  ;;  %s567_s0 = scalar_lea.vmem (!%p3352_p9), [#allocation3], %s1715_s13 }
 0x19b   : > { %2518 = dma.done.wait (%p3353_p5), %s564_s15, 128  }
 0x19c   : > { %2520 = vsyncadd (%p3353_p5), %s564_s15, 4294967168  ;;  %s572_s5 = sand.u32 1, %s2699_s14   ;;  %s1716_s20 = sshll.u32 %s3080_s9, 4 }
 0x19d   : > { %s573_s11 = scalar_lea.sflag [#allocation7], %s572_s5  ;;  %s3092_s23 = scalar_lea.vmem [#allocation6], %s1716_s20 }
 0x19e   : > { %2522 = dma.done.wait (%p3353_p5), %s573_s11, 320  }
 0x19f   : > { %2524 = vsyncadd (%p3353_p5), %s573_s11, 4294966976  ;;  %s1717_s7 = sshll.u32 %s3080_s9, 2  ;;  %p3354_p12 = scmp.eq.s32.totalorder %s2699_s14, 0 }
 0x1a0   : > { %s3099_s18 = scalar_lea.vmem [#allocation8], %s1717_s7 }
 0x1a1   : > { %2526 = dma.done.wait (%p3354_p12), [#allocation10], 272   ;;  %p3355_p13 = pmov %p3354_p12 }
 0x1a2   : > { %p3356_p4 = pmov %p3354_p12 }
 0x1a3   : > { %2528 = vsyncadd (%p3355_p13), [#allocation10], 4294967024 }
 0x1a4   : > { %2530 = dma.done.wait (%p3356_p4), [#allocation13], 32   ;;  %p3357_p7 = pmov %p3356_p4 }
 0x1a5   : > { %p3358_p2 = pmov %p3356_p4 }
 0x1a6   : > { %2532 = vsyncadd (%p3357_p7), [#allocation13], 4294967264 }
 0x1a7   : > { %2534 = dma.done.wait (%p3358_p2), [#allocation16], 272   ;;  %p3359_p8 = pmov %p3358_p2 }
 0x1a8   : > { %p3360_p1 = pmov %p3358_p2 }
 0x1a9   : > { %2536 = vsyncadd (%p3359_p8), [#allocation16], 4294967024 }
 0x1aa   : > { %2538 = dma.done.wait (%p3360_p1), [#allocation19], 1040   ;;  %p3361_p6 = pmov %p3360_p1 }
 0x1ab   : > { %p3362_p11 = pmov %p3360_p1 }
 0x1ac   : > { %2540 = vsyncadd (%p3361_p6), [#allocation19], 4294966256 }
 0x1ad   : > { %2542 = dma.done.wait (%p3362_p11), [#allocation22], 32   ;;  %p3363_p0 = pmov %p3360_p1 }
 0x1ae   : > { %v2588_v0 = vmov 0.0   ;;  %vm2589_vm0 = vmmov 0   ;;  %vm700_vm1 = vcmask 1043456   ;;  %v682_v1 = vld [vmem:[%s3092_s23] sm:$0xf]  ;;  %v3128_v2 = vld [vmem:[%s567_s0] sm:$0xff]  ;;  %v688_v6 = vlaneseq }
 0x1af   : > { %2544 = vsyncadd (%p3363_p0), [#allocation22], 4294967264  ;;  %1795 = vmatprep.subr.bf16.mxu1 %v2588_v0  ;;  %1797 = vmatprep.mubr.msk.bf16.mxu1 %vm2589_vm0, %v2588_v0  ;;  %v702_v3 = vsel %vm700_vm1, %v682_v1, 0  ;;  %v680_v4 = vmul.f32 0.35355338, %v3128_v2  ;;  %vm696_vm2 = vcmask 64512  }
 0x1b0   : > { %1819 = vmatprep.subr.bf16.mxu0 %v2588_v0  ;;  %1821 = vmatprep.mubr.msk.bf16.mxu0 %vm2589_vm0, %v2588_v0  ;;  %s2590_s14 = smov 120   ;;  %s2591_s19 = smov 112   ;;  %v689_v7 = vshrl.u32 %v688_v6, 7  ;;  %v693_v8 = vand.u32 127, %v688_v6  ;;  %v2592_v9 = vmov -1e+20  }
 0x1b1   : > { %1796 = vmatpush3.bf16.msra.mxu1 %v702_v3  ;;  %v681_v5 = vpack.c.bf16 %v680_v4, %v680_v4  ;;  %v684_v18 = vld [vmem:[%s3092_s23 + $0x8] sm:$0xf]  ;;  %s2593_s10 = smov 104   ;;  %v686_v26 = vld [vmem:[%s3099_s18] sm:$0xf]  ;;  %s2594_s3 = smov 8  }
 0x1b2   : > { %1801 = vmatprep.subr.bf16.mxu1 %v2588_v0  ;;  %vm694_vm3 = vcmp.le.s32.totalorder %v693_v8, %v689_v7  ;;  %v927_v19 = vsel %vm700_vm1, %v684_v18, 0  ;;  %v760_v27 = vsel %vm700_vm1, %v686_v26, 0  ;;  %v685_v28 = vld [vmem:[%s3092_s23 + $0xc] sm:$0xf]  ;;  %v683_v39 = vld [vmem:[%s3092_s23 + $0x4] sm:$0xf]  ;;  %v1732_v1 = vcombine.low %v686_v26, %v686_v26 }
 0x1b3   : > { %804 = vrot.lane.b32.xlu1 %v681_v5, %s2590_s14  ;;  %v3138_v10 = vsel %vm694_vm3, 0.0, %v2592_v9  ;;  %1820 = vmatpush3.bf16.msra.mxu0 %v927_v19  ;;  %v1041_v29 = vsel %vm700_vm1, %v685_v28, 0  ;;  %v810_v42 = vsel %vm700_vm1, %v683_v39, 0  ;;  %s2595_s24 = smov 16   ;;  %s2596_s28 = smov 24   ;;  %vm919_vm4 = vcmask 130112  }
 0x1b4   : > { %1798 = vmatmul.mubr.msk.bf16.vlgmr.msra.gmra.mrb[0].mxu1 %vm696_vm2, %v681_v5  ;;  %1831 = vmatprep.subr.bf16.mxu0 %v2588_v0  ;;  %vm1033_vm5 = vcmask 195712   ;;  %vm1147_vm6 = vcmask 261312   ;;  %vm1174_vm7 = vcmask 261120   ;;  %s3364_s27 = sld [smem:[#allocation34_spill]]  ;;  %s677_s15 = scalar_lea.vmem [#allocation24], %s1715_s13 }
 0x1b5   : > { %1803 = vmatprep.mubr.msk.bf16.mxu1 %vm2589_vm0, %v2588_v0  ;;  %1802 = vmatpush3.bf16.msra.mxu1 %v760_v27  ;;  %s1475_s0 = sshll.u32 %s677_s15, 4  ;;  %s3365_s11 = sld [smem:[#allocation48_spill]]  ;;  %s3223_s0 = int_to_ptr.vmem [resolvable:$true] %s1475_s0 }
 0x1b6   : > { %1807 = vmatprep.subr.bf16.mxu1 %v2588_v0  ;;  %s1461_s7 = scalar_lea.sflag [#allocation5], %s3080_s9  ;;  %s2465_s18 = scalar_lea.vmem %s3223_s0, 128 }
 0x1b7   : > { %921 = vrot.lane.b32.xlu1 %v681_v5, %s2591_s19  ;;  %p2466_p3 = scmp.ne.s32.totalorder %s3223_s0, %s2465_s18  ;;  %p3366_p10 = scmp.ne.s32.totalorder %s3332_s21, 0 }
 0x1b8   : > { %s2597_s13 = smov [#allocation24]  }
 0x1b9   : > { %p2467_p9 = pnand %p2466_p3, %p3366_p10 }
 0x1ba   : > { %s1760_s2 = sshll.u32 %s3364_s27, 7 }
 0x1bb   : > { %s3221_s23 = scalar_lea.hbm %s3365_s11, %s1760_s2  ;;  %p2468_p5 = pneg %p2467_p9 }
 0x225   : > { %v805_v17 = vpop.permute.xlu1 %804 }
 0x229   : > { %v922_v20 = vpop.permute.xlu1 %921 }
 0x22a   : > { %1822 = vmatmul.mubr.msk.bf16.vlgmr.msra.gmra.mrb[0].mxu0 %vm696_vm2, %v922_v20 }
 0x22b   : > { %1833 = vmatprep.mubr.msk.bf16.mxu0 %vm2589_vm0, %v2588_v0  ;;  %1832 = vmatpush3.bf16.msra.mxu0 %v1041_v29 }
 0x22c   : > { %1843 = vmatprep.subr.bf16.mxu0 %v2588_v0 }
 0x287   : > { %v738_v11 = vpop.f32.mrb[0].mxu1 }
 0x288   : > { %v739_v12 = vadd.f32 %v738_v11, %v3138_v10  ;;  %v1799_v13 = vpop.f32.mrb[1].mxu1 }
 0x289   : > { %v741_v14 = vpop.f32.mrb[2].mxu1 }
 0x28a   : > { %v1800_v15 = vpop.f32.mrb[3].mxu1  ;;  %v744_v16 = vsel %vm696_vm2, %v739_v12, -inf }
 0x28b   : > { %745 = vmax.xlane.f32.xlu0 %v744_v16 }
 0x2fd   : > { %v963_v30 = vpop.f32.mrb[0].mxu0 }
 0x2fe   : > { %v964_v31 = vadd.f32 %v963_v30, %v3138_v10  ;;  %v1823_v32 = vpop.f32.mrb[1].mxu0 }
 0x2ff   : > { %v966_v33 = vpop.f32.mrb[2].mxu0 }
 0x300   : > { %v969_v34 = vsel %vm696_vm2, %v964_v31, -inf  ;;  %v1824_v35 = vpop.f32.mrb[3].mxu0 }
 0x301   : > { %v2063_v35 = vld [vmem:[#allocation9] sm:$0xff]  }
 0x318   : > { %v746_v21 = vpop.xlane.xlu0 %745 }
 0x319   : > { %v747_v22 = vsub.f32 %v739_v12, %v746_v21 }
 0x31b   : > { %v748_v23 = vmul.f32 1.442695, %v747_v22 }
 0x31d   : > { %2075 = vpow2.f32 %v748_v23 }
 0x327   : > { %v2076_v24 = vpop.eup %2075 }
 0x328   : > { %v750_v25 = vsel %vm696_vm2, %v2076_v24, 0.0 }
 0x329   : > { %751 = vadd.xlane.f32.xlu0 %v750_v25 }
 0x33f   : > { %1035 = vrot.lane.b32.xlu0 %v681_v5, %s2593_s10 }
 0x35e   : > { %970 = vmax.xlane.f32.xlu0 %v969_v34 }
 0x374   : > { %981 = vrot.lane.b32.xlu0 %v1732_v1, %s2591_s19 }
 0x3b6   : > { %v752_v36 = vpop.xlane.xlu0 %751 }
 0x3b7   : > { %2077 = vrcp.f32 %v752_v36  ;;  %v2064_v36 = vld [vmem:[#allocation9 + $0x8] sm:$0xff]  }
 0x3ba   : > { %v1036_v37 = vpop.permute.xlu0 %1035 }
 0x3bb   : > { %1834 = vmatmul.mubr.msk.bf16.vlgmr.msra.gmra.mrb[4].mxu0 %vm696_vm2, %v1036_v37 }
 0x3bc   : > { %1847 = vmatprep.mubr.msk.bf16.mxu0 %vm2589_vm0, %v2588_v0  ;;  %1844 = vmatpush3.bf16.msra.mxu0 %v2063_v35 }
 0x3bd   : > { %1845 = vmatprep.subr.bf16.mxu0 %v2588_v0 }
 0x3c0   : > { %1846 = vmatpush3.bf16.msra.mxu0 %v2064_v36 }
 0x3c1   : > { %v2078_v38 = vpop.eup %2077  ;;  %1859 = vmatprep.subr.bf16.mxu0 %v2588_v0 }
 0x3c2   : > { %v754_v40 = vmul.f32 %v2078_v38, %v2076_v24 }
 0x3c4   : > { %v755_v41 = vpack.c.bf16 %v754_v40, %v754_v40 }
 0x3c6   : > { %1804 = vmatmul.mubr.msk.bf16.vlgmr.msra.gmra.mrb[4].mxu1 %vm696_vm2, %v755_v41 }
 0x3c7   : > { %1808 = vmatpush3.bf16.msra.mxu1 %v810_v42  ;;  %1809 = vmatprep.mubr.msk.bf16.mxu1 %vm2589_vm0, %v2588_v0 }
 0x3c8   : > { %1813 = vmatprep.subr.bf16.mxu1 %v2588_v0 }
 0x3ce   : > { %1810 = vmatmul.mubr.msk.bf16.vlgmr.msra.gmra.mrb[8].mxu1 %vm696_vm2, %v805_v17 }
 0x3cf   : > { %1815 = vmatprep.mubr.msk.bf16.mxu1 %vm2589_vm0, %v2588_v0 }
 0x3eb   : > { %v971_v47 = vpop.xlane.xlu0 %970 }
 0x3ec   : > { %v972_v48 = vsub.f32 %v964_v31, %v971_v47 }
 0x3ee   : > { %v973_v50 = vmul.f32 1.442695, %v972_v48 }
 0x3ef   : > { %v982_v19 = vpop.permute.xlu0 %981 }
 0x3f0   : > { %2079 = vpow2.f32 %v973_v50  ;;  %v987_v21 = vsel %vm700_vm1, %v982_v19, 0  ;;  %v1738_v50 = vld [vmem:[#allocation11] ss:$0 sm:$0xff]  ;;  %v2074_v19 = vld [vmem:[#allocation18 + $0x38] sm:$0xff]  }
 0x3fa   : > { %v2080_v62 = vpop.eup %2079 }
 0x3fb   : > { %v975_v63 = vsel %vm696_vm2, %v2080_v62, 0.0 }
 0x48e   : > { %v1077_v43 = vpop.f32.mrb[4].mxu0 }
 0x48f   : > { %v1835_v44 = vpop.f32.mrb[5].mxu0  ;;  %v1078_v57 = vadd.f32 %v1077_v43, %v3138_v10 }
 0x490   : > { %v1080_v45 = vpop.f32.mrb[6].mxu0 }
 0x491   : > { %v1836_v46 = vpop.f32.mrb[7].mxu0  ;;  %v1083_v61 = vsel %vm696_vm2, %v1078_v57, -inf }
 0x499   : > { %v796_v49 = vpop.f32.mrb[4].mxu1 }
 0x49a   : > { %802 = vst.msk [vmem:[#allocation2] sm:$0xff] %vm696_vm2, %v796_v49  ;;  %v1805_v51 = vpop.f32.mrb[5].mxu1 }
 0x49b   : > { %v799_v52 = vpop.f32.mrb[6].mxu1 }
 0x49c   : > { %v1806_v53 = vpop.f32.mrb[7].mxu1 }
 0x4a1   : > { %v846_v54 = vpop.f32.mrb[8].mxu1 }
 0x4a2   : > { %v847_v55 = vadd.f32 %v846_v54, %v3138_v10  ;;  %v1811_v56 = vpop.f32.mrb[9].mxu1 }
 0x4a3   : > { %v849_v58 = vpop.f32.mrb[10].mxu1 }
 0x4a4   : > { %v1812_v59 = vpop.f32.mrb[11].mxu1  ;;  %v852_v60 = vsel %vm696_vm2, %v847_v55, -inf }
 0x4a5   : > { %853 = vmax.xlane.f32.xlu1 %v852_v60 }
 0x4a9   : > { %1084 = vmax.xlane.f32.xlu1 %v1083_v61 }
 0x4ad   : > { %976 = vadd.xlane.f32.xlu1 %v975_v63  ;;  %v2065_v63 = vld [vmem:[#allocation15] sm:$0xff]  }
 0x532   : > { %v854_v3 = vpop.xlane.xlu1 %853 }
 0x533   : > { %v855_v4 = vsub.f32 %v847_v55, %v854_v3  ;;  %v2067_v3 = vld [vmem:[#allocation18] sm:$0xff]  }
 0x535   : > { %v856_v7 = vmul.f32 1.442695, %v855_v4  ;;  %v2068_v4 = vld [vmem:[#allocation18 + $0x8] sm:$0xff]  }
 0x536   : > { %v1085_v5 = vpop.xlane.xlu1 %1084 }
 0x537   : > { %v1086_v6 = vsub.f32 %v1078_v57, %v1085_v5  ;;  %v2070_v5 = vld [vmem:[#allocation18 + $0x18] sm:$0xff]  }
 0x539   : > { %v1087_v8 = vmul.f32 1.442695, %v1086_v6  ;;  %v2071_v6 = vld [vmem:[#allocation18 + $0x20] sm:$0xff]  }
 0x53a   : > { %v977_v13 = vpop.xlane.xlu1 %976 }
 0x53b   : > { %2081 = vpow2.f32 %v1087_v8 }
 0x53c   : > { %2083 = vpow2.f32 %v856_v7  ;;  %v2072_v7 = vld [vmem:[#allocation18 + $0x28] sm:$0xff]  }
 0x545   : > { %v2082_v9 = vpop.eup %2081 }
 0x546   : > { %v1089_v10 = vsel %vm696_vm2, %v2082_v9, 0.0  ;;  %v2084_v11 = vpop.eup %2083 }
 0x547   : > { %1090 = vadd.xlane.f32.xlu1 %v1089_v10  ;;  %v858_v12 = vsel %vm696_vm2, %v2084_v11, 0.0 }
 0x54b   : > { %859 = vadd.xlane.f32.xlu1 %v858_v12  ;;  %v1742_v12 = vld [vmem:[#allocation12] ss:$0 sm:$0xff] }
 0x55c   : > { %867 = vrot.lane.b32.xlu1 %v1732_v1, %s2590_s14  ;;  %s2469_s14 = sshll.u32 %s2597_s13, 4  ;;  %s2470_s14 = int_to_ptr.vmem [resolvable:$false] %s2469_s14 }
 0x55d   : > { %s2471_s19 = scalar_lea.vmem %s2470_s14, 256  ;;  %p2472_p12 = scmp.lt.s32.totalorder %s3223_s0, %s2470_s14 }
 0x55e   : > { %p2473_p13 = scmp.lt.s32.totalorder %s2471_s19, %s2465_s18 }
 0x560   : > { %1095 = vrot.lane.b32.xlu1 %v1732_v1, %s2593_s10  ;;  %v2066_v1 = vld [vmem:[#allocation15 + $0x8] sm:$0xff]   ;;  %p2474_p4 = por %p2473_p13, %p2472_p12 }
 0x562   : > { %p2475_p7 = pnand %p2474_p4, %p2468_p5 }
 0x5d4   : > { %v1091_v14 = vpop.xlane.xlu1 %1090 }
 0x5d8   : > { %v860_v15 = vpop.xlane.xlu1 %859 }
 0x5d9   : > { %2085 = vrcp.f32 %v860_v15 }
 0x5da   : > { %2087 = vrcp.f32 %v977_v13 }
 0x5db   : > { %2089 = vrcp.f32 %v1091_v14  ;;  %v1743_v14 = vld [vmem:[#allocation14] ss:$0 sm:$0xff] }
 0x5dc   : > { %v868_v16 = vpop.permute.xlu1 %867 }
 0x5dd   : > { %v873_v17 = vsel %vm700_vm1, %v868_v16, 0 }
 0x5de   : > { %1814 = vmatpush3.bf16.msra.mxu1 %v873_v17 }
 0x5df   : > { %1825 = vmatprep.subr.bf16.mxu1 %v2588_v0 }
 0x5e0   : > { %v1096_v25 = vpop.permute.xlu1 %1095 }
 0x5e1   : > { %v1101_v26 = vsel %vm700_vm1, %v1096_v25, 0 }
 0x5e3   : > { %v2086_v18 = vpop.eup %2085 }
 0x5e4   : > { %v862_v20 = vmul.f32 %v2086_v18, %v2084_v11  ;;  %v2088_v23 = vpop.eup %2087  ;;  %v2073_v18 = vld [vmem:[#allocation18 + $0x30] sm:$0xff]  }
 0x5e5   : > { %v979_v24 = vmul.f32 %v2088_v23, %v2080_v62  ;;  %v2090_v28 = vpop.eup %2089 }
 0x5e6   : > { %v863_v22 = vpack.c.bf16 %v862_v20, %v862_v20  ;;  %v1093_v29 = vmul.f32 %v2090_v28, %v2082_v9  ;;  %v1744_v20 = vld [vmem:[#allocation17] ss:$0 sm:$0xff]  ;;  %v1748_v28 = vld [vmem:[#allocation20] ss:$0 sm:$0xff] }
 0x5e7   : > { %v980_v27 = vpack.c.bf16 %v979_v24, %v979_v24 }
 0x5e8   : > { %1816 = vmatmul.mubr.msk.bf16.vlgmr.msra.gmra.mrb[12].mxu1 %vm696_vm2, %v863_v22  ;;  %v1094_v30 = vpack.c.bf16 %v1093_v29, %v1093_v29 }
 0x5e9   : > { %1826 = vmatpush3.bf16.msra.mxu1 %v987_v21  ;;  %1827 = vmatprep.mubr.msk.bf16.mxu1 %vm2589_vm0, %v2588_v0 }
 0x5ea   : > { %1837 = vmatprep.subr.bf16.mxu1 %v2588_v0 }
 0x5f0   : > { %1828 = vmatmul.mubr.msk.bf16.vlgmr.msra.gmra.mrb[16].mxu1 %vm696_vm2, %v980_v27 }
 0x5f1   : > { %1838 = vmatpush3.bf16.msra.mxu1 %v1101_v26  ;;  %1839 = vmatprep.mubr.msk.bf16.mxu1 %vm2589_vm0, %v2588_v0 }
 0x5f2   : > { %1851 = vmatprep.subr.bf16.mxu1 %v2588_v0 }
 0x5f8   : > { %1840 = vmatmul.mubr.msk.bf16.vlgmr.msra.gmra.mrb[20].mxu1 %vm696_vm2, %v1094_v30 }
 0x5f9   : > { %1855 = vmatprep.mubr.msk.bf16.mxu1 %vm2589_vm0, %v2588_v0  ;;  %1852 = vmatpush3.bf16.msra.mxu1 %v2065_v63 }
 0x5fa   : > { %1853 = vmatprep.subr.bf16.mxu1 %v2588_v0 }
 0x5fd   : > { %1854 = vmatpush3.bf16.msra.mxu1 %v2066_v1 }
 0x6bb   : > { %v909_v31 = vpop.f32.mrb[12].mxu1 }
 0x6bc   : > { %916 = vrot.lane.b32.xlu1 %v909_v31, %s2594_s3  ;;  %v1817_v32 = vpop.f32.mrb[13].mxu1 }
 0x6bd   : > { %v912_v33 = vpop.f32.mrb[14].mxu1 }
 0x6be   : > { %v1818_v34 = vpop.f32.mrb[15].mxu1 }
 0x6c3   : > { %v1023_v37 = vpop.f32.mrb[16].mxu1 }
 0x6c4   : > { %1030 = vrot.lane.b32.xlu0 %v1023_v37, %s2595_s24  ;;  %v1829_v38 = vpop.f32.mrb[17].mxu1 }
 0x6c5   : > { %v1026_v39 = vpop.f32.mrb[18].mxu1 }
 0x6c6   : > { %v1830_v40 = vpop.f32.mrb[19].mxu1 }
 0x6cb   : > { %v1137_v41 = vpop.f32.mrb[20].mxu1 }
 0x6cc   : > { %1144 = vrot.lane.b32.xlu1 %v1137_v41, %s2596_s28  ;;  %v1841_v42 = vpop.f32.mrb[21].mxu1 }
 0x6cd   : > { %v1140_v43 = vpop.f32.mrb[22].mxu1 }
 0x6ce   : > { %v1842_v44 = vpop.f32.mrb[23].mxu1 }
 0x6cf   : > { %v1757_v44 = vld [vmem:[#allocation21] ss:$0 sm:$0xff] }
 0x72e   : > { %v917_v45 = vpop.permute.xlu1 %916 }
 0x72f   : > { %920 = vst.msk [vmem:[#allocation2] sm:$0xff] %vm919_vm4, %v917_v45 }
 0x736   : > { %v1031_v46 = vpop.permute.xlu0 %1030 }
 0x737   : > { %1034 = vst.msk [vmem:[#allocation2] sm:$0xff] %vm1033_vm5, %v1031_v46  ;;  %v1758_v46 = vld [vmem:[#allocation23] ss:$0 sm:$0xff] }
 0x73e   : > { %v1145_v47 = vpop.permute.xlu1 %1144 }
 0x73f   : > { %1148 = vst.msk [vmem:[#allocation2] sm:$0xff] %vm1147_vm6, %v1145_v47 }
 0x746   : > { %v1149_v48 = vld [vmem:[#allocation2] sm:$0xff] }
 0x747   : > { %v1150_v49 = vpack.c.bf16 %v1149_v48, %v1149_v48 }
 0x749   : > { %1848 = vmatmul.mubr.msk.bf16.vlgmr.msra.gmra.mrb[8].mxu0 %vm1174_vm7, %v1150_v49 }
 0x74a   : > { %1875 = vmatprep.mubr.msk.bf16.mxu0 %vm2589_vm0, %v2588_v0  ;;  %1860 = vmatpush3.bf16.msra.mxu0 %v2067_v3 }
 0x74b   : > { %1861 = vmatprep.subr.bf16.mxu0 %v2588_v0 }
 0x74e   : > { %1862 = vmatpush3.bf16.msra.mxu0 %v2068_v4 }
 0x74f   : > { %1863 = vmatprep.subr.bf16.mxu0 %v2588_v0 }
 0x81c   : > { %v1212_v51 = vpop.f32.mrb[8].mxu0 }
 0x81d   : > { %v1213_v52 = vadd.f32 %v1738_v50, %v1212_v51  ;;  %v1849_v53 = vpop.f32.mrb[9].mxu0 }
 0x81e   : > { %v1215_v54 = vpop.f32.mrb[10].mxu0 }
 0x81f   : > { %v1850_v55 = vpop.f32.mrb[11].mxu0  ;;  %v1218_v56 = vadd.f32 %v1213_v52, %v3128_v2  ;;  %v2069_v2 = vld [vmem:[#allocation18 + $0x10] sm:$0xff]  }
 0x820   : > { %1864 = vmatpush3.bf16.msra.mxu0 %v2069_v2 }
 0x821   : > { %v1221_v57 = vsel %vm1174_vm7, %v1218_v56, 0.0  ;;  %1865 = vmatprep.subr.bf16.mxu0 %v2588_v0 }
 0x822   : > { %1222 = vadd.xlane.f32.xlu0 %v1221_v57 }
 0x824   : > { %1866 = vmatpush3.bf16.msra.mxu0 %v2070_v5 }
 0x825   : > { %1867 = vmatprep.subr.bf16.mxu0 %v2588_v0 }
 0x828   : > { %1868 = vmatpush3.bf16.msra.mxu0 %v2071_v6 }
 0x829   : > { %1869 = vmatprep.subr.bf16.mxu0 %v2588_v0 }
 0x82c   : > { %1870 = vmatpush3.bf16.msra.mxu0 %v2072_v7 }
 0x82d   : > { %1871 = vmatprep.subr.bf16.mxu0 %v2588_v0 }
 0x830   : > { %1872 = vmatpush3.bf16.msra.mxu0 %v2073_v18 }
 0x831   : > { %1873 = vmatprep.subr.bf16.mxu0 %v2588_v0 }
 0x834   : > { %1874 = vmatpush3.bf16.msra.mxu0 %v2074_v19 }
 0x8af   : > { %v1223_v58 = vpop.xlane.xlu0 %1222 }
 0x8b0   : > { %v1225_v59 = vmul.f32 0.03125, %v1223_v58 }
 0x8b2   : > { %v1226_v60 = vsub.f32 %v1218_v56, %v1225_v59 }
 0x8b4   : > { %v1227_v61 = vmul.f32 %v1226_v60, %v1226_v60 }
 0x8b6   : > { %v1228_v62 = vsel %vm1174_vm7, %v1227_v61, 0.0 }
 0x8b7   : > { %1229 = vadd.xlane.f32.xlu1 %v1228_v62 }
 0x944   : > { %v1230_v8 = vpop.xlane.xlu1 %1229 }
 0x945   : > { %v1231_v9 = vmul.f32 0.03125, %v1230_v8 }
 0x947   : > { %v1232_v10 = vadd.f32 1e-05, %v1231_v9 }
 0x949   : > { %2091 = vrsqrt.f32 %v1232_v10 }
 0x953   : > { %v2092_v11 = vpop.eup %2091 }
 0x954   : > { %v1234_v13 = vmul.f32 %v2092_v11, %v1226_v60 }
 0x956   : > { %v1241_v15 = vmul.f32 %v1742_v12, %v1234_v13 }
 0x958   : > { %v1248_v16 = vadd.f32 %v1743_v14, %v1241_v15 }
 0x95a   : > { %v1249_v17 = vpack.c.bf16 %v1248_v16, %v1248_v16 }
 0x95c   : > { %1856 = vmatmul.mubr.msk.bf16.vlgmr.msra.gmra.mrb[24].mxu1 %vm1174_vm7, %v1249_v17 }
 0xa2f   : > { %v1310_v21 = vpop.f32.mrb[24].mxu1 }
 0xa30   : > { %v1311_v22 = vadd.f32 %v1744_v20, %v1310_v21  ;;  %v1857_v23 = vpop.f32.mrb[25].mxu1 }
 0xa31   : > { %v1313_v24 = vpop.f32.mrb[26].mxu1 }
 0xa32   : > { %v1316_v25 = vmax.f32 %v1311_v22, 0.0  ;;  %v1858_v26 = vpop.f32.mrb[27].mxu1 }
 0xa34   : > { %v1317_v27 = vpack.c.bf16 %v1316_v25, %v1316_v25 }
 0xa36   : > { %1876 = vmatmul.mubr.bf16.vlgmr.msra.gmra.mrb[12].mxu0 %v1317_v27 }
 0xb09   : > { %v1423_v29 = vpop.f32.mrb[12].mxu0 }
 0xb0a   : > { %v1424_v30 = vadd.f32 %v1748_v28, %v1423_v29  ;;  %v1877_v31 = vpop.f32.mrb[13].mxu0 }
 0xb0b   : > { %v1426_v32 = vpop.f32.mrb[14].mxu0 }
 0xb0c   : > { %v1878_v33 = vpop.f32.mrb[15].mxu0  ;;  %v1429_v34 = vadd.f32 %v1424_v30, %v1248_v16 }
 0xb0e   : > { %v1432_v0 = vsel %vm1174_vm7, %v1429_v34, 0.0 }
 0xb0f   : > { %1433 = vadd.xlane.f32.xlu0 %v1432_v0 }
 0xb9c   : > { %v1434_v35 = vpop.xlane.xlu0 %1433 }
 0xb9d   : > { %v1435_v36 = vmul.f32 0.03125, %v1434_v35 }
 0xb9f   : > { %v1436_v37 = vsub.f32 %v1429_v34, %v1435_v36 }
 0xba1   : > { %v1437_v38 = vmul.f32 %v1436_v37, %v1436_v37 }
 0xba3   : > { %v1438_v39 = vsel %vm1174_vm7, %v1437_v38, 0.0 }
 0xba4   : > { %1439 = vadd.xlane.f32.xlu0 %v1438_v39 }
 0xc31   : > { %v1440_v40 = vpop.xlane.xlu0 %1439 }
 0xc32   : > { %v1441_v41 = vmul.f32 0.03125, %v1440_v40 }
 0xc34   : > { %v1442_v42 = vadd.f32 1e-05, %v1441_v41 }
 0xc36   : > { %2093 = vrsqrt.f32 %v1442_v42 }
 0xc40   : > { %v2094_v43 = vpop.eup %2093 }
 0xc41   : > { %v1444_v45 = vmul.f32 %v2094_v43, %v1436_v37 }
 0xc43   : > { %v1451_v47 = vmul.f32 %v1757_v44, %v1444_v45 }
 0xc45   : > { %v1458_v48 = vadd.f32 %v1758_v46, %v1451_v47 }
 0xc47   : > { %1459 = vst.msk [vmem:[%s677_s15] sm:$0xff] %vm1174_vm7, %v1458_v48 }
 0xc48   : > { %2478 = shalt.err (!%p2475_p7)
}
 0xc49   : > { %s2479_s9 = scalar_lea.hbm %s3221_s23, 128  ;;  %s2483_s24 = scalar_lea.hbm %s3365_s11, 256 }
 0xc4a   : > { %p2480_p2 = scmp.ne.s32.totalorder %s3221_s23, %s2479_s9  ;;  %p2484_p6 = scmp.lt.u32.totalorder %s3221_s23, %s3365_s11 }
 0xc4b   : > { %p2485_p11 = scmp.lt.u32.totalorder %s2483_s24, %s2479_s9  ;;  %p2487_p3 = scmp.lt.u32.totalorder %s2479_s9, %s3221_s23 }
 0xc4c   : > { %p2481_p8 = pnand %p2480_p2, %p3366_p10 }
 0xc4d   : > { %p2486_p0 = por %p2485_p11, %p2484_p6 }
 0xc4e   : > { %p2482_p1 = pneg %p2481_p8 }
 0xc4f   : > { %p2488_p9 = por %p2487_p3, %p2486_p0 }
 0xc51   : > { %p2489_p5 = pnand %p2488_p9, %p2482_p1 }
 0xc53   : > { %2492 = shalt.err (!%p2489_p5)
}
 0xc54   : > { %1925 = dma.vmem_to_hbm [thread:$0]  (%p3366_p10), %s3223_s0, 128, %s3221_s23, %s1461_s7  }
 0xc55 PF: > { %s1487_s2 = sand.u32 1, %s2551_s25   ;;  %p3367_p12 = scmp.ne.s32.totalorder %s3334_s17, 0 }
 0xc56   : > { %p3368_p13 = scmp.ge.s32.totalorder %s2571_s30, 2  ;;  %s1488_s15 = scalar_lea.sflag [#allocation5], %s1487_s2 }
 0xc58   : > { %p1969_p4 = pnand %p3368_p13, %p3367_p12 }
 0xc5a   : > { %2546 = dma.done.wait (!%p1969_p4), %s1488_s15, 128  }
 0xc5b   : > { %2548 = vsyncadd (!%p1969_p4), %s1488_s15, 4294967168  ;;  %s37_s30 = sadd.s32 1, %s2571_s30   ;;  %s3369_s5 = sld [smem:[#allocation33_spill]] }
 0xc5c   : > { %p34_p7 = scmp.ge.s32.totalorder %s37_s30, 4   ;;  %s3370_s27 = sld [smem:[#allocation37_spill]] }
 0xc5d   : > { %s3371_s21 = sld [smem:[#allocation36_spill]]  ;;  %s3372_s25 = smov %s2555_s26 }
 0xc5e   : > { %s3374_s28 = smov %s2567_s29  ;;  %36 = sbr.rel (!%p34_p7) target bundleno = 25 (0x19), region = 181 }
 0xc61   : > { %s3373_s26 = smov %s3369_s5 }
 0xc63   : > { %s3375_s29 = smov %s3371_s21 }
 0xc65   :  { %1493 = vsyncpa [#allocation4], 1 }
 0xc66   :  { %1495 = vsyncpa [#allocation4 + $0x1], 1 }
 0xc67   :  { %1496 = vsyncpa [#allocation7], 1 }
 0xc68   :  { %1498 = vsyncpa [#allocation7 + $0x1], 1 }
 0xc69   :  { %1499 = vsyncpa [#allocation10], 1 }
 0xc6a   :  { %1500 = vsyncpa [#allocation13], 1 }
 0xc6b   :  { %1501 = vsyncpa [#allocation16], 1 }
 0xc6c   :  { %1502 = vsyncpa [#allocation19], 1 }
 0xc6d   :  { %1503 = vsyncpa [#allocation22], 1 }
 0xc6e   :  { %1504 = vsyncpa [#allocation5], 1 }
 0xc6f   :  { %1506 = vsyncpa [#allocation5 + $0x1], 1 }

</bundles_post_ra>
